<compile_context>
chip_gen: v7x
topology: tpu7x:2x2x1
jax: 0.10.0
libtpu: 0.0.40
codegen_flags: <defaults>
</compile_context>

<pallas_src>
import functools

import jax
import jax.numpy as jnp
from jax.experimental import pallas as pl
from jax.experimental.pallas import tpu as pltpu


# ----------------------------------------------------------------------------
# Fused CrossAttention kernel. One grid step = (batch element, Lq tile).
#   img_ref  : (1, Lq_tile, D)  f32
#   lang_ref : (1, Lk, D)       f32
#   wq/wk/wv : (D, Dp)          composed effective weights, (K, N) layout, head-padded
#   bq/bk/bv : (1, Dp)          composed effective biases (f32), head-padded
#   wo       : (Dp, D)          out_proj weight, rows head-padded, (K, N) layout
#   bo       : (1, D)           out_proj bias (f32)
#   bias_ref : (1, 1, Lk)       additive key-padding bias (0 / -inf), f32   [optional]
#   o_ref    : (1, Lq_tile, D)  f32 output
#   k2_s/v2_s: (Lk, Dp)         VMEM scratch, projected K/V reused across Lq tiles
#   oc_s     : (Lq_tile, Dp)    VMEM scratch, per-head output concat
# ----------------------------------------------------------------------------
def _fused_cross_attn_kernel(img_ref, lang_ref,
                             wq_ref, bq_ref, wk_ref, bk_ref, wv_ref, bv_ref,
                             wo_ref, bo_ref, *rest,
                             num_heads, head_dim_p, has_bias):
    if has_bias:
        bias_ref, o_ref, k2_s, v2_s, oc_s = rest
    else:
        bias_ref = None
        o_ref, k2_s, v2_s, oc_s = rest

    f32 = jnp.float32
    cdt = wq_ref.dtype                        # MXU compute dtype (f32 or bf16)
    Lq_t = img_ref.shape[1]
    Lk = lang_ref.shape[1]

    # K/V projections of the language stream: compute once per batch element
    # (Lq-tile axis is the inner "arbitrary" grid axis) and keep in VMEM scratch.
    @pl.when(pl.program_id(1) == 0)
    def _():
        x_lang = lang_ref[0].astype(cdt)                                           # (Lk, D)
        k2 = jnp.dot(x_lang, wk_ref[...], preferred_element_type=f32) + bk_ref[...]
        v2 = jnp.dot(x_lang, wv_ref[...], preferred_element_type=f32) + bv_ref[...]
        k2_s[...] = k2.astype(cdt)
        v2_s[...] = v2.astype(cdt)

    # Q projection; 1/sqrt(head_dim) is pre-folded into wq/bq. Cast once, before the loop.
    x_img = img_ref[0].astype(cdt)                                                 # (Lq_t, D)
    q2 = (jnp.dot(x_img, wq_ref[...], preferred_element_type=f32)
          + bq_ref[...]).astype(cdt)                                               # (Lq_t, Dp)

    if has_bias:
        bias = pl.broadcast_to(bias_ref[0].astype(f32), (Lq_t, Lk))   # hoisted, built once

    nt = (((1,), (1,)), ((), ()))             # q @ k^T without materializing k.T
    for h in range(num_heads):                # static unroll; slices are 128-lane aligned
        sl = slice(h * head_dim_p, (h + 1) * head_dim_p)
        s = jax.lax.dot_general(q2[:, sl], k2_s[:, sl], nt,
                                preferred_element_type=f32)                        # (Lq_t, Lk)
        if has_bias:
            s = s + bias
        s = s - jnp.max(s, axis=-1, keepdims=True)
        p = jnp.exp(s)
        p = p * pl.reciprocal(jnp.sum(p, axis=-1, keepdims=True), approx=True)
        oc_s[:, sl] = jnp.dot(p.astype(cdt), v2_s[:, sl],
                              preferred_element_type=f32).astype(cdt)

    # Single D-wide out_proj over the concatenated (head-padded) heads.
    out = jnp.dot(oc_s[...], wo_ref[...], preferred_element_type=f32) + bo_ref[...]
    o_ref[0] = out.astype(o_ref.dtype)


# ----------------------------------------------------------------------------
# One-time parameter preparation: compose chained linears, fold the attention
# scale into Q, pad head_dim to the 128-lane width, pre-transpose, cast.
# ----------------------------------------------------------------------------
def prepare_params(params, compute_dtype=jnp.float32):
    D = params["q_w"].shape[0]
    H = params["num_heads"]
    assert D % H == 0
    hd = D // H
    hdp = ((hd + 127) // 128) * 128           # padded head_dim (lane-aligned)
    Dp = H * hdp
    scale = 1.0 / float(hd) ** 0.5            # scale of the ORIGINAL head_dim

    wq_in, wk_in, wv_in = jnp.split(params["in_proj_w"], 3, axis=0)
    bq_in, bk_in, bv_in = jnp.split(params["in_proj_b"], 3, axis=0)

    def compose(w_in, b_in, w_outer, b_outer, s):
        # y = ((x @ w_outer^T + b_outer) @ w_in^T + b_in) * s
        w_eff_t = (w_in @ w_outer).T * s                    # (D, D), (K, N) layout
        b_eff = (w_in @ b_outer + b_in) * s                 # (D,)
        return w_eff_t, b_eff

    def pad_head_cols(w_t, b):
        # Output features are head-major; zero-pad each head group hd -> hdp.
        w_t = jnp.pad(w_t.reshape(D, H, hd), ((0, 0), (0, 0), (0, hdp - hd))).reshape(D, Dp)
        b = jnp.pad(b.reshape(H, hd), ((0, 0), (0, hdp - hd))).reshape(1, Dp)
        return w_t.astype(compute_dtype), b.astype(jnp.float32)

    wq_t, bq = compose(wq_in, bq_in, params["q_w"], params["q_b"], scale)
    wk_t, bk = compose(wk_in, bk_in, params["k_w"], params["k_b"], 1.0)
    wv_t, bv = compose(wv_in, bv_in, params["v_w"], params["v_b"], 1.0)
    wq_t, bq = pad_head_cols(wq_t, bq)
    wk_t, bk = pad_head_cols(wk_t, bk)
    wv_t, bv = pad_head_cols(wv_t, bv)

    # out_proj: pad its input-feature rows (head-major) hd -> hdp with zeros so the
    # padded V columns contribute exactly zero.
    wo_t = jnp.pad(params["out_w"].T.reshape(H, hd, D),
                   ((0, 0), (0, hdp - hd), (0, 0))).reshape(Dp, D)

    return {
        "num_heads": H, "head_dim_p": hdp,
        "wq_t": wq_t, "bq": bq,
        "wk_t": wk_t, "bk": bk,
        "wv_t": wv_t, "bv": bv,
        "wo_t": wo_t.astype(compute_dtype),
        "bo": params["out_b"].reshape(1, D).astype(jnp.float32),
    }


# ----------------------------------------------------------------------------
# Full CrossAttention forward — single pallas_call.
# ----------------------------------------------------------------------------
def cross_attention_forward(prepared, img_feats, lang_feats, key_padding_mask=None,
                            lq_tile=None):
    B, Lq, D = img_feats.shape
    Lk = lang_feats.shape[1]
    H = prepared["num_heads"]
    hdp = prepared["head_dim_p"]
    Dp = H * hdp
    cdt = prepared["wq_t"].dtype
    has_bias = key_padding_mask is not None

    # Lq tile: keep whole Lq for small inputs; otherwise largest divisor <= 512 that is a
    # multiple of 8 (sublane) so VMEM stays bounded and the pipeliner can overlap DMAs.
    if lq_tile is None:
        lq_tile = Lq
        if Lq > 512:
            for t in range(512, 7, -8):
                if Lq % t == 0:
                    lq_tile = t
                    break
    assert Lq % lq_tile == 0
    n_lq = Lq // lq_tile

    kernel = functools.partial(_fused_cross_attn_kernel,
                               num_heads=H, head_dim_p=hdp, has_bias=has_bias)

    operands = [img_feats, lang_feats,
                prepared["wq_t"], prepared["bq"],
                prepared["wk_t"], prepared["bk"],
                prepared["wv_t"], prepared["bv"],
                prepared["wo_t"], prepared["bo"]]
    if has_bias:
        bias = jnp.where(key_padding_mask, -jnp.inf, 0.0).astype(jnp.float32)
        operands.append(bias.reshape(B, 1, Lk))

    # VMEM budget sized from the actual footprint (worst case: double-buffered weights).
    itemsize = jnp.dtype(cdt).itemsize
    w_bytes = (3 * D * Dp + Dp * D) * itemsize + (3 * Dp + D) * 4
    act_bytes = 2 * (2 * lq_tile * D + Lk * D + (Lk if has_bias else 0)) * 4
    scratch_bytes = (2 * Lk * Dp + lq_tile * Dp) * itemsize
    tmp_bytes = lq_tile * Dp * 4 + 3 * lq_tile * max(Lk, 128) * 4
    total = 2 * w_bytes + act_bytes + scratch_bytes + tmp_bytes
    vmem_limit = int(min(100 << 20, max(32 << 20, int(total * 1.5))))

    def build_in_specs(single_buffer_weights):
        wkw = {"pipeline_mode": pl.Buffered(1)} if single_buffer_weights else {}

        def wspec(shape):
            return pl.BlockSpec(shape, lambda b, t: (0,) * len(shape), **wkw)

        specs = [
            pl.BlockSpec((1, lq_tile, D), lambda b, t: (b, t, 0)),   # img tile
            pl.BlockSpec((1, Lk, D), lambda b, t: (b, 0, 0)),        # lang (whole seq)
            wspec((D, Dp)), wspec((1, Dp)),                          # wq_t, bq
            wspec((D, Dp)), wspec((1, Dp)),                          # wk_t, bk
            wspec((D, Dp)), wspec((1, Dp)),                          # wv_t, bv
            wspec((Dp, D)), wspec((1, D)),                           # wo_t, bo
        ]
        if has_bias:
            specs.append(pl.BlockSpec((1, 1, Lk), lambda b, t: (b, 0, 0)))
        return specs

    out_spec = pl.BlockSpec((1, lq_tile, D), lambda b, t: (b, t, 0))
    scratch = [pltpu.VMEM((Lk, Dp), cdt),        # k2 (reused across Lq tiles)
               pltpu.VMEM((Lk, Dp), cdt),        # v2
               pltpu.VMEM((lq_tile, Dp), cdt)]   # per-head output concat

    def run(single_buffer_weights):
        return pl.pallas_call(
            kernel,
            out_shape=jax.ShapeDtypeStruct((B, Lq, D), img_feats.dtype),
            grid=(B, n_lq),
            in_specs=build_in_specs(single_buffer_weights),
            out_specs=out_spec,
            scratch_shapes=scratch,
            compiler_params=pltpu.CompilerParams(
                dimension_semantics=("parallel", "arbitrary"),
                vmem_limit_bytes=vmem_limit),
        )(*operands)

    try:
        return run(True)        # single-buffered constant weight blocks
    except Exception:
        # Fallback for jax versions that reject pl.Buffered(1); default double-buffering.
        return run(False)


# ----------------------------------------------------------------------------
# Pure-JAX reference (same math as the PyTorch module) for correctness check
# ----------------------------------------------------------------------------
def reference_forward(params, img_feats, lang_feats, key_padding_mask=None):
    B, Lq, D = img_feats.shape
    Lk = lang_feats.shape[1]
    H = params["num_heads"]
    hd = D // H

    lin = lambda x, w, b: x @ w.T + b
    q = lin(img_feats, params["q_w"], params["q_b"])
    k = lin(lang_feats, params["k_w"], params["k_b"])
    v = lin(lang_feats, params["v_w"], params["v_b"])

    wq, wk, wv = jnp.split(params["in_proj_w"], 3, axis=0)
    bq, bk, bv = jnp.split(params["in_proj_b"], 3, axis=0)
    q2 = lin(q, wq, bq).reshape(B, Lq, H, hd).transpose(0, 2, 1, 3)
    k2 = lin(k, wk, bk).reshape(B, Lk, H, hd).transpose(0, 2, 1, 3)
    v2 = lin(v, wv, bv).reshape(B, Lk, H, hd).transpose(0, 2, 1, 3)

    s = jnp.einsum("bhqd,bhkd->bhqk", q2, k2) / jnp.sqrt(jnp.float32(hd))
    if key_padding_mask is not None:
        s = s + jnp.where(key_padding_mask, -jnp.inf, 0.0)[:, None, None, :]
    p = jax.nn.softmax(s, axis=-1)
    o = jnp.einsum("bhqk,bhkd->bhqd", p, v2).transpose(0, 2, 1, 3).reshape(B, Lq, D)
    return lin(o, params["out_w"], params["out_b"])


# ----------------------------------------------------------------------------
def init_params(key, dim, num_heads):
    ks = jax.random.split(key, 10)
    n = lambda k, shape: (jax.random.normal(k, shape, jnp.float32) * 0.05)
    return {
        "num_heads": num_heads,
        "q_w": n(ks[0], (dim, dim)), "q_b": n(ks[1], (dim,)),
        "k_w": n(ks[2], (dim, dim)), "k_b": n(ks[3], (dim,)),
        "v_w": n(ks[4], (dim, dim)), "v_b": n(ks[5], (dim,)),
        "in_proj_w": n(ks[6], (3 * dim, dim)), "in_proj_b": n(ks[7], (3 * dim,)),
        "out_w": n(ks[8], (dim, dim)), "out_b": n(ks[9], (dim,)),
    }


if __name__ == "__main__":
    B, Lq, Lk, D, H = 2, 16, 8, 32, 8

    key = jax.random.PRNGKey(0)
    k_img, k_lang, k_par = jax.random.split(key, 3)
    img_feats = jax.random.normal(k_img, (B, Lq, D), jnp.float32)
    lang_feats = jax.random.normal(k_lang, (B, Lk, D), jnp.float32)
    params = init_params(k_par, D, H)

    ref = reference_forward(params, img_feats, lang_feats, key_padding_mask=None)

    # f32 compute path, no mask (mask-free specialized kernel)
    prep32 = prepare_params(params, jnp.float32)
    out32 = jax.block_until_ready(cross_attention_forward(prep32, img_feats, lang_feats))
    assert out32.shape == (B, Lq, D)
    assert jnp.allclose(out32, ref, rtol=5e-3, atol=2e-3), "f32 mismatch vs reference"

    # f32 compute path with a key_padding_mask (mask last 3 keys of batch 1)
    mask = jnp.zeros((B, Lk), jnp.bool_).at[1, -3:].set(True)
    out_m = jax.block_until_ready(
        cross_attention_forward(prep32, img_feats, lang_feats, key_padding_mask=mask))
    ref_m = reference_forward(params, img_feats, lang_feats, key_padding_mask=mask)
    assert jnp.allclose(out_m, ref_m, rtol=5e-3, atol=2e-3), "masked mismatch vs reference"

    # bf16 MXU path (v6e/v7x): looser tolerance, output still f32
    prep16 = prepare_params(params, jnp.bfloat16)
    out16 = jax.block_until_ready(cross_attention_forward(prep16, img_feats, lang_feats))
    assert jnp.allclose(out16, ref, rtol=5e-2, atol=5e-2), "bf16 mismatch vs reference"

    print("KERNEL_OK")
</pallas_src>

<mosaic_0001>
module attributes {stable_mosaic.version = 11 : i64} {
  func.func @_fused_cross_attn_kernel(%arg0: i32, %arg1: i32, %arg2: memref<1x16x32xf32, #tpu.memory_space<vmem>>, %arg3: memref<1x8x32xf32, #tpu.memory_space<vmem>>, %arg4: memref<32x1024xf32, #tpu.memory_space<vmem>>, %arg5: memref<1x1024xf32, #tpu.memory_space<vmem>>, %arg6: memref<32x1024xf32, #tpu.memory_space<vmem>>, %arg7: memref<1x1024xf32, #tpu.memory_space<vmem>>, %arg8: memref<32x1024xf32, #tpu.memory_space<vmem>>, %arg9: memref<1x1024xf32, #tpu.memory_space<vmem>>, %arg10: memref<1024x32xf32, #tpu.memory_space<vmem>>, %arg11: memref<1x32xf32, #tpu.memory_space<vmem>>, %arg12: memref<1x16x32xf32, #tpu.memory_space<vmem>>, %arg13: memref<8x1024xf32, #tpu.memory_space<vmem>>, %arg14: memref<8x1024xf32, #tpu.memory_space<vmem>>, %arg15: memref<16x1024xf32, #tpu.memory_space<vmem>>) attributes {dimension_semantics = [#tpu.dimension_semantics<parallel>, #tpu.dimension_semantics<arbitrary>], iteration_bounds = array<i64: 2, 1>, scalar_prefetch = 0 : i64, scratch_operands = 3 : i64, tpu.core_type = #tpu.core_type<tc>, window_params = [{transform_indices = @transform_0, window_bounds = array<i64: 1, 16, 32>}, {transform_indices = @transform_1, window_bounds = array<i64: 1, 8, 32>}, {pipeline_mode = #tpu.pipeline_mode<synchronous>, transform_indices = @transform_2, window_bounds = array<i64: 32, 1024>}, {pipeline_mode = #tpu.pipeline_mode<synchronous>, transform_indices = @transform_3, window_bounds = array<i64: 1, 1024>}, {pipeline_mode = #tpu.pipeline_mode<synchronous>, transform_indices = @transform_4, window_bounds = array<i64: 32, 1024>}, {pipeline_mode = #tpu.pipeline_mode<synchronous>, transform_indices = @transform_5, window_bounds = array<i64: 1, 1024>}, {pipeline_mode = #tpu.pipeline_mode<synchronous>, transform_indices = @transform_6, window_bounds = array<i64: 32, 1024>}, {pipeline_mode = #tpu.pipeline_mode<synchronous>, transform_indices = @transform_7, window_bounds = array<i64: 1, 1024>}, {pipeline_mode = #tpu.pipeline_mode<synchronous>, transform_indices = @transform_8, window_bounds = array<i64: 1024, 32>}, {pipeline_mode = #tpu.pipeline_mode<synchronous>, transform_indices = @transform_9, window_bounds = array<i64: 1, 32>}, {transform_indices = @transform_10, window_bounds = array<i64: 1, 16, 32>}]} {
    %c0_i32 = arith.constant 0 : i32
    %0 = arith.cmpi eq, %arg1, %c0_i32 : i32
    %1 = arith.extui %0 : i1 to i32
    %c0_i32_0 = arith.constant 0 : i32
    %2 = arith.cmpi ne, %1, %c0_i32_0 : i32
    scf.if %2 {
      %c0_90 = arith.constant 0 : index
      %c0_91 = arith.constant 0 : index
      %c0_92 = arith.constant 0 : index
      %147 = vector.load %arg3[%c0_90, %c0_91, %c0_92] : memref<1x8x32xf32, #tpu.memory_space<vmem>>, vector<1x8x32xf32>
      %148 = vector.shape_cast %147 : vector<1x8x32xf32> to vector<8x32xf32>
      %c0_93 = arith.constant 0 : index
      %c0_94 = arith.constant 0 : index
      %149 = vector.load %arg6[%c0_93, %c0_94] : memref<32x1024xf32, #tpu.memory_space<vmem>>, vector<32x1024xf32>
      %cst_95 = arith.constant dense<0.000000e+00> : vector<8x1024xf32>
      %150 = tpu.matmul %148, %149, %cst_95 {dimension_numbers = #tpu.dot_dimension_numbers<[1], [0], [0], [1], [0, 0, 1, 1], [], []>} : vector<8x32xf32>, vector<32x1024xf32>, vector<8x1024xf32> -> vector<8x1024xf32>
      %c0_96 = arith.constant 0 : index
      %c0_97 = arith.constant 0 : index
      %151 = vector.load %arg7[%c0_96, %c0_97] : memref<1x1024xf32, #tpu.memory_space<vmem>>, vector<1x1024xf32>
      %152 = vector.broadcast %151 : vector<1x1024xf32> to vector<8x1024xf32>
      %153 = arith.addf %150, %152 : vector<8x1024xf32>
      %c0_98 = arith.constant 0 : index
      %c0_99 = arith.constant 0 : index
      %154 = vector.load %arg8[%c0_98, %c0_99] : memref<32x1024xf32, #tpu.memory_space<vmem>>, vector<32x1024xf32>
      %cst_100 = arith.constant dense<0.000000e+00> : vector<8x1024xf32>
      %155 = tpu.matmul %148, %154, %cst_100 {dimension_numbers = #tpu.dot_dimension_numbers<[1], [0], [0], [1], [0, 0, 1, 1], [], []>} : vector<8x32xf32>, vector<32x1024xf32>, vector<8x1024xf32> -> vector<8x1024xf32>
      %c0_101 = arith.constant 0 : index
      %c0_102 = arith.constant 0 : index
      %156 = vector.load %arg9[%c0_101, %c0_102] : memref<1x1024xf32, #tpu.memory_space<vmem>>, vector<1x1024xf32>
      %157 = vector.broadcast %156 : vector<1x1024xf32> to vector<8x1024xf32>
      %158 = arith.addf %155, %157 : vector<8x1024xf32>
      %c0_103 = arith.constant 0 : index
      %c0_104 = arith.constant 0 : index
      %159 = vector.load %arg13[%c0_103, %c0_104] : memref<8x1024xf32, #tpu.memory_space<vmem>>, vector<8x1024xf32>
      tpu.vector_store %arg13[%c0_103, %c0_104], %153 {strides = array<i32>} : memref<8x1024xf32, #tpu.memory_space<vmem>>, vector<8x1024xf32>,
      %c0_105 = arith.constant 0 : index
      %c0_106 = arith.constant 0 : index
      %160 = vector.load %arg14[%c0_105, %c0_106] : memref<8x1024xf32, #tpu.memory_space<vmem>>, vector<8x1024xf32>
      tpu.vector_store %arg14[%c0_105, %c0_106], %158 {strides = array<i32>} : memref<8x1024xf32, #tpu.memory_space<vmem>>, vector<8x1024xf32>,
    } else {
    }
    %c0 = arith.constant 0 : index
    %c0_1 = arith.constant 0 : index
    %c0_2 = arith.constant 0 : index
    %3 = vector.load %arg2[%c0, %c0_1, %c0_2] : memref<1x16x32xf32, #tpu.memory_space<vmem>>, vector<1x16x32xf32>
    %4 = vector.shape_cast %3 : vector<1x16x32xf32> to vector<16x32xf32>
    %c0_3 = arith.constant 0 : index
    %c0_4 = arith.constant 0 : index
    %5 = vector.load %arg4[%c0_3, %c0_4] : memref<32x1024xf32, #tpu.memory_space<vmem>>, vector<32x1024xf32>
    %cst = arith.constant dense<0.000000e+00> : vector<16x1024xf32>
    %6 = tpu.matmul %4, %5, %cst {dimension_numbers = #tpu.dot_dimension_numbers<[1], [0], [0], [1], [0, 0, 1, 1], [], []>} : vector<16x32xf32>, vector<32x1024xf32>, vector<16x1024xf32> -> vector<16x1024xf32>
    %c0_5 = arith.constant 0 : index
    %c0_6 = arith.constant 0 : index
    %7 = vector.load %arg5[%c0_5, %c0_6] : memref<1x1024xf32, #tpu.memory_space<vmem>>, vector<1x1024xf32>
    %8 = vector.broadcast %7 : vector<1x1024xf32> to vector<16x1024xf32>
    %9 = arith.addf %6, %8 : vector<16x1024xf32>
    %10 = vector.extract_strided_slice %9 {offsets = [0, 0], sizes = [16, 128], strides = [1, 1]} : vector<16x1024xf32> to vector<16x128xf32>
    %c0_7 = arith.constant 0 : index
    %c0_8 = arith.constant 0 : index
    %11 = vector.load %arg13[%c0_7, %c0_8] : memref<8x1024xf32, #tpu.memory_space<vmem>>, vector<8x128xf32>
    %cst_9 = arith.constant dense<0.000000e+00> : vector<16x8xf32>
    %12 = tpu.matmul %10, %11, %cst_9 {dimension_numbers = #tpu.dot_dimension_numbers<[1], [1], [0], [0], [0, 0, 1, 0], [], []>} : vector<16x128xf32>, vector<8x128xf32>, vector<16x8xf32> -> vector<16x8xf32>
    %cst_10 = arith.constant dense<0xFF800000> : vector<16xf32>
    %13 = vector.multi_reduction <maximumf>, %12, %cst_10 [1] : vector<16x8xf32> to vector<16xf32>
    %14 = vector.shape_cast %13 : vector<16xf32> to vector<16x1xf32>
    %15 = vector.broadcast %14 : vector<16x1xf32> to vector<16x8xf32>
    %16 = arith.subf %12, %15 : vector<16x8xf32>
    %17 = math.exp %16 : vector<16x8xf32>
    %cst_11 = arith.constant dense<0.000000e+00> : vector<16xf32>
    %18 = vector.multi_reduction <add>, %17, %cst_11 [1] : vector<16x8xf32> to vector<16xf32>
    %19 = vector.shape_cast %18 : vector<16xf32> to vector<16x1xf32>
    %20 = tpu.reciprocal %19 {approx = true} : vector<16x1xf32> -> vector<16x1xf32>
    %21 = vector.broadcast %20 : vector<16x1xf32> to vector<16x8xf32>
    %22 = arith.mulf %17, %21 : vector<16x8xf32>
    %c0_12 = arith.constant 0 : index
    %c0_13 = arith.constant 0 : index
    %23 = vector.load %arg14[%c0_12, %c0_13] : memref<8x1024xf32, #tpu.memory_space<vmem>>, vector<8x128xf32>
    %cst_14 = arith.constant dense<0.000000e+00> : vector<16x128xf32>
    %24 = tpu.matmul %22, %23, %cst_14 {dimension_numbers = #tpu.dot_dimension_numbers<[1], [0], [0], [1], [0, 0, 1, 1], [], []>} : vector<16x8xf32>, vector<8x128xf32>, vector<16x128xf32> -> vector<16x128xf32>
    %c0_15 = arith.constant 0 : index
    %c0_16 = arith.constant 0 : index
    %25 = vector.load %arg15[%c0_15, %c0_16] : memref<16x1024xf32, #tpu.memory_space<vmem>>, vector<16x128xf32>
    tpu.vector_store %arg15[%c0_15, %c0_16], %24 {strides = array<i32>} : memref<16x1024xf32, #tpu.memory_space<vmem>>, vector<16x128xf32>,
    %26 = vector.extract_strided_slice %9 {offsets = [0, 128], sizes = [16, 128], strides = [1, 1]} : vector<16x1024xf32> to vector<16x128xf32>
    %c0_17 = arith.constant 0 : index
    %c128 = arith.constant 128 : index
    %27 = vector.load %arg13[%c0_17, %c128] : memref<8x1024xf32, #tpu.memory_space<vmem>>, vector<8x128xf32>
    %cst_18 = arith.constant dense<0.000000e+00> : vector<16x8xf32>
    %28 = tpu.matmul %26, %27, %cst_18 {dimension_numbers = #tpu.dot_dimension_numbers<[1], [1], [0], [0], [0, 0, 1, 0], [], []>} : vector<16x128xf32>, vector<8x128xf32>, vector<16x8xf32> -> vector<16x8xf32>
    %cst_19 = arith.constant dense<0xFF800000> : vector<16xf32>
    %29 = vector.multi_reduction <maximumf>, %28, %cst_19 [1] : vector<16x8xf32> to vector<16xf32>
    %30 = vector.shape_cast %29 : vector<16xf32> to vector<16x1xf32>
    %31 = vector.broadcast %30 : vector<16x1xf32> to vector<16x8xf32>
    %32 = arith.subf %28, %31 : vector<16x8xf32>
    %33 = math.exp %32 : vector<16x8xf32>
    %cst_20 = arith.constant dense<0.000000e+00> : vector<16xf32>
    %34 = vector.multi_reduction <add>, %33, %cst_20 [1] : vector<16x8xf32> to vector<16xf32>
    %35 = vector.shape_cast %34 : vector<16xf32> to vector<16x1xf32>
    %36 = tpu.reciprocal %35 {approx = true} : vector<16x1xf32> -> vector<16x1xf32>
    %37 = vector.broadcast %36 : vector<16x1xf32> to vector<16x8xf32>
    %38 = arith.mulf %33, %37 : vector<16x8xf32>
    %c0_21 = arith.constant 0 : index
    %c128_22 = arith.constant 128 : index
    %39 = vector.load %arg14[%c0_21, %c128_22] : memref<8x1024xf32, #tpu.memory_space<vmem>>, vector<8x128xf32>
    %cst_23 = arith.constant dense<0.000000e+00> : vector<16x128xf32>
    %40 = tpu.matmul %38, %39, %cst_23 {dimension_numbers = #tpu.dot_dimension_numbers<[1], [0], [0], [1], [0, 0, 1, 1], [], []>} : vector<16x8xf32>, vector<8x128xf32>, vector<16x128xf32> -> vector<16x128xf32>
    %c0_24 = arith.constant 0 : index
    %c128_25 = arith.constant 128 : index
    %41 = vector.load %arg15[%c0_24, %c128_25] : memref<16x1024xf32, #tpu.memory_space<vmem>>, vector<16x128xf32>
    tpu.vector_store %arg15[%c0_24, %c128_25], %40 {strides = array<i32>} : memref<16x1024xf32, #tpu.memory_space<vmem>>, vector<16x128xf32>,
    %42 = vector.extract_strided_slice %9 {offsets = [0, 256], sizes = [16, 128], strides = [1, 1]} : vector<16x1024xf32> to vector<16x128xf32>
    %c0_26 = arith.constant 0 : index
    %c256 = arith.constant 256 : index
    %43 = vector.load %arg13[%c0_26, %c256] : memref<8x1024xf32, #tpu.memory_space<vmem>>, vector<8x128xf32>
    %cst_27 = arith.constant dense<0.000000e+00> : vector<16x8xf32>
    %44 = tpu.matmul %42, %43, %cst_27 {dimension_numbers = #tpu.dot_dimension_numbers<[1], [1], [0], [0], [0, 0, 1, 0], [], []>} : vector<16x128xf32>, vector<8x128xf32>, vector<16x8xf32> -> vector<16x8xf32>
    %cst_28 = arith.constant dense<0xFF800000> : vector<16xf32>
    %45 = vector.multi_reduction <maximumf>, %44, %cst_28 [1] : vector<16x8xf32> to vector<16xf32>
    %46 = vector.shape_cast %45 : vector<16xf32> to vector<16x1xf32>
    %47 = vector.broadcast %46 : vector<16x1xf32> to vector<16x8xf32>
    %48 = arith.subf %44, %47 : vector<16x8xf32>
    %49 = math.exp %48 : vector<16x8xf32>
    %cst_29 = arith.constant dense<0.000000e+00> : vector<16xf32>
    %50 = vector.multi_reduction <add>, %49, %cst_29 [1] : vector<16x8xf32> to vector<16xf32>
    %51 = vector.shape_cast %50 : vector<16xf32> to vector<16x1xf32>
    %52 = tpu.reciprocal %51 {approx = true} : vector<16x1xf32> -> vector<16x1xf32>
    %53 = vector.broadcast %52 : vector<16x1xf32> to vector<16x8xf32>
    %54 = arith.mulf %49, %53 : vector<16x8xf32>
    %c0_30 = arith.constant 0 : index
    %c256_31 = arith.constant 256 : index
    %55 = vector.load %arg14[%c0_30, %c256_31] : memref<8x1024xf32, #tpu.memory_space<vmem>>, vector<8x128xf32>
    %cst_32 = arith.constant dense<0.000000e+00> : vector<16x128xf32>
    %56 = tpu.matmul %54, %55, %cst_32 {dimension_numbers = #tpu.dot_dimension_numbers<[1], [0], [0], [1], [0, 0, 1, 1], [], []>} : vector<16x8xf32>, vector<8x128xf32>, vector<16x128xf32> -> vector<16x128xf32>
    %c0_33 = arith.constant 0 : index
    %c256_34 = arith.constant 256 : index
    %57 = vector.load %arg15[%c0_33, %c256_34] : memref<16x1024xf32, #tpu.memory_space<vmem>>, vector<16x128xf32>
    tpu.vector_store %arg15[%c0_33, %c256_34], %56 {strides = array<i32>} : memref<16x1024xf32, #tpu.memory_space<vmem>>, vector<16x128xf32>,
    %58 = vector.extract_strided_slice %9 {offsets = [0, 384], sizes = [16, 128], strides = [1, 1]} : vector<16x1024xf32> to vector<16x128xf32>
    %c0_35 = arith.constant 0 : index
    %c384 = arith.constant 384 : index
    %59 = vector.load %arg13[%c0_35, %c384] : memref<8x1024xf32, #tpu.memory_space<vmem>>, vector<8x128xf32>
    %cst_36 = arith.constant dense<0.000000e+00> : vector<16x8xf32>
    %60 = tpu.matmul %58, %59, %cst_36 {dimension_numbers = #tpu.dot_dimension_numbers<[1], [1], [0], [0], [0, 0, 1, 0], [], []>} : vector<16x128xf32>, vector<8x128xf32>, vector<16x8xf32> -> vector<16x8xf32>
    %cst_37 = arith.constant dense<0xFF800000> : vector<16xf32>
    %61 = vector.multi_reduction <maximumf>, %60, %cst_37 [1] : vector<16x8xf32> to vector<16xf32>
    %62 = vector.shape_cast %61 : vector<16xf32> to vector<16x1xf32>
    %63 = vector.broadcast %62 : vector<16x1xf32> to vector<16x8xf32>
    %64 = arith.subf %60, %63 : vector<16x8xf32>
    %65 = math.exp %64 : vector<16x8xf32>
    %cst_38 = arith.constant dense<0.000000e+00> : vector<16xf32>
    %66 = vector.multi_reduction <add>, %65, %cst_38 [1] : vector<16x8xf32> to vector<16xf32>
    %67 = vector.shape_cast %66 : vector<16xf32> to vector<16x1xf32>
    %68 = tpu.reciprocal %67 {approx = true} : vector<16x1xf32> -> vector<16x1xf32>
    %69 = vector.broadcast %68 : vector<16x1xf32> to vector<16x8xf32>
    %70 = arith.mulf %65, %69 : vector<16x8xf32>
    %c0_39 = arith.constant 0 : index
    %c384_40 = arith.constant 384 : index
    %71 = vector.load %arg14[%c0_39, %c384_40] : memref<8x1024xf32, #tpu.memory_space<vmem>>, vector<8x128xf32>
    %cst_41 = arith.constant dense<0.000000e+00> : vector<16x128xf32>
    %72 = tpu.matmul %70, %71, %cst_41 {dimension_numbers = #tpu.dot_dimension_numbers<[1], [0], [0], [1], [0, 0, 1, 1], [], []>} : vector<16x8xf32>, vector<8x128xf32>, vector<16x128xf32> -> vector<16x128xf32>
    %c0_42 = arith.constant 0 : index
    %c384_43 = arith.constant 384 : index
    %73 = vector.load %arg15[%c0_42, %c384_43] : memref<16x1024xf32, #tpu.memory_space<vmem>>, vector<16x128xf32>
    tpu.vector_store %arg15[%c0_42, %c384_43], %72 {strides = array<i32>} : memref<16x1024xf32, #tpu.memory_space<vmem>>, vector<16x128xf32>,
    %74 = vector.extract_strided_slice %9 {offsets = [0, 512], sizes = [16, 128], strides = [1, 1]} : vector<16x1024xf32> to vector<16x128xf32>
    %c0_44 = arith.constant 0 : index
    %c512 = arith.constant 512 : index
    %75 = vector.load %arg13[%c0_44, %c512] : memref<8x1024xf32, #tpu.memory_space<vmem>>, vector<8x128xf32>
    %cst_45 = arith.constant dense<0.000000e+00> : vector<16x8xf32>
    %76 = tpu.matmul %74, %75, %cst_45 {dimension_numbers = #tpu.dot_dimension_numbers<[1], [1], [0], [0], [0, 0, 1, 0], [], []>} : vector<16x128xf32>, vector<8x128xf32>, vector<16x8xf32> -> vector<16x8xf32>
    %cst_46 = arith.constant dense<0xFF800000> : vector<16xf32>
    %77 = vector.multi_reduction <maximumf>, %76, %cst_46 [1] : vector<16x8xf32> to vector<16xf32>
    %78 = vector.shape_cast %77 : vector<16xf32> to vector<16x1xf32>
    %79 = vector.broadcast %78 : vector<16x1xf32> to vector<16x8xf32>
    %80 = arith.subf %76, %79 : vector<16x8xf32>
    %81 = math.exp %80 : vector<16x8xf32>
    %cst_47 = arith.constant dense<0.000000e+00> : vector<16xf32>
    %82 = vector.multi_reduction <add>, %81, %cst_47 [1] : vector<16x8xf32> to vector<16xf32>
    %83 = vector.shape_cast %82 : vector<16xf32> to vector<16x1xf32>
    %84 = tpu.reciprocal %83 {approx = true} : vector<16x1xf32> -> vector<16x1xf32>
    %85 = vector.broadcast %84 : vector<16x1xf32> to vector<16x8xf32>
    %86 = arith.mulf %81, %85 : vector<16x8xf32>
    %c0_48 = arith.constant 0 : index
    %c512_49 = arith.constant 512 : index
    %87 = vector.load %arg14[%c0_48, %c512_49] : memref<8x1024xf32, #tpu.memory_space<vmem>>, vector<8x128xf32>
    %cst_50 = arith.constant dense<0.000000e+00> : vector<16x128xf32>
    %88 = tpu.matmul %86, %87, %cst_50 {dimension_numbers = #tpu.dot_dimension_numbers<[1], [0], [0], [1], [0, 0, 1, 1], [], []>} : vector<16x8xf32>, vector<8x128xf32>, vector<16x128xf32> -> vector<16x128xf32>
    %c0_51 = arith.constant 0 : index
    %c512_52 = arith.constant 512 : index
    %89 = vector.load %arg15[%c0_51, %c512_52] : memref<16x1024xf32, #tpu.memory_space<vmem>>, vector<16x128xf32>
    tpu.vector_store %arg15[%c0_51, %c512_52], %88 {strides = array<i32>} : memref<16x1024xf32, #tpu.memory_space<vmem>>, vector<16x128xf32>,
    %90 = vector.extract_strided_slice %9 {offsets = [0, 640], sizes = [16, 128], strides = [1, 1]} : vector<16x1024xf32> to vector<16x128xf32>
    %c0_53 = arith.constant 0 : index
    %c640 = arith.constant 640 : index
    %91 = vector.load %arg13[%c0_53, %c640] : memref<8x1024xf32, #tpu.memory_space<vmem>>, vector<8x128xf32>
    %cst_54 = arith.constant dense<0.000000e+00> : vector<16x8xf32>
    %92 = tpu.matmul %90, %91, %cst_54 {dimension_numbers = #tpu.dot_dimension_numbers<[1], [1], [0], [0], [0, 0, 1, 0], [], []>} : vector<16x128xf32>, vector<8x128xf32>, vector<16x8xf32> -> vector<16x8xf32>
    %cst_55 = arith.constant dense<0xFF800000> : vector<16xf32>
    %93 = vector.multi_reduction <maximumf>, %92, %cst_55 [1] : vector<16x8xf32> to vector<16xf32>
    %94 = vector.shape_cast %93 : vector<16xf32> to vector<16x1xf32>
    %95 = vector.broadcast %94 : vector<16x1xf32> to vector<16x8xf32>
    %96 = arith.subf %92, %95 : vector<16x8xf32>
    %97 = math.exp %96 : vector<16x8xf32>
    %cst_56 = arith.constant dense<0.000000e+00> : vector<16xf32>
    %98 = vector.multi_reduction <add>, %97, %cst_56 [1] : vector<16x8xf32> to vector<16xf32>
    %99 = vector.shape_cast %98 : vector<16xf32> to vector<16x1xf32>
    %100 = tpu.reciprocal %99 {approx = true} : vector<16x1xf32> -> vector<16x1xf32>
    %101 = vector.broadcast %100 : vector<16x1xf32> to vector<16x8xf32>
    %102 = arith.mulf %97, %101 : vector<16x8xf32>
    %c0_57 = arith.constant 0 : index
    %c640_58 = arith.constant 640 : index
    %103 = vector.load %arg14[%c0_57, %c640_58] : memref<8x1024xf32, #tpu.memory_space<vmem>>, vector<8x128xf32>
    %cst_59 = arith.constant dense<0.000000e+00> : vector<16x128xf32>
    %104 = tpu.matmul %102, %103, %cst_59 {dimension_numbers = #tpu.dot_dimension_numbers<[1], [0], [0], [1], [0, 0, 1, 1], [], []>} : vector<16x8xf32>, vector<8x128xf32>, vector<16x128xf32> -> vector<16x128xf32>
    %c0_60 = arith.constant 0 : index
    %c640_61 = arith.constant 640 : index
    %105 = vector.load %arg15[%c0_60, %c640_61] : memref<16x1024xf32, #tpu.memory_space<vmem>>, vector<16x128xf32>
    tpu.vector_store %arg15[%c0_60, %c640_61], %104 {strides = array<i32>} : memref<16x1024xf32, #tpu.memory_space<vmem>>, vector<16x128xf32>,
    %106 = vector.extract_strided_slice %9 {offsets = [0, 768], sizes = [16, 128], strides = [1, 1]} : vector<16x1024xf32> to vector<16x128xf32>
    %c0_62 = arith.constant 0 : index
    %c768 = arith.constant 768 : index
    %107 = vector.load %arg13[%c0_62, %c768] : memref<8x1024xf32, #tpu.memory_space<vmem>>, vector<8x128xf32>
    %cst_63 = arith.constant dense<0.000000e+00> : vector<16x8xf32>
    %108 = tpu.matmul %106, %107, %cst_63 {dimension_numbers = #tpu.dot_dimension_numbers<[1], [1], [0], [0], [0, 0, 1, 0], [], []>} : vector<16x128xf32>, vector<8x128xf32>, vector<16x8xf32> -> vector<16x8xf32>
    %cst_64 = arith.constant dense<0xFF800000> : vector<16xf32>
    %109 = vector.multi_reduction <maximumf>, %108, %cst_64 [1] : vector<16x8xf32> to vector<16xf32>
    %110 = vector.shape_cast %109 : vector<16xf32> to vector<16x1xf32>
    %111 = vector.broadcast %110 : vector<16x1xf32> to vector<16x8xf32>
    %112 = arith.subf %108, %111 : vector<16x8xf32>
    %113 = math.exp %112 : vector<16x8xf32>
    %cst_65 = arith.constant dense<0.000000e+00> : vector<16xf32>
    %114 = vector.multi_reduction <add>, %113, %cst_65 [1] : vector<16x8xf32> to vector<16xf32>
    %115 = vector.shape_cast %114 : vector<16xf32> to vector<16x1xf32>
    %116 = tpu.reciprocal %115 {approx = true} : vector<16x1xf32> -> vector<16x1xf32>
    %117 = vector.broadcast %116 : vector<16x1xf32> to vector<16x8xf32>
    %118 = arith.mulf %113, %117 : vector<16x8xf32>
    %c0_66 = arith.constant 0 : index
    %c768_67 = arith.constant 768 : index
    %119 = vector.load %arg14[%c0_66, %c768_67] : memref<8x1024xf32, #tpu.memory_space<vmem>>, vector<8x128xf32>
    %cst_68 = arith.constant dense<0.000000e+00> : vector<16x128xf32>
    %120 = tpu.matmul %118, %119, %cst_68 {dimension_numbers = #tpu.dot_dimension_numbers<[1], [0], [0], [1], [0, 0, 1, 1], [], []>} : vector<16x8xf32>, vector<8x128xf32>, vector<16x128xf32> -> vector<16x128xf32>
    %c0_69 = arith.constant 0 : index
    %c768_70 = arith.constant 768 : index
    %121 = vector.load %arg15[%c0_69, %c768_70] : memref<16x1024xf32, #tpu.memory_space<vmem>>, vector<16x128xf32>
    tpu.vector_store %arg15[%c0_69, %c768_70], %120 {strides = array<i32>} : memref<16x1024xf32, #tpu.memory_space<vmem>>, vector<16x128xf32>,
    %122 = vector.extract_strided_slice %9 {offsets = [0, 896], sizes = [16, 128], strides = [1, 1]} : vector<16x1024xf32> to vector<16x128xf32>
    %c0_71 = arith.constant 0 : index
    %c896 = arith.constant 896 : index
    %123 = vector.load %arg13[%c0_71, %c896] : memref<8x1024xf32, #tpu.memory_space<vmem>>, vector<8x128xf32>
    %cst_72 = arith.constant dense<0.000000e+00> : vector<16x8xf32>
    %124 = tpu.matmul %122, %123, %cst_72 {dimension_numbers = #tpu.dot_dimension_numbers<[1], [1], [0], [0], [0, 0, 1, 0], [], []>} : vector<16x128xf32>, vector<8x128xf32>, vector<16x8xf32> -> vector<16x8xf32>
    %cst_73 = arith.constant dense<0xFF800000> : vector<16xf32>
    %125 = vector.multi_reduction <maximumf>, %124, %cst_73 [1] : vector<16x8xf32> to vector<16xf32>
    %126 = vector.shape_cast %125 : vector<16xf32> to vector<16x1xf32>
    %127 = vector.broadcast %126 : vector<16x1xf32> to vector<16x8xf32>
    %128 = arith.subf %124, %127 : vector<16x8xf32>
    %129 = math.exp %128 : vector<16x8xf32>
    %cst_74 = arith.constant dense<0.000000e+00> : vector<16xf32>
    %130 = vector.multi_reduction <add>, %129, %cst_74 [1] : vector<16x8xf32> to vector<16xf32>
    %131 = vector.shape_cast %130 : vector<16xf32> to vector<16x1xf32>
    %132 = tpu.reciprocal %131 {approx = true} : vector<16x1xf32> -> vector<16x1xf32>
    %133 = vector.broadcast %132 : vector<16x1xf32> to vector<16x8xf32>
    %134 = arith.mulf %129, %133 : vector<16x8xf32>
    %c0_75 = arith.constant 0 : index
    %c896_76 = arith.constant 896 : index
    %135 = vector.load %arg14[%c0_75, %c896_76] : memref<8x1024xf32, #tpu.memory_space<vmem>>, vector<8x128xf32>
    %cst_77 = arith.constant dense<0.000000e+00> : vector<16x128xf32>
    %136 = tpu.matmul %134, %135, %cst_77 {dimension_numbers = #tpu.dot_dimension_numbers<[1], [0], [0], [1], [0, 0, 1, 1], [], []>} : vector<16x8xf32>, vector<8x128xf32>, vector<16x128xf32> -> vector<16x128xf32>
    %c0_78 = arith.constant 0 : index
    %c896_79 = arith.constant 896 : index
    %137 = vector.load %arg15[%c0_78, %c896_79] : memref<16x1024xf32, #tpu.memory_space<vmem>>, vector<16x128xf32>
    tpu.vector_store %arg15[%c0_78, %c896_79], %136 {strides = array<i32>} : memref<16x1024xf32, #tpu.memory_space<vmem>>, vector<16x128xf32>,
    %c0_80 = arith.constant 0 : index
    %c0_81 = arith.constant 0 : index
    %138 = vector.load %arg15[%c0_80, %c0_81] : memref<16x1024xf32, #tpu.memory_space<vmem>>, vector<16x1024xf32>
    %c0_82 = arith.constant 0 : index
    %c0_83 = arith.constant 0 : index
    %139 = vector.load %arg10[%c0_82, %c0_83] : memref<1024x32xf32, #tpu.memory_space<vmem>>, vector<1024x32xf32>
    %cst_84 = arith.constant dense<0.000000e+00> : vector<16x32xf32>
    %140 = tpu.matmul %138, %139, %cst_84 {dimension_numbers = #tpu.dot_dimension_numbers<[1], [0], [0], [1], [0, 0, 1, 1], [], []>} : vector<16x1024xf32>, vector<1024x32xf32>, vector<16x32xf32> -> vector<16x32xf32>
    %c0_85 = arith.constant 0 : index
    %c0_86 = arith.constant 0 : index
    %141 = vector.load %arg11[%c0_85, %c0_86] : memref<1x32xf32, #tpu.memory_space<vmem>>, vector<1x32xf32>
    %142 = vector.broadcast %141 : vector<1x32xf32> to vector<16x32xf32>
    %143 = arith.addf %140, %142 : vector<16x32xf32>
    %c0_87 = arith.constant 0 : index
    %c0_88 = arith.constant 0 : index
    %c0_89 = arith.constant 0 : index
    %144 = vector.load %arg12[%c0_87, %c0_88, %c0_89] : memref<1x16x32xf32, #tpu.memory_space<vmem>>, vector<1x16x32xf32>
    %145 = vector.shape_cast %144 : vector<1x16x32xf32> to vector<16x32xf32>
    %146 = vector.shape_cast %143 : vector<16x32xf32> to vector<1x16x32xf32>
    tpu.vector_store %arg12[%c0_87, %c0_88, %c0_89], %146 {strides = array<i32>} : memref<1x16x32xf32, #tpu.memory_space<vmem>>, vector<1x16x32xf32>,
    return
  }
  func.func @transform_0(%arg0: i32, %arg1: i32) -> (i32, i32, i32) {
    %c0_i32 = arith.constant 0 : i32
    %c0_i32_0 = arith.constant 0 : i32
    return %arg0, %arg1, %c0_i32 : i32, i32, i32
  }
  func.func @transform_1(%arg0: i32, %arg1: i32) -> (i32, i32, i32) {
    %c0_i32 = arith.constant 0 : i32
    %c0_i32_0 = arith.constant 0 : i32
    %c0_i32_1 = arith.constant 0 : i32
    return %arg0, %c0_i32, %c0_i32_0 : i32, i32, i32
  }
  func.func @transform_2(%arg0: i32, %arg1: i32) -> (i32, i32) {
    %c0_i32 = arith.constant 0 : i32
    %c0_i32_0 = arith.constant 0 : i32
    %c0_i32_1 = arith.constant 0 : i32
    return %c0_i32, %c0_i32_0 : i32, i32
  }
  func.func @transform_3(%arg0: i32, %arg1: i32) -> (i32, i32) {
    %c0_i32 = arith.constant 0 : i32
    %c0_i32_0 = arith.constant 0 : i32
    %c0_i32_1 = arith.constant 0 : i32
    return %c0_i32, %c0_i32_0 : i32, i32
  }
  func.func @transform_4(%arg0: i32, %arg1: i32) -> (i32, i32) {
    %c0_i32 = arith.constant 0 : i32
    %c0_i32_0 = arith.constant 0 : i32
    %c0_i32_1 = arith.constant 0 : i32
    return %c0_i32, %c0_i32_0 : i32, i32
  }
  func.func @transform_5(%arg0: i32, %arg1: i32) -> (i32, i32) {
    %c0_i32 = arith.constant 0 : i32
    %c0_i32_0 = arith.constant 0 : i32
    %c0_i32_1 = arith.constant 0 : i32
    return %c0_i32, %c0_i32_0 : i32, i32
  }
  func.func @transform_6(%arg0: i32, %arg1: i32) -> (i32, i32) {
    %c0_i32 = arith.constant 0 : i32
    %c0_i32_0 = arith.constant 0 : i32
    %c0_i32_1 = arith.constant 0 : i32
    return %c0_i32, %c0_i32_0 : i32, i32
  }
  func.func @transform_7(%arg0: i32, %arg1: i32) -> (i32, i32) {
    %c0_i32 = arith.constant 0 : i32
    %c0_i32_0 = arith.constant 0 : i32
    %c0_i32_1 = arith.constant 0 : i32
    return %c0_i32, %c0_i32_0 : i32, i32
  }
  func.func @transform_8(%arg0: i32, %arg1: i32) -> (i32, i32) {
    %c0_i32 = arith.constant 0 : i32
    %c0_i32_0 = arith.constant 0 : i32
    %c0_i32_1 = arith.constant 0 : i32
    return %c0_i32, %c0_i32_0 : i32, i32
  }
  func.func @transform_9(%arg0: i32, %arg1: i32) -> (i32, i32) {
    %c0_i32 = arith.constant 0 : i32
    %c0_i32_0 = arith.constant 0 : i32
    %c0_i32_1 = arith.constant 0 : i32
    return %c0_i32, %c0_i32_0 : i32, i32
  }
  func.func @transform_10(%arg0: i32, %arg1: i32) -> (i32, i32, i32) {
    %c0_i32 = arith.constant 0 : i32
    %c0_i32_0 = arith.constant 0 : i32
    return %arg0, %arg1, %c0_i32 : i32, i32, i32
  }
}

module attributes {stable_mosaic.version = 11 : i64} {
  func.func @_fused_cross_attn_kernel(%arg0: i32, %arg1: i32, %arg2: memref<1x16x32xf32, #tpu.memory_space<vmem>>, %arg3: memref<1x8x32xf32, #tpu.memory_space<vmem>>, %arg4: memref<32x1024xf32, #tpu.memory_space<vmem>>, %arg5: memref<1x1024xf32, #tpu.memory_space<vmem>>, %arg6: memref<32x1024xf32, #tpu.memory_space<vmem>>, %arg7: memref<1x1024xf32, #tpu.memory_space<vmem>>, %arg8: memref<32x1024xf32, #tpu.memory_space<vmem>>, %arg9: memref<1x1024xf32, #tpu.memory_space<vmem>>, %arg10: memref<1024x32xf32, #tpu.memory_space<vmem>>, %arg11: memref<1x32xf32, #tpu.memory_space<vmem>>, %arg12: memref<1x16x32xf32, #tpu.memory_space<vmem>>, %arg13: memref<8x1024xf32, #tpu.memory_space<vmem>>, %arg14: memref<8x1024xf32, #tpu.memory_space<vmem>>, %arg15: memref<16x1024xf32, #tpu.memory_space<vmem>>) attributes {dimension_semantics = [#tpu.dimension_semantics<parallel>, #tpu.dimension_semantics<arbitrary>], iteration_bounds = array<i64: 2, 1>, scalar_prefetch = 0 : i64, scratch_operands = 3 : i64, tpu.core_type = #tpu.core_type<tc>, window_params = [{transform_indices = @transform_0, window_bounds = array<i64: 1, 16, 32>}, {transform_indices = @transform_1, window_bounds = array<i64: 1, 8, 32>}, {pipeline_mode = #tpu.pipeline_mode<synchronous>, transform_indices = @transform_2, window_bounds = array<i64: 32, 1024>}, {pipeline_mode = #tpu.pipeline_mode<synchronous>, transform_indices = @transform_3, window_bounds = array<i64: 1, 1024>}, {pipeline_mode = #tpu.pipeline_mode<synchronous>, transform_indices = @transform_4, window_bounds = array<i64: 32, 1024>}, {pipeline_mode = #tpu.pipeline_mode<synchronous>, transform_indices = @transform_5, window_bounds = array<i64: 1, 1024>}, {pipeline_mode = #tpu.pipeline_mode<synchronous>, transform_indices = @transform_6, window_bounds = array<i64: 32, 1024>}, {pipeline_mode = #tpu.pipeline_mode<synchronous>, transform_indices = @transform_7, window_bounds = array<i64: 1, 1024>}, {pipeline_mode = #tpu.pipeline_mode<synchronous>, transform_indices = @transform_8, window_bounds = array<i64: 1024, 32>}, {pipeline_mode = #tpu.pipeline_mode<synchronous>, transform_indices = @transform_9, window_bounds = array<i64: 1, 32>}, {transform_indices = @transform_10, window_bounds = array<i64: 1, 16, 32>}]} {
    %c0_i32 = arith.constant 0 : i32
    %0 = arith.cmpi eq, %arg1, %c0_i32 : i32
    %1 = arith.extui %0 : i1 to i32
    %c0_i32_0 = arith.constant 0 : i32
    %2 = arith.cmpi ne, %1, %c0_i32_0 : i32
    scf.if %2 {
      %c0_90 = arith.constant 0 : index
      %c0_91 = arith.constant 0 : index
      %c0_92 = arith.constant 0 : index
      %147 = vector.load %arg3[%c0_90, %c0_91, %c0_92] : memref<1x8x32xf32, #tpu.memory_space<vmem>>, vector<1x8x32xf32>
      %148 = vector.shape_cast %147 : vector<1x8x32xf32> to vector<8x32xf32>
      %c0_93 = arith.constant 0 : index
      %c0_94 = arith.constant 0 : index
      %149 = vector.load %arg6[%c0_93, %c0_94] : memref<32x1024xf32, #tpu.memory_space<vmem>>, vector<32x1024xf32>
      %cst_95 = arith.constant dense<0.000000e+00> : vector<8x1024xf32>
      %150 = tpu.matmul %148, %149, %cst_95 {dimension_numbers = #tpu.dot_dimension_numbers<[1], [0], [0], [1], [0, 0, 1, 1], [], []>} : vector<8x32xf32>, vector<32x1024xf32>, vector<8x1024xf32> -> vector<8x1024xf32>
      %c0_96 = arith.constant 0 : index
      %c0_97 = arith.constant 0 : index
      %151 = vector.load %arg7[%c0_96, %c0_97] : memref<1x1024xf32, #tpu.memory_space<vmem>>, vector<1x1024xf32>
      %152 = vector.broadcast %151 : vector<1x1024xf32> to vector<8x1024xf32>
      %153 = arith.addf %150, %152 : vector<8x1024xf32>
      %c0_98 = arith.constant 0 : index
      %c0_99 = arith.constant 0 : index
      %154 = vector.load %arg8[%c0_98, %c0_99] : memref<32x1024xf32, #tpu.memory_space<vmem>>, vector<32x1024xf32>
      %cst_100 = arith.constant dense<0.000000e+00> : vector<8x1024xf32>
      %155 = tpu.matmul %148, %154, %cst_100 {dimension_numbers = #tpu.dot_dimension_numbers<[1], [0], [0], [1], [0, 0, 1, 1], [], []>} : vector<8x32xf32>, vector<32x1024xf32>, vector<8x1024xf32> -> vector<8x1024xf32>
      %c0_101 = arith.constant 0 : index
      %c0_102 = arith.constant 0 : index
      %156 = vector.load %arg9[%c0_101, %c0_102] : memref<1x1024xf32, #tpu.memory_space<vmem>>, vector<1x1024xf32>
      %157 = vector.broadcast %156 : vector<1x1024xf32> to vector<8x1024xf32>
      %158 = arith.addf %155, %157 : vector<8x1024xf32>
      %c0_103 = arith.constant 0 : index
      %c0_104 = arith.constant 0 : index
      %159 = vector.load %arg13[%c0_103, %c0_104] : memref<8x1024xf32, #tpu.memory_space<vmem>>, vector<8x1024xf32>
      tpu.vector_store %arg13[%c0_103, %c0_104], %153 {strides = array<i32>} : memref<8x1024xf32, #tpu.memory_space<vmem>>, vector<8x1024xf32>,
      %c0_105 = arith.constant 0 : index
      %c0_106 = arith.constant 0 : index
      %160 = vector.load %arg14[%c0_105, %c0_106] : memref<8x1024xf32, #tpu.memory_space<vmem>>, vector<8x1024xf32>
      tpu.vector_store %arg14[%c0_105, %c0_106], %158 {strides = array<i32>} : memref<8x1024xf32, #tpu.memory_space<vmem>>, vector<8x1024xf32>,
    } else {
    }
    %c0 = arith.constant 0 : index
    %c0_1 = arith.constant 0 : index
    %c0_2 = arith.constant 0 : index
    %3 = vector.load %arg2[%c0, %c0_1, %c0_2] : memref<1x16x32xf32, #tpu.memory_space<vmem>>, vector<1x16x32xf32>
    %4 = vector.shape_cast %3 : vector<1x16x32xf32> to vector<16x32xf32>
    %c0_3 = arith.constant 0 : index
    %c0_4 = arith.constant 0 : index
    %5 = vector.load %arg4[%c0_3, %c0_4] : memref<32x1024xf32, #tpu.memory_space<vmem>>, vector<32x1024xf32>
    %cst = arith.constant dense<0.000000e+00> : vector<16x1024xf32>
    %6 = tpu.matmul %4, %5, %cst {dimension_numbers = #tpu.dot_dimension_numbers<[1], [0], [0], [1], [0, 0, 1, 1], [], []>} : vector<16x32xf32>, vector<32x1024xf32>, vector<16x1024xf32> -> vector<16x1024xf32>
    %c0_5 = arith.constant 0 : index
    %c0_6 = arith.constant 0 : index
    %7 = vector.load %arg5[%c0_5, %c0_6] : memref<1x1024xf32, #tpu.memory_space<vmem>>, vector<1x1024xf32>
    %8 = vector.broadcast %7 : vector<1x1024xf32> to vector<16x1024xf32>
    %9 = arith.addf %6, %8 : vector<16x1024xf32>
    %10 = vector.extract_strided_slice %9 {offsets = [0, 0], sizes = [16, 128], strides = [1, 1]} : vector<16x1024xf32> to vector<16x128xf32>
    %c0_7 = arith.constant 0 : index
    %c0_8 = arith.constant 0 : index
    %11 = vector.load %arg13[%c0_7, %c0_8] : memref<8x1024xf32, #tpu.memory_space<vmem>>, vector<8x128xf32>
    %cst_9 = arith.constant dense<0.000000e+00> : vector<16x8xf32>
    %12 = tpu.matmul %10, %11, %cst_9 {dimension_numbers = #tpu.dot_dimension_numbers<[1], [1], [0], [0], [0, 0, 1, 0], [], []>} : vector<16x128xf32>, vector<8x128xf32>, vector<16x8xf32> -> vector<16x8xf32>
    %cst_10 = arith.constant dense<0xFF800000> : vector<16xf32>
    %13 = vector.multi_reduction <maximumf>, %12, %cst_10 [1] : vector<16x8xf32> to vector<16xf32>
    %14 = vector.shape_cast %13 : vector<16xf32> to vector<16x1xf32>
    %15 = vector.broadcast %14 : vector<16x1xf32> to vector<16x8xf32>
    %16 = arith.subf %12, %15 : vector<16x8xf32>
    %17 = math.exp %16 : vector<16x8xf32>
    %cst_11 = arith.constant dense<0.000000e+00> : vector<16xf32>
    %18 = vector.multi_reduction <add>, %17, %cst_11 [1] : vector<16x8xf32> to vector<16xf32>
    %19 = vector.shape_cast %18 : vector<16xf32> to vector<16x1xf32>
    %20 = tpu.reciprocal %19 {approx = true} : vector<16x1xf32> -> vector<16x1xf32>
    %21 = vector.broadcast %20 : vector<16x1xf32> to vector<16x8xf32>
    %22 = arith.mulf %17, %21 : vector<16x8xf32>
    %c0_12 = arith.constant 0 : index
    %c0_13 = arith.constant 0 : index
    %23 = vector.load %arg14[%c0_12, %c0_13] : memref<8x1024xf32, #tpu.memory_space<vmem>>, vector<8x128xf32>
    %cst_14 = arith.constant dense<0.000000e+00> : vector<16x128xf32>
    %24 = tpu.matmul %22, %23, %cst_14 {dimension_numbers = #tpu.dot_dimension_numbers<[1], [0], [0], [1], [0, 0, 1, 1], [], []>} : vector<16x8xf32>, vector<8x128xf32>, vector<16x128xf32> -> vector<16x128xf32>
    %c0_15 = arith.constant 0 : index
    %c0_16 = arith.constant 0 : index
    %25 = vector.load %arg15[%c0_15, %c0_16] : memref<16x1024xf32, #tpu.memory_space<vmem>>, vector<16x128xf32>
    tpu.vector_store %arg15[%c0_15, %c0_16], %24 {strides = array<i32>} : memref<16x1024xf32, #tpu.memory_space<vmem>>, vector<16x128xf32>,
    %26 = vector.extract_strided_slice %9 {offsets = [0, 128], sizes = [16, 128], strides = [1, 1]} : vector<16x1024xf32> to vector<16x128xf32>
    %c0_17 = arith.constant 0 : index
    %c128 = arith.constant 128 : index
    %27 = vector.load %arg13[%c0_17, %c128] : memref<8x1024xf32, #tpu.memory_space<vmem>>, vector<8x128xf32>
    %cst_18 = arith.constant dense<0.000000e+00> : vector<16x8xf32>
    %28 = tpu.matmul %26, %27, %cst_18 {dimension_numbers = #tpu.dot_dimension_numbers<[1], [1], [0], [0], [0, 0, 1, 0], [], []>} : vector<16x128xf32>, vector<8x128xf32>, vector<16x8xf32> -> vector<16x8xf32>
    %cst_19 = arith.constant dense<0xFF800000> : vector<16xf32>
    %29 = vector.multi_reduction <maximumf>, %28, %cst_19 [1] : vector<16x8xf32> to vector<16xf32>
    %30 = vector.shape_cast %29 : vector<16xf32> to vector<16x1xf32>
    %31 = vector.broadcast %30 : vector<16x1xf32> to vector<16x8xf32>
    %32 = arith.subf %28, %31 : vector<16x8xf32>
    %33 = math.exp %32 : vector<16x8xf32>
    %cst_20 = arith.constant dense<0.000000e+00> : vector<16xf32>
    %34 = vector.multi_reduction <add>, %33, %cst_20 [1] : vector<16x8xf32> to vector<16xf32>
    %35 = vector.shape_cast %34 : vector<16xf32> to vector<16x1xf32>
    %36 = tpu.reciprocal %35 {approx = true} : vector<16x1xf32> -> vector<16x1xf32>
    %37 = vector.broadcast %36 : vector<16x1xf32> to vector<16x8xf32>
    %38 = arith.mulf %33, %37 : vector<16x8xf32>
    %c0_21 = arith.constant 0 : index
    %c128_22 = arith.constant 128 : index
    %39 = vector.load %arg14[%c0_21, %c128_22] : memref<8x1024xf32, #tpu.memory_space<vmem>>, vector<8x128xf32>
    %cst_23 = arith.constant dense<0.000000e+00> : vector<16x128xf32>
    %40 = tpu.matmul %38, %39, %cst_23 {dimension_numbers = #tpu.dot_dimension_numbers<[1], [0], [0], [1], [0, 0, 1, 1], [], []>} : vector<16x8xf32>, vector<8x128xf32>, vector<16x128xf32> -> vector<16x128xf32>
    %c0_24 = arith.constant 0 : index
    %c128_25 = arith.constant 128 : index
    %41 = vector.load %arg15[%c0_24, %c128_25] : memref<16x1024xf32, #tpu.memory_space<vmem>>, vector<16x128xf32>
    tpu.vector_store %arg15[%c0_24, %c128_25], %40 {strides = array<i32>} : memref<16x1024xf32, #tpu.memory_space<vmem>>, vector<16x128xf32>,
    %42 = vector.extract_strided_slice %9 {offsets = [0, 256], sizes = [16, 128], strides = [1, 1]} : vector<16x1024xf32> to vector<16x128xf32>
    %c0_26 = arith.constant 0 : index
    %c256 = arith.constant 256 : index
    %43 = vector.load %arg13[%c0_26, %c256] : memref<8x1024xf32, #tpu.memory_space<vmem>>, vector<8x128xf32>
    %cst_27 = arith.constant dense<0.000000e+00> : vector<16x8xf32>
    %44 = tpu.matmul %42, %43, %cst_27 {dimension_numbers = #tpu.dot_dimension_numbers<[1], [1], [0], [0], [0, 0, 1, 0], [], []>} : vector<16x128xf32>, vector<8x128xf32>, vector<16x8xf32> -> vector<16x8xf32>
    %cst_28 = arith.constant dense<0xFF800000> : vector<16xf32>
    %45 = vector.multi_reduction <maximumf>, %44, %cst_28 [1] : vector<16x8xf32> to vector<16xf32>
    %46 = vector.shape_cast %45 : vector<16xf32> to vector<16x1xf32>
    %47 = vector.broadcast %46 : vector<16x1xf32> to vector<16x8xf32>
    %48 = arith.subf %44, %47 : vector<16x8xf32>
    %49 = math.exp %48 : vector<16x8xf32>
    %cst_29 = arith.constant dense<0.000000e+00> : vector<16xf32>
    %50 = vector.multi_reduction <add>, %49, %cst_29 [1] : vector<16x8xf32> to vector<16xf32>
    %51 = vector.shape_cast %50 : vector<16xf32> to vector<16x1xf32>
    %52 = tpu.reciprocal %51 {approx = true} : vector<16x1xf32> -> vector<16x1xf32>
    %53 = vector.broadcast %52 : vector<16x1xf32> to vector<16x8xf32>
    %54 = arith.mulf %49, %53 : vector<16x8xf32>
    %c0_30 = arith.constant 0 : index
    %c256_31 = arith.constant 256 : index
    %55 = vector.load %arg14[%c0_30, %c256_31] : memref<8x1024xf32, #tpu.memory_space<vmem>>, vector<8x128xf32>
    %cst_32 = arith.constant dense<0.000000e+00> : vector<16x128xf32>
    %56 = tpu.matmul %54, %55, %cst_32 {dimension_numbers = #tpu.dot_dimension_numbers<[1], [0], [0], [1], [0, 0, 1, 1], [], []>} : vector<16x8xf32>, vector<8x128xf32>, vector<16x128xf32> -> vector<16x128xf32>
    %c0_33 = arith.constant 0 : index
    %c256_34 = arith.constant 256 : index
    %57 = vector.load %arg15[%c0_33, %c256_34] : memref<16x1024xf32, #tpu.memory_space<vmem>>, vector<16x128xf32>
    tpu.vector_store %arg15[%c0_33, %c256_34], %56 {strides = array<i32>} : memref<16x1024xf32, #tpu.memory_space<vmem>>, vector<16x128xf32>,
    %58 = vector.extract_strided_slice %9 {offsets = [0, 384], sizes = [16, 128], strides = [1, 1]} : vector<16x1024xf32> to vector<16x128xf32>
    %c0_35 = arith.constant 0 : index
    %c384 = arith.constant 384 : index
    %59 = vector.load %arg13[%c0_35, %c384] : memref<8x1024xf32, #tpu.memory_space<vmem>>, vector<8x128xf32>
    %cst_36 = arith.constant dense<0.000000e+00> : vector<16x8xf32>
    %60 = tpu.matmul %58, %59, %cst_36 {dimension_numbers = #tpu.dot_dimension_numbers<[1], [1], [0], [0], [0, 0, 1, 0], [], []>} : vector<16x128xf32>, vector<8x128xf32>, vector<16x8xf32> -> vector<16x8xf32>
    %cst_37 = arith.constant dense<0xFF800000> : vector<16xf32>
    %61 = vector.multi_reduction <maximumf>, %60, %cst_37 [1] : vector<16x8xf32> to vector<16xf32>
    %62 = vector.shape_cast %61 : vector<16xf32> to vector<16x1xf32>
    %63 = vector.broadcast %62 : vector<16x1xf32> to vector<16x8xf32>
    %64 = arith.subf %60, %63 : vector<16x8xf32>
    %65 = math.exp %64 : vector<16x8xf32>
    %cst_38 = arith.constant dense<0.000000e+00> : vector<16xf32>
    %66 = vector.multi_reduction <add>, %65, %cst_38 [1] : vector<16x8xf32> to vector<16xf32>
    %67 = vector.shape_cast %66 : vector<16xf32> to vector<16x1xf32>
    %68 = tpu.reciprocal %67 {approx = true} : vector<16x1xf32> -> vector<16x1xf32>
    %69 = vector.broadcast %68 : vector<16x1xf32> to vector<16x8xf32>
    %70 = arith.mulf %65, %69 : vector<16x8xf32>
    %c0_39 = arith.constant 0 : index
    %c384_40 = arith.constant 384 : index
    %71 = vector.load %arg14[%c0_39, %c384_40] : memref<8x1024xf32, #tpu.memory_space<vmem>>, vector<8x128xf32>
    %cst_41 = arith.constant dense<0.000000e+00> : vector<16x128xf32>
    %72 = tpu.matmul %70, %71, %cst_41 {dimension_numbers = #tpu.dot_dimension_numbers<[1], [0], [0], [1], [0, 0, 1, 1], [], []>} : vector<16x8xf32>, vector<8x128xf32>, vector<16x128xf32> -> vector<16x128xf32>
    %c0_42 = arith.constant 0 : index
    %c384_43 = arith.constant 384 : index
    %73 = vector.load %arg15[%c0_42, %c384_43] : memref<16x1024xf32, #tpu.memory_space<vmem>>, vector<16x128xf32>
    tpu.vector_store %arg15[%c0_42, %c384_43], %72 {strides = array<i32>} : memref<16x1024xf32, #tpu.memory_space<vmem>>, vector<16x128xf32>,
    %74 = vector.extract_strided_slice %9 {offsets = [0, 512], sizes = [16, 128], strides = [1, 1]} : vector<16x1024xf32> to vector<16x128xf32>
    %c0_44 = arith.constant 0 : index
    %c512 = arith.constant 512 : index
    %75 = vector.load %arg13[%c0_44, %c512] : memref<8x1024xf32, #tpu.memory_space<vmem>>, vector<8x128xf32>
    %cst_45 = arith.constant dense<0.000000e+00> : vector<16x8xf32>
    %76 = tpu.matmul %74, %75, %cst_45 {dimension_numbers = #tpu.dot_dimension_numbers<[1], [1], [0], [0], [0, 0, 1, 0], [], []>} : vector<16x128xf32>, vector<8x128xf32>, vector<16x8xf32> -> vector<16x8xf32>
    %cst_46 = arith.constant dense<0xFF800000> : vector<16xf32>
    %77 = vector.multi_reduction <maximumf>, %76, %cst_46 [1] : vector<16x8xf32> to vector<16xf32>
    %78 = vector.shape_cast %77 : vector<16xf32> to vector<16x1xf32>
    %79 = vector.broadcast %78 : vector<16x1xf32> to vector<16x8xf32>
    %80 = arith.subf %76, %79 : vector<16x8xf32>
    %81 = math.exp %80 : vector<16x8xf32>
    %cst_47 = arith.constant dense<0.000000e+00> : vector<16xf32>
    %82 = vector.multi_reduction <add>, %81, %cst_47 [1] : vector<16x8xf32> to vector<16xf32>
    %83 = vector.shape_cast %82 : vector<16xf32> to vector<16x1xf32>
    %84 = tpu.reciprocal %83 {approx = true} : vector<16x1xf32> -> vector<16x1xf32>
    %85 = vector.broadcast %84 : vector<16x1xf32> to vector<16x8xf32>
    %86 = arith.mulf %81, %85 : vector<16x8xf32>
    %c0_48 = arith.constant 0 : index
    %c512_49 = arith.constant 512 : index
    %87 = vector.load %arg14[%c0_48, %c512_49] : memref<8x1024xf32, #tpu.memory_space<vmem>>, vector<8x128xf32>
    %cst_50 = arith.constant dense<0.000000e+00> : vector<16x128xf32>
    %88 = tpu.matmul %86, %87, %cst_50 {dimension_numbers = #tpu.dot_dimension_numbers<[1], [0], [0], [1], [0, 0, 1, 1], [], []>} : vector<16x8xf32>, vector<8x128xf32>, vector<16x128xf32> -> vector<16x128xf32>
    %c0_51 = arith.constant 0 : index
    %c512_52 = arith.constant 512 : index
    %89 = vector.load %arg15[%c0_51, %c512_52] : memref<16x1024xf32, #tpu.memory_space<vmem>>, vector<16x128xf32>
    tpu.vector_store %arg15[%c0_51, %c512_52], %88 {strides = array<i32>} : memref<16x1024xf32, #tpu.memory_space<vmem>>, vector<16x128xf32>,
    %90 = vector.extract_strided_slice %9 {offsets = [0, 640], sizes = [16, 128], strides = [1, 1]} : vector<16x1024xf32> to vector<16x128xf32>
    %c0_53 = arith.constant 0 : index
    %c640 = arith.constant 640 : index
    %91 = vector.load %arg13[%c0_53, %c640] : memref<8x1024xf32, #tpu.memory_space<vmem>>, vector<8x128xf32>
    %cst_54 = arith.constant dense<0.000000e+00> : vector<16x8xf32>
    %92 = tpu.matmul %90, %91, %cst_54 {dimension_numbers = #tpu.dot_dimension_numbers<[1], [1], [0], [0], [0, 0, 1, 0], [], []>} : vector<16x128xf32>, vector<8x128xf32>, vector<16x8xf32> -> vector<16x8xf32>
    %cst_55 = arith.constant dense<0xFF800000> : vector<16xf32>
    %93 = vector.multi_reduction <maximumf>, %92, %cst_55 [1] : vector<16x8xf32> to vector<16xf32>
    %94 = vector.shape_cast %93 : vector<16xf32> to vector<16x1xf32>
    %95 = vector.broadcast %94 : vector<16x1xf32> to vector<16x8xf32>
    %96 = arith.subf %92, %95 : vector<16x8xf32>
    %97 = math.exp %96 : vector<16x8xf32>
    %cst_56 = arith.constant dense<0.000000e+00> : vector<16xf32>
    %98 = vector.multi_reduction <add>, %97, %cst_56 [1] : vector<16x8xf32> to vector<16xf32>
    %99 = vector.shape_cast %98 : vector<16xf32> to vector<16x1xf32>
    %100 = tpu.reciprocal %99 {approx = true} : vector<16x1xf32> -> vector<16x1xf32>
    %101 = vector.broadcast %100 : vector<16x1xf32> to vector<16x8xf32>
    %102 = arith.mulf %97, %101 : vector<16x8xf32>
    %c0_57 = arith.constant 0 : index
    %c640_58 = arith.constant 640 : index
    %103 = vector.load %arg14[%c0_57, %c640_58] : memref<8x1024xf32, #tpu.memory_space<vmem>>, vector<8x128xf32>
    %cst_59 = arith.constant dense<0.000000e+00> : vector<16x128xf32>
    %104 = tpu.matmul %102, %103, %cst_59 {dimension_numbers = #tpu.dot_dimension_numbers<[1], [0], [0], [1], [0, 0, 1, 1], [], []>} : vector<16x8xf32>, vector<8x128xf32>, vector<16x128xf32> -> vector<16x128xf32>
    %c0_60 = arith.constant 0 : index
    %c640_61 = arith.constant 640 : index
    %105 = vector.load %arg15[%c0_60, %c640_61] : memref<16x1024xf32, #tpu.memory_space<vmem>>, vector<16x128xf32>
    tpu.vector_store %arg15[%c0_60, %c640_61], %104 {strides = array<i32>} : memref<16x1024xf32, #tpu.memory_space<vmem>>, vector<16x128xf32>,
    %106 = vector.extract_strided_slice %9 {offsets = [0, 768], sizes = [16, 128], strides = [1, 1]} : vector<16x1024xf32> to vector<16x128xf32>
    %c0_62 = arith.constant 0 : index
    %c768 = arith.constant 768 : index
    %107 = vector.load %arg13[%c0_62, %c768] : memref<8x1024xf32, #tpu.memory_space<vmem>>, vector<8x128xf32>
    %cst_63 = arith.constant dense<0.000000e+00> : vector<16x8xf32>
    %108 = tpu.matmul %106, %107, %cst_63 {dimension_numbers = #tpu.dot_dimension_numbers<[1], [1], [0], [0], [0, 0, 1, 0], [], []>} : vector<16x128xf32>, vector<8x128xf32>, vector<16x8xf32> -> vector<16x8xf32>
    %cst_64 = arith.constant dense<0xFF800000> : vector<16xf32>
    %109 = vector.multi_reduction <maximumf>, %108, %cst_64 [1] : vector<16x8xf32> to vector<16xf32>
    %110 = vector.shape_cast %109 : vector<16xf32> to vector<16x1xf32>
    %111 = vector.broadcast %110 : vector<16x1xf32> to vector<16x8xf32>
    %112 = arith.subf %108, %111 : vector<16x8xf32>
    %113 = math.exp %112 : vector<16x8xf32>
    %cst_65 = arith.constant dense<0.000000e+00> : vector<16xf32>
    %114 = vector.multi_reduction <add>, %113, %cst_65 [1] : vector<16x8xf32> to vector<16xf32>
    %115 = vector.shape_cast %114 : vector<16xf32> to vector<16x1xf32>
    %116 = tpu.reciprocal %115 {approx = true} : vector<16x1xf32> -> vector<16x1xf32>
    %117 = vector.broadcast %116 : vector<16x1xf32> to vector<16x8xf32>
    %118 = arith.mulf %113, %117 : vector<16x8xf32>
    %c0_66 = arith.constant 0 : index
    %c768_67 = arith.constant 768 : index
    %119 = vector.load %arg14[%c0_66, %c768_67] : memref<8x1024xf32, #tpu.memory_space<vmem>>, vector<8x128xf32>
    %cst_68 = arith.constant dense<0.000000e+00> : vector<16x128xf32>
    %120 = tpu.matmul %118, %119, %cst_68 {dimension_numbers = #tpu.dot_dimension_numbers<[1], [0], [0], [1], [0, 0, 1, 1], [], []>} : vector<16x8xf32>, vector<8x128xf32>, vector<16x128xf32> -> vector<16x128xf32>
    %c0_69 = arith.constant 0 : index
    %c768_70 = arith.constant 768 : index
    %121 = vector.load %arg15[%c0_69, %c768_70] : memref<16x1024xf32, #tpu.memory_space<vmem>>, vector<16x128xf32>
    tpu.vector_store %arg15[%c0_69, %c768_70], %120 {strides = array<i32>} : memref<16x1024xf32, #tpu.memory_space<vmem>>, vector<16x128xf32>,
    %122 = vector.extract_strided_slice %9 {offsets = [0, 896], sizes = [16, 128], strides = [1, 1]} : vector<16x1024xf32> to vector<16x128xf32>
    %c0_71 = arith.constant 0 : index
    %c896 = arith.constant 896 : index
    %123 = vector.load %arg13[%c0_71, %c896] : memref<8x1024xf32, #tpu.memory_space<vmem>>, vector<8x128xf32>
    %cst_72 = arith.constant dense<0.000000e+00> : vector<16x8xf32>
    %124 = tpu.matmul %122, %123, %cst_72 {dimension_numbers = #tpu.dot_dimension_numbers<[1], [1], [0], [0], [0, 0, 1, 0], [], []>} : vector<16x128xf32>, vector<8x128xf32>, vector<16x8xf32> -> vector<16x8xf32>
    %cst_73 = arith.constant dense<0xFF800000> : vector<16xf32>
    %125 = vector.multi_reduction <maximumf>, %124, %cst_73 [1] : vector<16x8xf32> to vector<16xf32>
    %126 = vector.shape_cast %125 : vector<16xf32> to vector<16x1xf32>
    %127 = vector.broadcast %126 : vector<16x1xf32> to vector<16x8xf32>
    %128 = arith.subf %124, %127 : vector<16x8xf32>
    %129 = math.exp %128 : vector<16x8xf32>
    %cst_74 = arith.constant dense<0.000000e+00> : vector<16xf32>
    %130 = vector.multi_reduction <add>, %129, %cst_74 [1] : vector<16x8xf32> to vector<16xf32>
    %131 = vector.shape_cast %130 : vector<16xf32> to vector<16x1xf32>
    %132 = tpu.reciprocal %131 {approx = true} : vector<16x1xf32> -> vector<16x1xf32>
    %133 = vector.broadcast %132 : vector<16x1xf32> to vector<16x8xf32>
    %134 = arith.mulf %129, %133 : vector<16x8xf32>
    %c0_75 = arith.constant 0 : index
    %c896_76 = arith.constant 896 : index
    %135 = vector.load %arg14[%c0_75, %c896_76] : memref<8x1024xf32, #tpu.memory_space<vmem>>, vector<8x128xf32>
    %cst_77 = arith.constant dense<0.000000e+00> : vector<16x128xf32>
    %136 = tpu.matmul %134, %135, %cst_77 {dimension_numbers = #tpu.dot_dimension_numbers<[1], [0], [0], [1], [0, 0, 1, 1], [], []>} : vector<16x8xf32>, vector<8x128xf32>, vector<16x128xf32> -> vector<16x128xf32>
    %c0_78 = arith.constant 0 : index
    %c896_79 = arith.constant 896 : index
    %137 = vector.load %arg15[%c0_78, %c896_79] : memref<16x1024xf32, #tpu.memory_space<vmem>>, vector<16x128xf32>
    tpu.vector_store %arg15[%c0_78, %c896_79], %136 {strides = array<i32>} : memref<16x1024xf32, #tpu.memory_space<vmem>>, vector<16x128xf32>,
    %c0_80 = arith.constant 0 : index
    %c0_81 = arith.constant 0 : index
    %138 = vector.load %arg15[%c0_80, %c0_81] : memref<16x1024xf32, #tpu.memory_space<vmem>>, vector<16x1024xf32>
    %c0_82 = arith.constant 0 : index
    %c0_83 = arith.constant 0 : index
    %139 = vector.load %arg10[%c0_82, %c0_83] : memref<1024x32xf32, #tpu.memory_space<vmem>>, vector<1024x32xf32>
    %cst_84 = arith.constant dense<0.000000e+00> : vector<16x32xf32>
    %140 = tpu.matmul %138, %139, %cst_84 {dimension_numbers = #tpu.dot_dimension_numbers<[1], [0], [0], [1], [0, 0, 1, 1], [], []>} : vector<16x1024xf32>, vector<1024x32xf32>, vector<16x32xf32> -> vector<16x32xf32>
    %c0_85 = arith.constant 0 : index
    %c0_86 = arith.constant 0 : index
    %141 = vector.load %arg11[%c0_85, %c0_86] : memref<1x32xf32, #tpu.memory_space<vmem>>, vector<1x32xf32>
    %142 = vector.broadcast %141 : vector<1x32xf32> to vector<16x32xf32>
    %143 = arith.addf %140, %142 : vector<16x32xf32>
    %c0_87 = arith.constant 0 : index
    %c0_88 = arith.constant 0 : index
    %c0_89 = arith.constant 0 : index
    %144 = vector.load %arg12[%c0_87, %c0_88, %c0_89] : memref<1x16x32xf32, #tpu.memory_space<vmem>>, vector<1x16x32xf32>
    %145 = vector.shape_cast %144 : vector<1x16x32xf32> to vector<16x32xf32>
    %146 = vector.shape_cast %143 : vector<16x32xf32> to vector<1x16x32xf32>
    tpu.vector_store %arg12[%c0_87, %c0_88, %c0_89], %146 {strides = array<i32>} : memref<1x16x32xf32, #tpu.memory_space<vmem>>, vector<1x16x32xf32>,
    return
  }
  func.func @transform_0(%arg0: i32, %arg1: i32) -> (i32, i32, i32) {
    %c0_i32 = arith.constant 0 : i32
    %c0_i32_0 = arith.constant 0 : i32
    return %arg0, %arg1, %c0_i32 : i32, i32, i32
  }
  func.func @transform_1(%arg0: i32, %arg1: i32) -> (i32, i32, i32) {
    %c0_i32 = arith.constant 0 : i32
    %c0_i32_0 = arith.constant 0 : i32
    %c0_i32_1 = arith.constant 0 : i32
    return %arg0, %c0_i32, %c0_i32_0 : i32, i32, i32
  }
  func.func @transform_2(%arg0: i32, %arg1: i32) -> (i32, i32) {
    %c0_i32 = arith.constant 0 : i32
    %c0_i32_0 = arith.constant 0 : i32
    %c0_i32_1 = arith.constant 0 : i32
    return %c0_i32, %c0_i32_0 : i32, i32
  }
  func.func @transform_3(%arg0: i32, %arg1: i32) -> (i32, i32) {
    %c0_i32 = arith.constant 0 : i32
    %c0_i32_0 = arith.constant 0 : i32
    %c0_i32_1 = arith.constant 0 : i32
    return %c0_i32, %c0_i32_0 : i32, i32
  }
  func.func @transform_4(%arg0: i32, %arg1: i32) -> (i32, i32) {
    %c0_i32 = arith.constant 0 : i32
    %c0_i32_0 = arith.constant 0 : i32
    %c0_i32_1 = arith.constant 0 : i32
    return %c0_i32, %c0_i32_0 : i32, i32
  }
  func.func @transform_5(%arg0: i32, %arg1: i32) -> (i32, i32) {
    %c0_i32 = arith.constant 0 : i32
    %c0_i32_0 = arith.constant 0 : i32
    %c0_i32_1 = arith.constant 0 : i32
    return %c0_i32, %c0_i32_0 : i32, i32
  }
  func.func @transform_6(%arg0: i32, %arg1: i32) -> (i32, i32) {
    %c0_i32 = arith.constant 0 : i32
    %c0_i32_0 = arith.constant 0 : i32
    %c0_i32_1 = arith.constant 0 : i32
    return %c0_i32, %c0_i32_0 : i32, i32
  }
  func.func @transform_7(%arg0: i32, %arg1: i32) -> (i32, i32) {
    %c0_i32 = arith.constant 0 : i32
    %c0_i32_0 = arith.constant 0 : i32
    %c0_i32_1 = arith.constant 0 : i32
    return %c0_i32, %c0_i32_0 : i32, i32
  }
  func.func @transform_8(%arg0: i32, %arg1: i32) -> (i32, i32) {
    %c0_i32 = arith.constant 0 : i32
    %c0_i32_0 = arith.constant 0 : i32
    %c0_i32_1 = arith.constant 0 : i32
    return %c0_i32, %c0_i32_0 : i32, i32
  }
  func.func @transform_9(%arg0: i32, %arg1: i32) -> (i32, i32) {
    %c0_i32 = arith.constant 0 : i32
    %c0_i32_0 = arith.constant 0 : i32
    %c0_i32_1 = arith.constant 0 : i32
    return %c0_i32, %c0_i32_0 : i32, i32
  }
  func.func @transform_10(%arg0: i32, %arg1: i32) -> (i32, i32, i32) {
    %c0_i32 = arith.constant 0 : i32
    %c0_i32_0 = arith.constant 0 : i32
    return %arg0, %arg1, %c0_i32 : i32, i32, i32
  }
}

</mosaic_0001>

<bundles_post_ra>
// kernel: tpu_custom_call.1
= control target key start
LH: loop header
LB: loop body
LE: loop exit
PB: predicated region body
PF: predicated region fallthrough
CT: control target
= control target key end

     0   :  { %15 = vsyncpa [#allocation6], 0  ;;  %s5466_s0 = inlined_call_operand.vmem [shape: f32[2,16,32], index: 0, kind: input, shape index: {}]   ;;  %s5467_s1 = inlined_call_operand.vmem [shape: f32[2,8,32], index: 1, kind: input, shape index: {}]   ;;  %s5468_s2 = inlined_call_operand.vmem [shape: f32[32,1024], index: 2, kind: input, shape index: {}]   ;;  %s5469_s3 = inlined_call_operand.vmem [shape: f32[1,1024], index: 3, kind: input, shape index: {}]   ;;  %s5470_s4 = inlined_call_operand.vmem [shape: f32[32,1024], index: 4, kind: input, shape index: {}]   ;;  %s5471_s5 = inlined_call_operand.vmem [shape: f32[1,1024], index: 5, kind: input, shape index: {}]   ;;  %s5472_s6 = inlined_call_operand.vmem [shape: f32[32,1024], index: 6, kind: input, shape index: {}]   ;;  %s5473_s7 = inlined_call_operand.vmem [shape: f32[1,1024], index: 7, kind: input, shape index: {}]   ;;  %s5474_s8 = inlined_call_operand.vmem [shape: f32[1024,32], index: 8, kind: input, shape index: {}]   ;;  %s5475_s9 = inlined_call_operand.vmem [shape: f32[1,32], index: 9, kind: input, shape index: {}]   ;;  %s5476_s10 = inlined_call_operand.hbm [shape: f32[2,16,32], index: 10, kind: output, shape index: {}]  }
   0x1   :  { %17 = vsyncpa [#allocation6 + $0x1], 0  ;;  %s4369_s13 = smov 0   ;;  %s4371_s14 = smov 0  }
   0x2   :  { %s4373_s15 = smov 0   ;;  %s4375_s16 = smov 0  }
   0x3   :  { %s4377_s17 = smov 0   ;;  %s4379_s18 = smov 0  }
   0x4 LB: > { %5479 = sst [smem:[#allocation8_spill]] %s4304_s17  ;;  %s3555_s19 = sadd.s32 4294967295, %s4308_s18   ;;  %s4308_s18 = sphi %s4379_s18, %s23_s18   ;;  %s4304_s17 = sphi %s4377_s17, %s5486_s17   ;;  %s4300_s16 = sphi %s4375_s16, %s5485_s16   ;;  %s4296_s15 = sphi %s4373_s15, %s5489_s15   ;;  %s4292_s14 = sphi %s4371_s14, %s5488_s14   ;;  %s4288_s13 = sphi %s4369_s13, %s5487_s13  }
   0x5   : > { %s3556_s20 = sadd.s32 4294967294, %s4308_s18   ;;  %s35_s21 = sadd.s32 1, %s4304_s17 }
   0x6   : > { %s266_s22 = sadd.s32 1, %s4296_s15  ;;  %p37_p0 = scmp.ge.s32.totalorder %s35_s21, 2 }
   0x7   : > { %p276_p1 = scmp.ne.s32.totalorder %s4296_s15, %s4292_s14  ;;  %p277_p2 = scmp.eq.s32.totalorder %s3555_s19, 1 }
   0x8   : > { %p282_p3 = scmp.ne.s32.totalorder %s4292_s14, %s4288_s13  ;;  %s5491_s21 = smov (%p37_p0, %s35_s21), 0 }
   0x9   : > { %5480 = sst [smem:[#allocation9_spill]] %s5491_s21  ;;  %p4409_p4 = por %p277_p2, %p276_p1 }
   0xa   : > { %p283_p5 = scmp.eq.s32.totalorder %s3556_s20, 1  ;;  %s261_s24 = ssub.s32 %s4304_s17, %s5491_s21 }
   0xb   : > { %p3559_p6 = scmp.ge.s32.totalorder %s4308_s18, 1  ;;  %p264_p7 = scmp.eq.s32.totalorder %s261_s24, 0 }
   0xc   : > { %p4416_p8 = por %p283_p5, %p282_p3  ;;  %p345_p9 = scmp.lt.s32.totalorder %s4308_s18, 3 }
   0xd   : > { %s4422_s26 = scalar_select %p264_p7, %s4296_s15, %s266_s22  }
   0xe   : > { %p346_p10 = pnand %p3559_p6, %p345_p9 }
   0xf   : > { %5483 = sst [smem:[#allocation10_spill]] %s4422_s26  ;;  %v412_v0 = vld [vmem:[%s5470_s4 + $0x8] sm:$0xff] (!%p346_p10)  ;;  %v411_v2 = vld [vmem:[%s5470_s4] sm:$0xff] (!%p346_p10)  ;;  %p392_p11 = scmp.lt.s32.totalorder (!%p346_p10), %s4300_s16, 1  ;;  %v4310_v7 = vmov (!%p346_p10), 0.0   ;;  %v414_v12 = vld [vmem:[%s5470_s4 + $0x18] sm:$0xff] (!%p346_p10) }
  0x10   : > { %349 = sbr.rel (%p346_p10) target bundleno = 1304 (0x518), region = 60  ;;  %v420_v1 = vld [vmem:[%s5470_s4 + $0x48] sm:$0xff] (!%p346_p10)  ;;  %v419_v4 = vld [vmem:[%s5470_s4 + $0x40] sm:$0xff] (!%p346_p10)  ;;  %553 = vmatprep.mubr.f32.mxu0 (!%p346_p10), %v4310_v7  ;;  %624 = vmatprep.mubr.f32.mxu1 (!%p346_p10), %v4310_v7  ;;  %v422_v13 = vld [vmem:[%s5470_s4 + $0x58] sm:$0xff] (!%p346_p10)  ;;  %vm485_vm0 = vcmask (!%p346_p10), 261120   ;;  %vm1614_vm1 = vcmask (!%p346_p10), 64512  }
  0x11   : > { %v3884_v3 = vpack.c.bf16 (!%p346_p10), %v420_v1, %v412_v0  ;;  %v428_v5 = vld [vmem:[%s5470_s4 + $0x88] sm:$0xff] (!%p346_p10)  ;;  %v3886_v8 = vpack.c.bf16 (!%p346_p10), %v419_v4, %v411_v2  ;;  %v427_v10 = vld [vmem:[%s5470_s4 + $0x80] sm:$0xff] (!%p346_p10)  ;;  %v3892_v17 = vpack.c.bf16 (!%p346_p10), %v422_v13, %v414_v12  ;;  %v413_v18 = vld [vmem:[%s5470_s4 + $0x10] sm:$0xff] (!%p346_p10)  ;;  %s388_s30 = sand.u32 (!%p346_p10), 1, %s4292_s14   ;;  %s3603_s17 = sshll.u32 (!%p346_p10), %s4300_s16, 8 }
  0x12   : > { %v436_v6 = vld [vmem:[%s5470_s4 + $0xc8] sm:$0xff] (!%p346_p10)  ;;  %v435_v11 = vld [vmem:[%s5470_s4 + $0xc0] sm:$0xff] (!%p346_p10)  ;;  %v421_v19 = vld [vmem:[%s5470_s4 + $0x50] sm:$0xff] (!%p346_p10)  ;;  %s5420_s21 = scalar_lea.sflag (!%p346_p10), [#allocation6], %s388_s30 }
  0x13   : > { %v3888_v9 = vpack.c.bf16 (!%p346_p10), %v436_v6, %v428_v5  ;;  %3885 = vmatprep.subr.bf16.mxu0 (!%p346_p10), %v3884_v3  ;;  %v416_v14 = vld [vmem:[%s5470_s4 + $0x28] sm:$0xff] (!%p346_p10)  ;;  %v3890_v16 = vpack.c.bf16 (!%p346_p10), %v435_v11, %v427_v10  ;;  %v415_v20 = vld [vmem:[%s5470_s4 + $0x20] sm:$0xff] (!%p346_p10)  ;;  %v3894_v22 = vpack.c.bf16 (!%p346_p10), %v421_v19, %v413_v18  ;;  %v430_v24 = vld [vmem:[%s5470_s4 + $0x98] sm:$0xff] (!%p346_p10)  ;;  %3893 = vmatprep.subr.bf16.mxu1 (!%p346_p10), %v3892_v17 }
  0x14   : > { %v424_v15 = vld [vmem:[%s5470_s4 + $0x68] sm:$0xff] (!%p346_p10)  ;;  %3887 = vmatpush1.bf16.msra.mxu0 (!%p346_p10), %v3886_v8  ;;  %v423_v23 = vld [vmem:[%s5470_s4 + $0x60] sm:$0xff] (!%p346_p10)  ;;  %v438_v25 = vld [vmem:[%s5470_s4 + $0xd8] sm:$0xff] (!%p346_p10) }
  0x15   : > { %3889 = vmatprep.subr.bf16.mxu0 (!%p346_p10), %v3888_v9  ;;  %v3900_v21 = vpack.c.bf16 (!%p346_p10), %v424_v15, %v416_v14  ;;  %v3896_v26 = vpack.c.bf16 (!%p346_p10), %v438_v25, %v430_v24  ;;  %v432_v27 = vld [vmem:[%s5470_s4 + $0xa8] sm:$0xff] (!%p346_p10)  ;;  %3895 = vmatpush1.bf16.msra.mxu1 (!%p346_p10), %v3894_v22  ;;  %v429_v29 = vld [vmem:[%s5470_s4 + $0x90] sm:$0xff] (!%p346_p10)  ;;  %v3902_v32 = vpack.c.bf16 (!%p346_p10), %v423_v23, %v415_v20  ;;  %v418_v34 = vld [vmem:[%s5470_s4 + $0x38] sm:$0xff] (!%p346_p10) }
  0x16   : > { %v440_v28 = vld [vmem:[%s5470_s4 + $0xe8] sm:$0xff] (!%p346_p10)  ;;  %v437_v30 = vld [vmem:[%s5470_s4 + $0xd0] sm:$0xff] (!%p346_p10)  ;;  %v426_v35 = vld [vmem:[%s5470_s4 + $0x78] sm:$0xff] (!%p346_p10) }
  0x17   : > { %s4452_s19 = scalar_select %p392_p11, %s4300_s16, 1  ;;  %3897 = vmatprep.subr.bf16.mxu1 %v3896_v26  ;;  %v3898_v33 = vpack.c.bf16 %v437_v30, %v429_v29  ;;  %v3904_v36 = vpack.c.bf16 %v440_v28, %v432_v27  ;;  %v431_v37 = vld [vmem:[%s5470_s4 + $0xa0] sm:$0xff]  ;;  %v3908_v39 = vpack.c.bf16 %v426_v35, %v418_v34  ;;  %v417_v40 = vld [vmem:[%s5470_s4 + $0x30] sm:$0xff]  ;;  %v774_v41 = vld [vmem:[%s5472_s6 + $0x8] sm:$0xff] }
  0x18   : > { %3891 = vmatpush1.bf16.msra.mxu0 %v3890_v16  ;;  %v439_v38 = vld [vmem:[%s5470_s4 + $0xe0] sm:$0xff]  ;;  %v782_v42 = vld [vmem:[%s5472_s6 + $0x48] sm:$0xff]  ;;  %v425_v43 = vld [vmem:[%s5470_s4 + $0x70] sm:$0xff] }
  0x19   : > { %s3563_s11 = sshll.u32 %s4452_s19, 3  ;;  %3901 = vmatprep.subr.bf16.mxu0 %v3900_v21  ;;  %3899 = vmatpush1.bf16.msra.mxu1 %v3898_v33  ;;  %v3910_v44 = vpack.c.bf16 %v425_v43, %v417_v40  ;;  %v434_v45 = vld [vmem:[%s5470_s4 + $0xb8] sm:$0xff]  ;;  %v3906_v47 = vpack.c.bf16 %v439_v38, %v431_v37  ;;  %v433_v49 = vld [vmem:[%s5470_s4 + $0xb0] sm:$0xff]  ;;  %v3916_v51 = vpack.c.bf16 %v782_v42, %v774_v41  ;;  %v773_v52 = vld [vmem:[%s5472_s6] sm:$0xff]  ;;  %s3602_s27 = sshll.u32 %s4452_s19, 4 }
  0x1a   : > { %s404_s29 = scalar_lea.vmem %s5467_s1, %s3563_s11  ;;  %v442_v46 = vld [vmem:[%s5470_s4 + $0xf8] sm:$0xff]  ;;  %v441_v50 = vld [vmem:[%s5470_s4 + $0xf0] sm:$0xff]  ;;  %3909 = vmatprep.subr.bf16.mxu1 %v3908_v39  ;;  %v781_v53 = vld [vmem:[%s5472_s6 + $0x40] sm:$0xff]  ;;  %s399_s22 = scalar_lea.vmem %s5466_s0, %s3602_s27 }
  0x1b   : > { %v4500_v31 = vld [vmem:[%s404_s29] sm:$0xff]  ;;  %v3912_v48 = vpack.c.bf16 %v442_v46, %v434_v45  ;;  %v790_v54 = vld [vmem:[%s5472_s6 + $0x88] sm:$0xff]  ;;  %v776_v56 = vld [vmem:[%s5472_s6 + $0x18] sm:$0xff]  ;;  %v3914_v58 = vpack.c.bf16 %v441_v50, %v433_v49  ;;  %v3918_v59 = vpack.c.bf16 %v781_v53, %v773_v52  ;;  %s3560_s27 = sshll.u32 %s388_s30, 4  ;;  %s5415_s29 = scalar_lea.hbm %s5476_s10, %s3603_s17 }
  0x1c   : > { %3564 = vmatmul.mubr.msk.f32.vlgmr.msra.gmra.mrb[0].mxu0 %vm485_vm0, %v4500_v31  ;;  %3565 = vmatmul.mubr.msk.f32.vlgmr.msra.gmra.mrb[0].mxu1 %vm485_vm0, %v4500_v31  ;;  %v798_v55 = vld [vmem:[%s5472_s6 + $0xc8] sm:$0xff]  ;;  %v784_v57 = vld [vmem:[%s5472_s6 + $0x58] sm:$0xff]  ;;  %v789_v60 = vld [vmem:[%s5472_s6 + $0x80] sm:$0xff]  ;;  %s390_s12 = scalar_lea.vmem [#allocation5], %s3560_s27 }
  0x1d   : > { %3903 = vmatpush1.bf16.msra.mxu0 %v3902_v32  ;;  %695 = vmatprep.mubr.f32.mxu0 %v4310_v7  ;;  %v775_v61 = vld [vmem:[%s5472_s6 + $0x10] sm:$0xff]  ;;  %v3920_v63 = vpack.c.bf16 %v798_v55, %v790_v54  ;;  %v797_v0 = vld [vmem:[%s5472_s6 + $0xc0] sm:$0xff]  ;;  %v3924_v1 = vpack.c.bf16 %v784_v57, %v776_v56  ;;  %v792_v2 = vld [vmem:[%s5472_s6 + $0x98] sm:$0xff]  ;;  %s3464_s20 = sshll.u32 %s390_s12, 4  ;;  %s5417_s20 = int_to_ptr.vmem [resolvable:$true] %s3464_s20 }
  0x1e   : > { %3905 = vmatprep.subr.bf16.mxu0 %v3904_v36  ;;  %3911 = vmatpush1.bf16.msra.mxu1 %v3910_v44  ;;  %v783_v62 = vld [vmem:[%s5472_s6 + $0x50] sm:$0xff]  ;;  %v800_v3 = vld [vmem:[%s5472_s6 + $0xd8] sm:$0xff]  ;;  %v778_v4 = vld [vmem:[%s5472_s6 + $0x28] sm:$0xff]  ;;  %v3922_v8 = vpack.c.bf16 %v797_v0, %v789_v60  ;;  %s4230_s16 = scalar_lea.vmem %s5417_s20, 256 }
  0x1f   : > { %766 = vmatprep.mubr.f32.mxu1 %v4310_v7  ;;  %3913 = vmatprep.subr.bf16.mxu1 %v3912_v48  ;;  %v786_v5 = vld [vmem:[%s5472_s6 + $0x68] sm:$0xff]  ;;  %v3926_v6 = vpack.c.bf16 %v783_v62, %v775_v61  ;;  %v3928_v9 = vpack.c.bf16 %v800_v3, %v792_v2  ;;  %v791_v10 = vld [vmem:[%s5472_s6 + $0x90] sm:$0xff]  ;;  %v777_v13 = vld [vmem:[%s5472_s6 + $0x20] sm:$0xff]  ;;  %p4231_p12 = scmp.ne.s32.totalorder %s5417_s20, %s4230_s16 }
  0x20   : > { %v799_v11 = vld [vmem:[%s5472_s6 + $0xd0] sm:$0xff]  ;;  %v3932_v12 = vpack.c.bf16 %v786_v5, %v778_v4  ;;  %v785_v14 = vld [vmem:[%s5472_s6 + $0x60] sm:$0xff]  ;;  %v794_v15 = vld [vmem:[%s5472_s6 + $0xa8] sm:$0xff] }
  0x21   : > { %3907 = vmatpush1.bf16.msra.mxu0 %v3906_v47  ;;  %v802_v16 = vld [vmem:[%s5472_s6 + $0xe8] sm:$0xff]  ;;  %v780_v17 = vld [vmem:[%s5472_s6 + $0x38] sm:$0xff]  ;;  %v3930_v19 = vpack.c.bf16 %v799_v11, %v791_v10  ;;  %v3934_v20 = vpack.c.bf16 %v785_v14, %v777_v13  ;;  %v793_v21 = vld [vmem:[%s5472_s6 + $0xa0] sm:$0xff]  ;;  %p4232_p13 = pnand %p4231_p12, %p4409_p4 }
  0x22   : > { %3917 = vmatprep.subr.bf16.mxu0 %v3916_v51  ;;  %3915 = vmatpush1.bf16.msra.mxu1 %v3914_v58  ;;  %v788_v18 = vld [vmem:[%s5472_s6 + $0x78] sm:$0xff]  ;;  %v779_v22 = vld [vmem:[%s5472_s6 + $0x30] sm:$0xff]  ;;  %v3936_v24 = vpack.c.bf16 %v802_v16, %v794_v15  ;;  %v801_v25 = vld [vmem:[%s5472_s6 + $0xe0] sm:$0xff] }
  0x23   : > { %3925 = vmatprep.subr.bf16.mxu1 %v3924_v1  ;;  %v787_v23 = vld [vmem:[%s5472_s6 + $0x70] sm:$0xff]  ;;  %v3940_v26 = vpack.c.bf16 %v788_v18, %v780_v17  ;;  %v796_v27 = vld [vmem:[%s5472_s6 + $0xb8] sm:$0xff]  ;;  %v1150_v29 = vld [vmem:[%s5468_s2 + $0x8] sm:$0xff]  ;;  %v3938_v33 = vpack.c.bf16 %v801_v25, %v793_v21  ;;  %p4233_p0 = pneg %p4232_p13 }
  0x24   : > { %3566 = vmatmul.mubr.msk.f32.vlgmr.msra.gmra.mrb[2].mxu0 %vm485_vm0, %v4500_v31  ;;  %v804_v28 = vld [vmem:[%s5472_s6 + $0xf8] sm:$0xff]  ;;  %v1158_v30 = vld [vmem:[%s5468_s2 + $0x48] sm:$0xff]  ;;  %v3942_v32 = vpack.c.bf16 %v787_v23, %v779_v22  ;;  %v795_v35 = vld [vmem:[%s5472_s6 + $0xb0] sm:$0xff]  ;;  %v445_v22 = vlaneseq }
  0x25   : > { %3919 = vmatpush1.bf16.msra.mxu0 %v3918_v59  ;;  %911 = vmatprep.mubr.f32.mxu0 %v4310_v7  ;;  %v3944_v34 = vpack.c.bf16 %v804_v28, %v796_v27  ;;  %v803_v36 = vld [vmem:[%s5472_s6 + $0xf0] sm:$0xff]  ;;  %v3948_v37 = vpack.c.bf16 %v1158_v30, %v1150_v29  ;;  %v1149_v38 = vld [vmem:[%s5468_s2] sm:$0xff]  ;;  %v1166_v40 = vld [vmem:[%s5468_s2 + $0x88] sm:$0xff] }
  0x26   : > { %3921 = vmatprep.subr.bf16.mxu0 %v3920_v63  ;;  %3567 = vmatmul.mubr.msk.f32.vlgmr.msra.gmra.mrb[2].mxu1 %vm485_vm0, %v4500_v31  ;;  %v1157_v39 = vld [vmem:[%s5468_s2 + $0x40] sm:$0xff]  ;;  %v1174_v41 = vld [vmem:[%s5468_s2 + $0xc8] sm:$0xff]  ;;  %v1152_v42 = vld [vmem:[%s5468_s2 + $0x18] sm:$0xff]  ;;  %v3946_v44 = vpack.c.bf16 %v803_v36, %v795_v35  ;;  %v446_v23 = vshrl.u32 %v445_v22, 7 }
  0x27   : > { %3927 = vmatpush1.bf16.msra.mxu1 %v3926_v6  ;;  %982 = vmatprep.mubr.f32.mxu1 %v4310_v7  ;;  %v1160_v43 = vld [vmem:[%s5468_s2 + $0x58] sm:$0xff]  ;;  %v3950_v45 = vpack.c.bf16 %v1157_v39, %v1149_v38  ;;  %v1165_v46 = vld [vmem:[%s5468_s2 + $0x80] sm:$0xff]  ;;  %v1151_v47 = vld [vmem:[%s5468_s2 + $0x10] sm:$0xff]  ;;  %v3952_v49 = vpack.c.bf16 %v1174_v41, %v1166_v40 }
  0x28   : > { %3929 = vmatprep.subr.bf16.mxu1 %v3928_v9  ;;  %v1159_v48 = vld [vmem:[%s5468_s2 + $0x50] sm:$0xff]  ;;  %v1173_v50 = vld [vmem:[%s5468_s2 + $0xc0] sm:$0xff]  ;;  %v3956_v51 = vpack.c.bf16 %v1160_v43, %v1152_v42  ;;  %v1168_v52 = vld [vmem:[%s5468_s2 + $0x98] sm:$0xff]  ;;  %v4772_v27 = vsub.s32 5, %v446_v23  ;;  %v4774_v28 = vsub.s32 2, %v446_v23  ;;  %v4776_v29 = vsub.s32 3, %v446_v23 }
  0x29   : > { %3923 = vmatpush1.bf16.msra.mxu0 %v3922_v8  ;;  %v1176_v53 = vld [vmem:[%s5468_s2 + $0xd8] sm:$0xff]  ;;  %v1154_v54 = vld [vmem:[%s5468_s2 + $0x28] sm:$0xff]  ;;  %v3958_v56 = vpack.c.bf16 %v1159_v48, %v1151_v47  ;;  %v3954_v57 = vpack.c.bf16 %v1173_v50, %v1165_v46  ;;  %v1167_v59 = vld [vmem:[%s5468_s2 + $0x90] sm:$0xff]  ;;  %v451_v39 = vsub.s32 1, %v446_v23 }
  0x2a   : > { %3933 = vmatprep.subr.bf16.mxu0 %v3932_v12  ;;  %v1162_v55 = vld [vmem:[%s5468_s2 + $0x68] sm:$0xff]  ;;  %v3960_v58 = vpack.c.bf16 %v1176_v53, %v1168_v52  ;;  %v1175_v60 = vld [vmem:[%s5468_s2 + $0xd0] sm:$0xff]  ;;  %v1153_v62 = vld [vmem:[%s5468_s2 + $0x20] sm:$0xff] }
  0x2b   : > { %3931 = vmatpush1.bf16.msra.mxu1 %v3930_v19  ;;  %v3964_v61 = vpack.c.bf16 %v1162_v55, %v1154_v54  ;;  %v1161_v63 = vld [vmem:[%s5468_s2 + $0x60] sm:$0xff]  ;;  %v1170_v0 = vld [vmem:[%s5468_s2 + $0xa8] sm:$0xff]  ;;  %v1156_v2 = vld [vmem:[%s5468_s2 + $0x38] sm:$0xff]  ;;  %v3962_v4 = vpack.c.bf16 %v1175_v60, %v1167_v59 }
  0x2c   : > { %3568 = vmatmul.mubr.msk.f32.vlgmr.msra.gmra.mrb[4].mxu0 %vm485_vm0, %v4500_v31  ;;  %3941 = vmatprep.subr.bf16.mxu1 %v3940_v26  ;;  %v1178_v1 = vld [vmem:[%s5468_s2 + $0xe8] sm:$0xff]  ;;  %v1164_v3 = vld [vmem:[%s5468_s2 + $0x78] sm:$0xff]  ;;  %v1147_v5 = vld [vmem:[%s399_s22] sm:$0xff] }
  0x2d   : > { %3935 = vmatpush1.bf16.msra.mxu0 %v3934_v20  ;;  %1053 = vmatprep.mubr.f32.mxu0 %v4310_v7  ;;  %v3968_v6 = vpack.c.bf16 %v1178_v1, %v1170_v0  ;;  %v1169_v8 = vld [vmem:[%s5468_s2 + $0xa0] sm:$0xff]  ;;  %v3972_v10 = vpack.c.bf16 %v1164_v3, %v1156_v2  ;;  %v1155_v11 = vld [vmem:[%s5468_s2 + $0x30] sm:$0xff]  ;;  %v1172_v13 = vld [vmem:[%s5468_s2 + $0xb8] sm:$0xff] }
  0x2e   : > { %3937 = vmatprep.subr.bf16.mxu0 %v3936_v24  ;;  %3569 = vmatmul.mubr.msk.f32.vlgmr.msra.gmra.mrb[4].mxu1 %vm485_vm0, %v4500_v31  ;;  %v1177_v9 = vld [vmem:[%s5468_s2 + $0xe0] sm:$0xff]  ;;  %v1163_v12 = vld [vmem:[%s5468_s2 + $0x70] sm:$0xff]  ;;  %v1180_v14 = vld [vmem:[%s5468_s2 + $0xf8] sm:$0xff]  ;;  %v4766_v24 = vsub.s32 4, %v446_v23 }
  0x2f   : > { %3943 = vmatpush1.bf16.msra.mxu1 %v3942_v32  ;;  %1124 = vmatprep.mubr.f32.mxu1 %v4310_v7  ;;  %v1148_v15 = vld [vmem:[%s399_s22 + $0x8] sm:$0xff]  ;;  %v3970_v16 = vpack.c.bf16 %v1177_v9, %v1169_v8  ;;  %v3974_v17 = vpack.c.bf16 %v1163_v12, %v1155_v11  ;;  %v3976_v18 = vpack.c.bf16 %v1180_v14, %v1172_v13  ;;  %v1171_v19 = vld [vmem:[%s5468_s2 + $0xb0] sm:$0xff]  ;;  %v805_v25 = vld [vmem:[%s5473_s7] sm:$0xff]  ;;  %s4311_s22 = smov [#allocation5]  }
  0x30   : > { %3945 = vmatprep.subr.bf16.mxu1 %v3944_v34  ;;  %v1179_v20 = vld [vmem:[%s5468_s2 + $0xf0] sm:$0xff]  ;;  %v826_v26 = vrot.slane %v805_v25, %v4766_v24  ;;  %v818_v30 = vrot.slane %v805_v25, %v4774_v28  ;;  %v822_v32 = vrot.slane %v805_v25, %v4776_v29  ;;  %v4783_v34 = vsub.s32 7, %v446_v23  ;;  %v4790_v38 = vld [vmem:[%s5471_s5] sm:$0xff]  ;;  %s4234_s26 = sshll.u32 %s4311_s22, 4  ;;  %s4235_s26 = int_to_ptr.vmem [resolvable:$false] %s4234_s26 }
  0x31   : > { %3939 = vmatpush1.bf16.msra.mxu0 %v3938_v33  ;;  %v3978_v21 = vpack.c.bf16 %v1179_v20, %v1171_v19  ;;  %v4781_v33 = vsub.s32 6, %v446_v23  ;;  %v452_v41 = vrot.slane %v4790_v38, %v451_v39  ;;  %v814_v53 = vrot.slane %v805_v25, %v451_v39  ;;  %v4816_v2 = vld [vmem:[%s5469_s3] sm:$0xff]  ;;  %s4236_s28 = scalar_lea.vmem %s4235_s26, 512  ;;  %p4237_p1 = scmp.lt.s32.totalorder %s5417_s20, %s4235_s26 }
  0x32   : > { %3949 = vmatprep.subr.bf16.mxu0 %v3948_v37  ;;  %v838_v36 = vrot.slane %v805_v25, %v4783_v34  ;;  %v447_v37 = vsub.s32 0, %v446_v23  ;;  %v1190_v11 = vrot.slane %v4816_v2, %v451_v39  ;;  %v456_v12 = vrot.slane %v4790_v38, %v4774_v28  ;;  %p4238_p2 = scmp.lt.s32.totalorder %s4236_s28, %s4230_s16 }
  0x33   : > { %3947 = vmatpush1.bf16.msra.mxu1 %v3946_v44  ;;  %v834_v35 = vrot.slane %v805_v25, %v4781_v33 }
  0x34   : > { %3570 = vmatmul.mubr.msk.f32.vlgmr.msra.gmra.mrb[6].mxu0 %vm485_vm0, %v4500_v31  ;;  %3957 = vmatprep.subr.bf16.mxu1 %v3956_v51  ;;  %v448_v40 = vrot.slane %v4790_v38, %v447_v37  ;;  %v810_v52 = vrot.slane %v805_v25, %v447_v37  ;;  %p4239_p3 = por %p4238_p2, %p4237_p1 }
  0x35   : > { %3951 = vmatpush1.bf16.msra.mxu0 %v3950_v45  ;;  %1294 = vmatprep.mubr.f32.mxu0 %v4310_v7 }
  0x36   : > { %3953 = vmatprep.subr.bf16.mxu0 %v3952_v49  ;;  %3571 = vmatmul.mubr.msk.f32.vlgmr.msra.gmra.mrb[6].mxu1 %vm485_vm0, %v4500_v31  ;;  %v3966_v31 = vpack.c.bf16 %v1161_v63, %v1153_v62  ;;  %p4240_p5 = pnand %p4239_p3, %p4233_p0 }
  0x37   : > { %3959 = vmatpush1.bf16.msra.mxu1 %v3958_v56  ;;  %1371 = vmatprep.mubr.f32.mxu1 %v4310_v7 }
  0x38   : > { %3961 = vmatprep.subr.bf16.mxu1 %v3960_v58 }
  0x39   : > { %3955 = vmatpush1.bf16.msra.mxu0 %v3954_v57 }
  0x3a   : > { %3965 = vmatprep.subr.bf16.mxu0 %v3964_v61 }
  0x3b   : > { %3963 = vmatpush1.bf16.msra.mxu1 %v3962_v4 }
  0x3c   : > { %3572 = vmatmul.mubr.msk.f32.vlgmr.msra.gmra.mrb[8].mxu0 %vm485_vm0, %v1147_v5  ;;  %3973 = vmatprep.subr.bf16.mxu1 %v3972_v10 }
  0x3d   : > { %1300 = vmatprep.mubr.f32.mxu0 %v4310_v7  ;;  %3967 = vmatpush1.bf16.msra.mxu0 %v3966_v31  ;;  %v1186_v31 = vrot.slane %v4816_v2, %v447_v37  ;;  %v1202_v37 = vrot.slane %v4816_v2, %v4766_v24 }
  0x3e   : > { %3969 = vmatprep.subr.bf16.mxu0 %v3968_v6  ;;  %3574 = vmatmul.mubr.msk.f32.vlgmr.msra.gmra.mrb[8].mxu1 %vm485_vm0, %v1147_v5 }
  0x3f   : > { %1377 = vmatprep.mubr.f32.mxu1 %v4310_v7  ;;  %3975 = vmatpush1.bf16.msra.mxu1 %v3974_v17 }
  0x40   : > { %3573 = vmatmul.mubr.msk.f32.gmra.mrb[10].mxu0 %vm485_vm0, %v1148_v15  ;;  %3977 = vmatprep.subr.bf16.mxu1 %v3976_v18 }
  0x41   : > { %3971 = vmatpush1.bf16.msra.mxu0 %v3970_v16  ;;  %1448 = vmatprep.mubr.f32.mxu0 %v4310_v7 }
  0x42   : > { %3575 = vmatmul.mubr.msk.f32.gmra.mrb[10].mxu1 %vm485_vm0, %v1148_v15 }
  0x43   : > { %1525 = vmatprep.mubr.f32.mxu1 %v4310_v7  ;;  %3979 = vmatpush1.bf16.msra.mxu1 %v3978_v21  ;;  %v460_v21 = vrot.slane %v4790_v38, %v4776_v29 }
  0x44   : > { %3576 = vmatmul.mubr.msk.f32.vlgmr.msra.gmra.mrb[12].mxu0 %vm485_vm0, %v1147_v5 }
  0x45   : > { %1454 = vmatprep.mubr.f32.mxu0 %v4310_v7 }
  0x46   : > { %3578 = vmatmul.mubr.msk.f32.vlgmr.msra.gmra.mrb[12].mxu1 %vm485_vm0, %v1147_v5 }
  0x47   : > { %1531 = vmatprep.mubr.f32.mxu1 %v4310_v7  ;;  %v830_v7 = vrot.slane %v805_v25, %v4772_v27 }
  0x48   : > { %3577 = vmatmul.mubr.msk.f32.gmra.mrb[14].mxu0 %vm485_vm0, %v1148_v15 }
  0x4a   : > { %3579 = vmatmul.mubr.msk.f32.gmra.mrb[14].mxu1 %vm485_vm0, %v1148_v15  ;;  %v1194_v15 = vrot.slane %v4816_v2, %v4774_v28  ;;  %v1198_v28 = vrot.slane %v4816_v2, %v4776_v29  ;;  %v468_v29 = vrot.slane %v4790_v38, %v4772_v27 }
  0xef   : > { %v555_v42 = vpop.f32.mrb[0].mxu0  ;;  %v626_v46 = vpop.f32.mrb[0].mxu1 }
  0xf0   : > { %v556_v43 = vadd.f32 %v555_v42, %v448_v40  ;;  %v557_v44 = vpop.f32.mrb[1].mxu0  ;;  %v628_v47 = vpop.f32.mrb[1].mxu1  ;;  %v627_v20 = vadd.f32 %v626_v46, %v456_v12 }
  0xf1   : > { %v558_v45 = vadd.f32 %v557_v44, %v452_v41 }
  0xf2   : > { %3804 = vmatprep.subr.mxu0 %v556_v43 }
  0xf3   : > { %3805 = vmatpush3.xpose.msra.mxu0 %v556_v43 }
  0xf4   : > { %3814 = vmatprep.subr.mxu0 %v558_v45 }
  0xf7   : > { %v4794_v48 = vpop.f32.mrb[2].mxu0 }
  0xf8   : > { %v4796_v49 = vpop.f32.mrb[3].mxu0 }
  0xf9   : > { %v4798_v50 = vpop.f32.mrb[2].mxu1 }
  0xfa   : > { %v4800_v51 = vpop.f32.mrb[3].mxu1 }
  0xff   : > { %v913_v54 = vpop.f32.mrb[4].mxu0 }
 0x100   : > { %v914_v55 = vadd.f32 %v913_v54, %v810_v52  ;;  %v915_v56 = vpop.f32.mrb[5].mxu0  ;;  %v472_v54 = vrot.slane %v4790_v38, %v4781_v33 }
 0x101   : > { %v4802_v57 = vadd.f32 %v915_v56, %v814_v53  ;;  %v984_v58 = vpop.f32.mrb[4].mxu1  ;;  %v700_v53 = vadd.f32 %v4796_v49, %v468_v29  ;;  %v1210_v56 = vrot.slane %v4816_v2, %v4781_v33 }
 0x102   : > { %3809 = vmatprep.subr.mxu1 %v914_v55  ;;  %v4804_v59 = vadd.f32 %v984_v58, %v818_v30  ;;  %v986_v60 = vpop.f32.mrb[5].mxu1  ;;  %v769_v58 = vadd.f32 %v4798_v50, %v472_v54 }
 0x103   : > { %3810 = vmatpush3.msra.mxu1 %v914_v55  ;;  %v4807_v61 = vadd.f32 %v986_v60, %v822_v32  ;;  %v464_v32 = vrot.slane %v4790_v38, %v4766_v24 }
 0x104   : > { %3819 = vmatprep.subr.mxu1 %v4802_v57 }
 0x105   : > { %v698_v44 = vadd.f32 %v4794_v48, %v464_v32 }
 0x107   : > { %v1055_v62 = vpop.f32.mrb[6].mxu0 }
 0x108   : > { %v4809_v63 = vadd.f32 %v1055_v62, %v826_v26  ;;  %v1057_v0 = vpop.f32.mrb[7].mxu0  ;;  %v1214_v62 = vrot.slane %v4816_v2, %v4783_v34 }
 0x109   : > { %v4811_v1 = vadd.f32 %v1057_v0, %v830_v7  ;;  %v1126_v3 = vpop.f32.mrb[6].mxu1 }
 0x10a   : > { %v4818_v4 = vadd.f32 %v1126_v3, %v834_v35  ;;  %v1128_v5 = vpop.f32.mrb[7].mxu1  ;;  %v629_v35 = vadd.f32 %v628_v47, %v460_v21  ;;  %v1206_v47 = vrot.slane %v4816_v2, %v4772_v27  ;;  %v476_v27 = vrot.slane %v4790_v38, %v4783_v34 }
 0x10b   : > { %v4821_v6 = vadd.f32 %v1128_v5, %v838_v36 }
 0x10c   : > { %v771_v0 = vadd.f32 %v4800_v51, %v476_v27 }
 0x10f   : > { %v1296_v8 = vpop.f32.mrb[8].mxu0 }
 0x110   : > { %v1297_v9 = vadd.f32 %v1296_v8, %v1186_v31  ;;  %v1298_v10 = vpop.f32.mrb[9].mxu0 }
 0x111   : > { %v1373_v13 = vpop.f32.mrb[8].mxu1  ;;  %v1299_v19 = vadd.f32 %v1298_v10, %v1190_v11 }
 0x112   : > { %3806 = vmatprep.mubr.f32.mxu0 %v1297_v9  ;;  %v1375_v16 = vpop.f32.mrb[9].mxu1  ;;  %v1374_v23 = vadd.f32 %v1373_v13, %v1194_v15 }
 0x113   : > { %v1302_v14 = vpop.f32.mrb[10].mxu0  ;;  %v1376_v42 = vadd.f32 %v1375_v16, %v1198_v28 }
 0x114   : > { %v1303_v17 = vadd.f32 %v1302_v14, %v1186_v31  ;;  %v1304_v18 = vpop.f32.mrb[11].mxu0 }
 0x115   : > { %v1379_v22 = vpop.f32.mrb[10].mxu1  ;;  %v1305_v7 = vadd.f32 %v1304_v18, %v1190_v11 }
 0x116   : > { %3807 = vmatmul.mubr.f32.vlgmr.msra.gmra.mrb[16].mxu0 %v1303_v17  ;;  %v1381_v25 = vpop.f32.mrb[11].mxu1  ;;  %v1380_v36 = vadd.f32 %v1379_v22, %v1194_v15 }
 0x117   : > { %3815 = vmatpush3.xpose.msra.mxu0 %v558_v45  ;;  %3816 = vmatprep.mubr.f32.mxu0 %v1299_v19  ;;  %v1450_v26 = vpop.f32.mrb[12].mxu0  ;;  %v1382_v45 = vadd.f32 %v1381_v25, %v1198_v28 }
 0x118   : > { %3824 = vmatprep.subr.mxu0 %v627_v20  ;;  %v1452_v30 = vpop.f32.mrb[13].mxu0  ;;  %v1451_v46 = vadd.f32 %v1450_v26, %v1202_v37 }
 0x119   : > { %v1527_v41 = vpop.f32.mrb[12].mxu1  ;;  %v1453_v55 = vadd.f32 %v1452_v30, %v1206_v47 }
 0x11a   : > { %3817 = vmatmul.mubr.f32.vlgmr.msra.gmra.mrb[18].mxu0 %v1305_v7  ;;  %v1529_v43 = vpop.f32.mrb[13].mxu1  ;;  %v1528_v49 = vadd.f32 %v1527_v41, %v1210_v56 }
 0x11b   : > { %3825 = vmatpush3.xpose.msra.mxu0 %v627_v20  ;;  %3826 = vmatprep.mubr.f32.mxu0 %v1374_v23  ;;  %v1456_v39 = vpop.f32.mrb[14].mxu0  ;;  %v1530_v33 = vadd.f32 %v1529_v43, %v1214_v62 }
 0x11c   : > { %3834 = vmatprep.subr.mxu0 %v629_v35  ;;  %v1458_v40 = vpop.f32.mrb[15].mxu0  ;;  %v1457_v48 = vadd.f32 %v1456_v39, %v1202_v37 }
 0x11d   : > { %v1533_v24 = vpop.f32.mrb[14].mxu1  ;;  %v1459_v60 = vadd.f32 %v1458_v40, %v1206_v47 }
 0x11e   : > { %3827 = vmatmul.mubr.f32.vlgmr.msra.gmra.mrb[20].mxu0 %v1380_v36  ;;  %v1535_v52 = vpop.f32.mrb[15].mxu1  ;;  %v1534_v3 = vadd.f32 %v1533_v24, %v1210_v56 }
 0x11f   : > { %3835 = vmatpush3.xpose.msra.mxu0 %v629_v35  ;;  %3836 = vmatprep.mubr.f32.mxu0 %v1376_v42  ;;  %v1536_v50 = vadd.f32 %v1535_v52, %v1214_v62 }
 0x120   : > { %3844 = vmatprep.subr.mxu0 %v698_v44 }
 0x122   : > { %3837 = vmatmul.mubr.f32.vlgmr.msra.gmra.mrb[22].mxu0 %v1382_v45 }
 0x123   : > { %3845 = vmatpush3.xpose.msra.mxu0 %v698_v44  ;;  %3846 = vmatprep.mubr.f32.mxu0 %v1451_v46 }
 0x124   : > { %3854 = vmatprep.subr.mxu0 %v700_v53 }
 0x126   : > { %3847 = vmatmul.mubr.f32.vlgmr.msra.gmra.mrb[24].mxu0 %v1457_v48 }
 0x127   : > { %3855 = vmatpush3.xpose.msra.mxu0 %v700_v53  ;;  %3856 = vmatprep.mubr.f32.mxu0 %v1453_v55 }
 0x128   : > { %3864 = vmatprep.subr.mxu0 %v769_v58 }
 0x12a   : > { %3857 = vmatmul.mubr.f32.vlgmr.msra.gmra.mrb[26].mxu0 %v1459_v60 }
 0x12b   : > { %3865 = vmatpush3.xpose.msra.mxu0 %v769_v58  ;;  %3866 = vmatprep.mubr.f32.mxu0 %v1528_v49 }
 0x12c   : > { %3874 = vmatprep.subr.mxu0 %v771_v0 }
 0x12e   : > { %3867 = vmatmul.mubr.f32.vlgmr.msra.gmra.mrb[28].mxu0 %v1534_v3 }
 0x12f   : > { %3875 = vmatpush3.xpose.msra.mxu0 %v771_v0  ;;  %3876 = vmatprep.mubr.f32.mxu0 %v1530_v33 }
 0x132   : > { %3877 = vmatmul.mubr.f32.vlgmr.msra.gmra.mrb[30].mxu0 %v1536_v50 }
 0x1e9   : > { %v3808_v38 = vpop.f32.mrb[16].mxu0 }
 0x1ea   : > { %v1605_v5 = vpop.f32.mrb[17].mxu0  ;;  %v1618_v8 = vsel %vm1614_vm1, %v3808_v38, -inf }
 0x1eb   : > { %v1615_v31 = vsel %vm1614_vm1, %v1605_v5, -inf }
 0x1ec   : > { %1616 = vmax.xlane.f32.xlu0 %v1615_v31 }
 0x1ed   : > { %v3818_v34 = vpop.f32.mrb[18].mxu0 }
 0x1ee   : > { %v1788_v2 = vpop.f32.mrb[19].mxu0  ;;  %v1800_v11 = vsel %vm1614_vm1, %v3818_v34, -inf }
 0x1ef   : > { %v1797_v51 = vsel %vm1614_vm1, %v1788_v2, -inf }
 0x1f0   : > { %1798 = vmax.xlane.f32.xlu1 %v1797_v51  ;;  %1619 = vmax.xlane.f32.xlu0 %v1618_v8 }
 0x1f1   : > { %v4855_v9 = vpop.f32.mrb[20].mxu0 }
 0x1f2   : > { %v1970_v10 = vpop.f32.mrb[21].mxu0  ;;  %v1982_v15 = vsel %vm1614_vm1, %v4855_v9, -inf }
 0x1f3   : > { %v1979_v12 = vsel %vm1614_vm1, %v1970_v10, -inf }
 0x1f4   : > { %1801 = vmax.xlane.f32.xlu1 %v1800_v11  ;;  %1980 = vmax.xlane.f32.xlu0 %v1979_v12 }
 0x1f5   : > { %v4859_v13 = vpop.f32.mrb[22].mxu0 }
 0x1f6   : > { %v2152_v14 = vpop.f32.mrb[23].mxu0  ;;  %v2164_v19 = vsel %vm1614_vm1, %v4859_v13, -inf }
 0x1f7   : > { %v2161_v16 = vsel %vm1614_vm1, %v2152_v14, -inf }
 0x1f8   : > { %1983 = vmax.xlane.f32.xlu1 %v1982_v15  ;;  %2162 = vmax.xlane.f32.xlu0 %v2161_v16 }
 0x1f9   : > { %v4864_v17 = vpop.f32.mrb[24].mxu0 }
 0x1fa   : > { %v2334_v18 = vpop.f32.mrb[25].mxu0  ;;  %v2346_v22 = vsel %vm1614_vm1, %v4864_v17, -inf }
 0x1fb   : > { %v2343_v20 = vsel %vm1614_vm1, %v2334_v18, -inf }
 0x1fc   : > { %2165 = vmax.xlane.f32.xlu1 %v2164_v19  ;;  %2344 = vmax.xlane.f32.xlu0 %v2343_v20 }
 0x1fd   : > { %v4869_v21 = vpop.f32.mrb[26].mxu0 }
 0x1fe   : > { %v4873_v23 = vpop.f32.mrb[27].mxu0  ;;  %v2528_v7 = vsel %vm1614_vm1, %v4869_v21, -inf }
 0x1ff   : > { %v2525_v25 = vsel %vm1614_vm1, %v4873_v23, -inf }
 0x200   : > { %2347 = vmax.xlane.f32.xlu1 %v2346_v22  ;;  %2526 = vmax.xlane.f32.xlu0 %v2525_v25 }
 0x201   : > { %v4877_v26 = vpop.f32.mrb[28].mxu0 }
 0x202   : > { %v4881_v30 = vpop.f32.mrb[29].mxu0  ;;  %v2710_v35 = vsel %vm1614_vm1, %v4877_v26, -inf }
 0x203   : > { %v2707_v28 = vsel %vm1614_vm1, %v4881_v30, -inf }
 0x204   : > { %2529 = vmax.xlane.f32.xlu1 %v2528_v7  ;;  %2708 = vmax.xlane.f32.xlu0 %v2707_v28 }
 0x205   : > { %v4885_v32 = vpop.f32.mrb[30].mxu0 }
 0x206   : > { %v4889_v36 = vpop.f32.mrb[31].mxu0  ;;  %v2892_v39 = vsel %vm1614_vm1, %v4885_v32, -inf }
 0x207   : > { %v2889_v37 = vsel %vm1614_vm1, %v4889_v36, -inf }
 0x208   : > { %2711 = vmax.xlane.f32.xlu1 %v2710_v35  ;;  %2890 = vmax.xlane.f32.xlu0 %v2889_v37 }
 0x20c   : > { %2893 = vmax.xlane.f32.xlu1 %v2892_v39 }
 0x279   : > { %v1617_v40 = vpop.xlane.xlu0 %1616 }
 0x27a   : > { %v1621_v41 = vsub.f32 %v1605_v5, %v1617_v40 }
 0x27c   : > { %v1623_v42 = vmul.f32 1.442695, %v1621_v41 }
 0x27d   : > { %v1799_v43 = vpop.xlane.xlu1 %1798  ;;  %v1620_v44 = vpop.xlane.xlu0 %1619 }
 0x27e   : > { %4166 = vpow2.f32 %v1623_v42  ;;  %v1803_v29 = vsub.f32 %v1788_v2, %v1799_v43  ;;  %v1622_v45 = vsub.f32 %v3808_v38, %v1620_v44 }
 0x280   : > { %v1805_v46 = vmul.f32 1.442695, %v1803_v29  ;;  %v1625_v47 = vmul.f32 1.442695, %v1622_v45 }
 0x281   : > { %v1802_v24 = vpop.xlane.xlu1 %1801  ;;  %v1981_v52 = vpop.xlane.xlu0 %1980 }
 0x282   : > { %4168 = vpow2.f32 %v1805_v46  ;;  %v1804_v53 = vsub.f32 %v3818_v34, %v1802_v24  ;;  %v1985_v54 = vsub.f32 %v1970_v10, %v1981_v52 }
 0x283   : > { %4170 = vpow2.f32 %v1625_v47 }
 0x284   : > { %v1807_v48 = vmul.f32 1.442695, %v1804_v53  ;;  %v1987_v55 = vmul.f32 1.442695, %v1985_v54 }
 0x285   : > { %v1984_v56 = vpop.xlane.xlu1 %1983  ;;  %v2163_v58 = vpop.xlane.xlu0 %2162 }
 0x286   : > { %4172 = vpow2.f32 %v1807_v48  ;;  %v1986_v27 = vsub.f32 %v4855_v9, %v1984_v56  ;;  %v2167_v60 = vsub.f32 %v2152_v14, %v2163_v58 }
 0x287   : > { %4174 = vpow2.f32 %v1987_v55 }
 0x288   : > { %v4896_v49 = vpop.eup %4166  ;;  %v1989_v62 = vmul.f32 1.442695, %v1986_v27  ;;  %v2169_v0 = vmul.f32 1.442695, %v2167_v60 }
 0x289   : > { %v2166_v3 = vpop.xlane.xlu1 %2165  ;;  %v2345_v33 = vpop.xlane.xlu0 %2344  ;;  %v1627_v50 = vsel %vm1614_vm1, %v4896_v49, 0.0 }
 0x28a   : > { %4176 = vpow2.f32 %v1989_v62  ;;  %v2168_v38 = vsub.f32 %v4859_v13, %v2166_v3  ;;  %v2349_v5 = vsub.f32 %v2334_v18, %v2345_v33  ;;  %1628 = vadd.xlane.f32.xlu0 %v1627_v50  ;;  %v3027_v50 = vld [vmem:[%s5474_s8 + $0x80] sm:$0xff] }
 0x28b   : > { %4178 = vpow2.f32 %v2169_v0 }
 0x28c   : > { %v4901_v31 = vpop.eup %4168  ;;  %v2171_v34 = vmul.f32 1.442695, %v2168_v38  ;;  %v2351_v2 = vmul.f32 1.442695, %v2349_v5  ;;  %v3028_v38 = vld [vmem:[%s5474_s8 + $0x88] sm:$0xff]  ;;  %v3011_v5 = vld [vmem:[%s5474_s8] sm:$0xff] }
 0x28d   : > { %v4903_v51 = vpop.eup %4170  ;;  %v2348_v8 = vpop.xlane.xlu1 %2347  ;;  %v1809_v10 = vsel %vm1614_vm1, %v4901_v31, 0.0 }
 0x28e   : > { %v2527_v9 = vpop.xlane.xlu0 %2526  ;;  %4180 = vpow2.f32 %v2171_v34  ;;  %v2350_v11 = vsub.f32 %v4864_v17, %v2348_v8  ;;  %1810 = vadd.xlane.f32.xlu0 %v1809_v10  ;;  %v1630_v13 = vsel %vm1614_vm1, %v4903_v51, 0.0  ;;  %v3980_v34 = vpack.c.bf16 %v3028_v38, %v3027_v50  ;;  %v3029_v8 = vld [vmem:[%s5474_s8 + $0x90] sm:$0xff] }
 0x28f   : > { %v2531_v12 = vsub.f32 %v4873_v23, %v2527_v9  ;;  %4182 = vpow2.f32 %v2351_v2  ;;  %1631 = vadd.xlane.f32.xlu1 %v1630_v13  ;;  %v3012_v2 = vld [vmem:[%s5474_s8 + $0x8] sm:$0xff]  ;;  %v3030_v9 = vld [vmem:[%s5474_s8 + $0x98] sm:$0xff] }
 0x290   : > { %v4911_v14 = vpop.eup %4172  ;;  %v2353_v15 = vmul.f32 1.442695, %v2350_v11  ;;  %v3982_v10 = vpack.c.bf16 %v3012_v2, %v3011_v5  ;;  %v3984_v11 = vpack.c.bf16 %v3030_v9, %v3029_v8  ;;  %v3014_v13 = vld [vmem:[%s5474_s8 + $0x18] sm:$0xff]  ;;  %3981 = vmatprep.subr.bf16.mxu0 %v3980_v34 }
 0x291   : > { %v2533_v16 = vmul.f32 1.442695, %v2531_v12  ;;  %v4913_v18 = vpop.eup %4174  ;;  %v2530_v19 = vpop.xlane.xlu1 %2529  ;;  %v1812_v22 = vsel %vm1614_vm1, %v4911_v14, 0.0  ;;  %v3013_v12 = vld [vmem:[%s5474_s8 + $0x10] sm:$0xff] }
 0x292   : > { %v2709_v20 = vpop.xlane.xlu0 %2708  ;;  %4184 = vpow2.f32 %v2353_v15  ;;  %v2532_v17 = vsub.f32 %v4869_v21, %v2530_v19  ;;  %v1991_v25 = vsel %vm1614_vm1, %v4913_v18, 0.0  ;;  %v3031_v15 = vld [vmem:[%s5474_s8 + $0xa0] sm:$0xff]  ;;  %3983 = vmatpush3.bf16.msra.mxu0 %v3982_v10  ;;  %v3986_v19 = vpack.c.bf16 %v3014_v13, %v3013_v12 }
 0x293   : > { %v2713_v23 = vsub.f32 %v4881_v30, %v2709_v20  ;;  %4186 = vpow2.f32 %v2533_v16  ;;  %1813 = vadd.xlane.f32.xlu1 %v1812_v22  ;;  %1992 = vadd.xlane.f32.xlu0 %v1991_v25  ;;  %v3032_v16 = vld [vmem:[%s5474_s8 + $0xa8] sm:$0xff]  ;;  %v3015_v22 = vld [vmem:[%s5474_s8 + $0x20] sm:$0xff]  ;;  %v3034_v25 = vld [vmem:[%s5474_s8 + $0xb8] sm:$0xff] }
 0x294   : > { %v4921_v7 = vpop.eup %4176  ;;  %v2535_v28 = vmul.f32 1.442695, %v2532_v17  ;;  %3985 = vmatprep.subr.bf16.mxu0 %v3984_v11  ;;  %v3988_v20 = vpack.c.bf16 %v3032_v16, %v3031_v15  ;;  %v3016_v17 = vld [vmem:[%s5474_s8 + $0x28] sm:$0xff] }
 0x295   : > { %v2715_v35 = vmul.f32 1.442695, %v2713_v23  ;;  %v4923_v37 = vpop.eup %4178  ;;  %v2712_v39 = vpop.xlane.xlu1 %2711  ;;  %v1994_v41 = vsel %vm1614_vm1, %v4921_v7, 0.0  ;;  %v3033_v23 = vld [vmem:[%s5474_s8 + $0xb0] sm:$0xff] }
 0x296   : > { %v2891_v40 = vpop.xlane.xlu0 %2890  ;;  %4188 = vpow2.f32 %v2535_v28  ;;  %v2714_v21 = vsub.f32 %v4877_v26, %v2712_v39  ;;  %v2173_v42 = vsel %vm1614_vm1, %v4923_v37, 0.0  ;;  %3987 = vmatpush3.bf16.msra.mxu0 %v3986_v19  ;;  %v3990_v28 = vpack.c.bf16 %v3016_v17, %v3015_v22  ;;  %v3017_v39 = vld [vmem:[%s5474_s8 + $0x30] sm:$0xff] }
 0x297   : > { %v2895_v30 = vsub.f32 %v4889_v36, %v2891_v40  ;;  %4190 = vpow2.f32 %v2715_v35  ;;  %1995 = vadd.xlane.f32.xlu1 %v1994_v41  ;;  %2174 = vadd.xlane.f32.xlu0 %v2173_v42  ;;  %v3992_v35 = vpack.c.bf16 %v3034_v25, %v3033_v23  ;;  %v3018_v40 = vld [vmem:[%s5474_s8 + $0x38] sm:$0xff]  ;;  %v3035_v41 = vld [vmem:[%s5474_s8 + $0xc0] sm:$0xff] }
 0x298   : > { %v4931_v43 = vpop.eup %4180  ;;  %v2717_v44 = vmul.f32 1.442695, %v2714_v21  ;;  %3989 = vmatprep.subr.bf16.mxu0 %v3988_v20  ;;  %v3036_v21 = vld [vmem:[%s5474_s8 + $0xc8] sm:$0xff] }
 0x299   : > { %v2897_v29 = vmul.f32 1.442695, %v2895_v30  ;;  %v4933_v45 = vpop.eup %4182  ;;  %v2894_v46 = vpop.xlane.xlu1 %2893  ;;  %v2176_v47 = vsel %vm1614_vm1, %v4931_v43, 0.0  ;;  %v3994_v30 = vpack.c.bf16 %v3018_v40, %v3017_v39  ;;  %v3996_v42 = vpack.c.bf16 %v3036_v21, %v3035_v41 }
 0x29a   : > { %4192 = vpow2.f32 %v2717_v44  ;;  %v2896_v26 = vsub.f32 %v4885_v32, %v2894_v46  ;;  %v2355_v36 = vsel %vm1614_vm1, %v4933_v45, 0.0  ;;  %3991 = vmatpush3.bf16.msra.mxu0 %v3990_v28  ;;  %v3019_v44 = vld [vmem:[%s5474_s8 + $0x40] sm:$0xff]  ;;  %v3037_v46 = vld [vmem:[%s5474_s8 + $0xd0] sm:$0xff] }
 0x29b   : > { %4194 = vpow2.f32 %v2897_v29  ;;  %2177 = vadd.xlane.f32.xlu1 %v2176_v47  ;;  %2356 = vadd.xlane.f32.xlu0 %v2355_v36  ;;  %v3020_v29 = vld [vmem:[%s5474_s8 + $0x48] sm:$0xff]  ;;  %v3038_v47 = vld [vmem:[%s5474_s8 + $0xd8] sm:$0xff] }
 0x29c   : > { %v4940_v24 = vpop.eup %4184  ;;  %v2899_v52 = vmul.f32 1.442695, %v2896_v26  ;;  %3993 = vmatprep.subr.bf16.mxu0 %v3992_v35  ;;  %v3998_v26 = vpack.c.bf16 %v3020_v29, %v3019_v44  ;;  %v4000_v36 = vpack.c.bf16 %v3038_v47, %v3037_v46  ;;  %v3059_v46 = vld [vmem:[%s5474_s8 + $0x180] sm:$0xff] }
 0x29d   : > { %v4942_v53 = vpop.eup %4186  ;;  %v2358_v54 = vsel %vm1614_vm1, %v4940_v24, 0.0 }
 0x29e   : > { %4196 = vpow2.f32 %v2899_v52  ;;  %v2537_v48 = vsel %vm1614_vm1, %v4942_v53, 0.0  ;;  %3995 = vmatpush3.bf16.msra.mxu0 %v3994_v30  ;;  %v3021_v52 = vld [vmem:[%s5474_s8 + $0x50] sm:$0xff] }
 0x29f   : > { %2359 = vadd.xlane.f32.xlu1 %v2358_v54  ;;  %2538 = vadd.xlane.f32.xlu0 %v2537_v48  ;;  %v3022_v54 = vld [vmem:[%s5474_s8 + $0x58] sm:$0xff]  ;;  %v3039_v48 = vld [vmem:[%s5474_s8 + $0xe0] sm:$0xff] }
 0x2a0   : > { %v4948_v32 = vpop.eup %4188  ;;  %3997 = vmatprep.subr.bf16.mxu0 %v3996_v42 }
 0x2a1   : > { %v4950_v55 = vpop.eup %4190  ;;  %v2540_v56 = vsel %vm1614_vm1, %v4948_v32, 0.0 }
 0x2a2   : > { %v2719_v58 = vsel %vm1614_vm1, %v4950_v55, 0.0  ;;  %3999 = vmatpush3.bf16.msra.mxu0 %v3998_v26  ;;  %v3043_v26 = vld [vmem:[%s5474_s8 + $0x100] sm:$0xff] }
 0x2a3   : > { %2541 = vadd.xlane.f32.xlu1 %v2540_v56  ;;  %2720 = vadd.xlane.f32.xlu0 %v2719_v58  ;;  %v3040_v56 = vld [vmem:[%s5474_s8 + $0xe8] sm:$0xff]  ;;  %v4002_v58 = vpack.c.bf16 %v3022_v54, %v3021_v52 }
 0x2a4   : > { %v4956_v27 = vpop.eup %4192  ;;  %4001 = vmatprep.subr.bf16.mxu0 %v4000_v36  ;;  %v3044_v36 = vld [vmem:[%s5474_s8 + $0x108] sm:$0xff] }
 0x2a5   : > { %v4958_v60 = vpop.eup %4194  ;;  %v2722_v62 = vsel %vm1614_vm1, %v4956_v27, 0.0 }
 0x2a6   : > { %v2901_v0 = vsel %vm1614_vm1, %v4958_v60, 0.0  ;;  %4003 = vmatpush3.bf16.msra.mxu0 %v4002_v58  ;;  %v3045_v58 = vld [vmem:[%s5474_s8 + $0x110] sm:$0xff] }
 0x2a7   : > { %2723 = vadd.xlane.f32.xlu1 %v2722_v62  ;;  %2902 = vadd.xlane.f32.xlu0 %v2901_v0  ;;  %v4004_v62 = vpack.c.bf16 %v3040_v56, %v3039_v48  ;;  %v3023_v0 = vld [vmem:[%s5474_s8 + $0x60] sm:$0xff]  ;;  %v4014_v48 = vpack.c.bf16 %v3044_v36, %v3043_v26  ;;  %v3093_v26 = vld [vmem:[%s5474_s8 + $0x290] sm:$0xff]  ;;  %v3094_v36 = vld [vmem:[%s5474_s8 + $0x298] sm:$0xff] }
 0x2a8   : > { %v4964_v3 = vpop.eup %4196 }
 0x2a9   : > { %v2904_v33 = vsel %vm1614_vm1, %v4964_v3, 0.0  ;;  %4005 = vmatprep.subr.bf16.mxu0 %v4004_v62  ;;  %v3046_v62 = vld [vmem:[%s5474_s8 + $0x118] sm:$0xff] }
 0x2ab   : > { %2905 = vadd.xlane.f32.xlu1 %v2904_v33  ;;  %v3024_v33 = vld [vmem:[%s5474_s8 + $0x68] sm:$0xff] }
 0x2ac   : > { %v4006_v50 = vpack.c.bf16 %v3024_v33, %v3023_v0  ;;  %v3063_v0 = vld [vmem:[%s5474_s8 + $0x1a0] sm:$0xff] }
 0x2ae   : > { %4007 = vmatpush3.bf16.msra.mxu0 %v4006_v50  ;;  %v3047_v50 = vld [vmem:[%s5474_s8 + $0x120] sm:$0xff] }
 0x317   : > { %v1629_v38 = vpop.xlane.xlu0 %1628 }
 0x318   : > { %4198 = vrcp.f32 %v1629_v38  ;;  %v3048_v38 = vld [vmem:[%s5474_s8 + $0x128] sm:$0xff] }
 0x31b   : > { %v1811_v5 = vpop.xlane.xlu0 %1810 }
 0x31c   : > { %v1632_v34 = vpop.xlane.xlu1 %1631  ;;  %4200 = vrcp.f32 %v1811_v5  ;;  %v3065_v5 = vld [vmem:[%s5474_s8 + $0x1b0] sm:$0xff] }
 0x31d   : > { %4202 = vrcp.f32 %v1632_v34  ;;  %v3066_v34 = vld [vmem:[%s5474_s8 + $0x1b8] sm:$0xff] }
 0x320   : > { %v1814_v2 = vpop.xlane.xlu1 %1813  ;;  %v1993_v8 = vpop.xlane.xlu0 %1992 }
 0x321   : > { %4204 = vrcp.f32 %v1814_v2  ;;  %v4022_v2 = vpack.c.bf16 %v3048_v38, %v3047_v50  ;;  %v3080_v50 = vld [vmem:[%s5474_s8 + $0x228] sm:$0xff]  ;;  %v3107_v38 = vld [vmem:[%s5474_s8 + $0x300] sm:$0xff] }
 0x322   : > { %v4199_v9 = vpop.eup %4198  ;;  %4206 = vrcp.f32 %v1993_v8  ;;  %v4024_v8 = vpack.c.bf16 %v3066_v34, %v3065_v5  ;;  %v3108_v5 = vld [vmem:[%s5474_s8 + $0x308] sm:$0xff]  ;;  %v3097_v34 = vld [vmem:[%s5474_s8 + $0x2b0] sm:$0xff] }
 0x323   : > { %v1635_v10 = vmul.f32 %v4199_v9, %v4896_v49  ;;  %v3049_v9 = vld [vmem:[%s5474_s8 + $0x130] sm:$0xff] }
 0x324   : > { %v1996_v11 = vpop.xlane.xlu1 %1995  ;;  %v2175_v12 = vpop.xlane.xlu0 %2174 }
 0x325   : > { %4208 = vrcp.f32 %v1996_v11  ;;  %3811 = vmatprep.mubr.msk.f32.mxu1 %vm1614_vm1, %v1635_v10  ;;  %v3050_v10 = vld [vmem:[%s5474_s8 + $0x138] sm:$0xff]  ;;  %v3067_v11 = vld [vmem:[%s5474_s8 + $0x1c0] sm:$0xff] }
 0x326   : > { %v4201_v13 = vpop.eup %4200  ;;  %4210 = vrcp.f32 %v2175_v12  ;;  %v3068_v12 = vld [vmem:[%s5474_s8 + $0x1c8] sm:$0xff] }
 0x327   : > { %v4203_v15 = vpop.eup %4202  ;;  %v1817_v16 = vmul.f32 %v4201_v13, %v4901_v31  ;;  %v4026_v13 = vpack.c.bf16 %v3050_v10, %v3049_v9  ;;  %v3126_v9 = vld [vmem:[%s5474_s8 + $0x398] sm:$0xff] }
 0x328   : > { %v1636_v19 = vmul.f32 %v4203_v15, %v4903_v51  ;;  %v2178_v20 = vpop.xlane.xlu1 %2177  ;;  %v2357_v22 = vpop.xlane.xlu0 %2356  ;;  %v4028_v15 = vpack.c.bf16 %v3068_v12, %v3067_v11  ;;  %v4078_v12 = vpack.c.bf16 %v3108_v5, %v3107_v38  ;;  %v3089_v5 = vld [vmem:[%s5474_s8 + $0x270] sm:$0xff] }
 0x329   : > { %4212 = vrcp.f32 %v2178_v20 }
 0x32a   : > { %4214 = vrcp.f32 %v2357_v22  ;;  %3812 = vmatmul.mubr.msk.f32.vlgmr.msra.gmra.mrb[16].mxu1 %vm1614_vm1, %v1636_v19  ;;  %v3052_v19 = vld [vmem:[%s5474_s8 + $0x148] sm:$0xff]  ;;  %v3041_v22 = vld [vmem:[%s5474_s8 + $0xf0] sm:$0xff] }
 0x32b   : > { %v4205_v17 = vpop.eup %4204  ;;  %3820 = vmatpush3.msra.mxu1 %v4802_v57  ;;  %3821 = vmatprep.mubr.msk.f32.mxu1 %vm1614_vm1, %v1817_v16  ;;  %v3051_v16 = vld [vmem:[%s5474_s8 + $0x140] sm:$0xff] }
 0x32c   : > { %v4207_v49 = vpop.eup %4206  ;;  %v1818_v23 = vmul.f32 %v4205_v17, %v4911_v14  ;;  %3829 = vmatprep.subr.mxu1 %v4804_v59  ;;  %v2360_v25 = vpop.xlane.xlu1 %2359  ;;  %v4030_v20 = vpack.c.bf16 %v3052_v19, %v3051_v16  ;;  %v3042_v17 = vld [vmem:[%s5474_s8 + $0xf8] sm:$0xff] }
 0x32d   : > { %v2539_v31 = vpop.xlane.xlu0 %2538  ;;  %4216 = vrcp.f32 %v2360_v25  ;;  %v1999_v51 = vmul.f32 %v4207_v49, %v4913_v18  ;;  %v3069_v49 = vld [vmem:[%s5474_s8 + $0x1d0] sm:$0xff]  ;;  %v3070_v25 = vld [vmem:[%s5474_s8 + $0x1d8] sm:$0xff] }
 0x32e   : > { %4218 = vrcp.f32 %v2539_v31  ;;  %3822 = vmatmul.mubr.msk.f32.vlgmr.msra.gmra.mrb[18].mxu1 %vm1614_vm1, %v1818_v23  ;;  %v4008_v23 = vpack.c.bf16 %v3042_v17, %v3041_v22  ;;  %v3025_v31 = vld [vmem:[%s5474_s8 + $0x70] sm:$0xff]  ;;  %v3110_v22 = vld [vmem:[%s5474_s8 + $0x318] sm:$0xff]  ;;  %v3099_v17 = vld [vmem:[%s5474_s8 + $0x2c0] sm:$0xff] }
 0x32f   : > { %v4209_v28 = vpop.eup %4208  ;;  %3830 = vmatpush3.msra.mxu1 %v4804_v59  ;;  %3831 = vmatprep.mubr.msk.f32.mxu1 %vm1614_vm1, %v1999_v51  ;;  %v3026_v51 = vld [vmem:[%s5474_s8 + $0x78] sm:$0xff] }
 0x330   : > { %v4211_v57 = vpop.eup %4210  ;;  %v2000_v35 = vmul.f32 %v4209_v28, %v4921_v7  ;;  %3839 = vmatprep.subr.mxu1 %v4807_v61  ;;  %v2542_v14 = vpop.xlane.xlu1 %2541  ;;  %v4032_v28 = vpack.c.bf16 %v3070_v25, %v3069_v49  ;;  %4009 = vmatprep.subr.bf16.mxu0 %v4008_v23  ;;  %v3100_v23 = vld [vmem:[%s5474_s8 + $0x2c8] sm:$0xff]  ;;  %v3127_v25 = vld [vmem:[%s5474_s8 + $0x3a0] sm:$0xff] }
 0x331   : > { %v2721_v39 = vpop.xlane.xlu0 %2720  ;;  %4220 = vrcp.f32 %v2542_v14  ;;  %v2181_v40 = vmul.f32 %v4211_v57, %v4923_v37  ;;  %v4010_v57 = vpack.c.bf16 %v3026_v51, %v3025_v31  ;;  %v3054_v14 = vld [vmem:[%s5474_s8 + $0x158] sm:$0xff]  ;;  %v3128_v31 = vld [vmem:[%s5474_s8 + $0x3a8] sm:$0xff] }
 0x332   : > { %4222 = vrcp.f32 %v2721_v39  ;;  %3832 = vmatmul.mubr.msk.f32.vlgmr.msra.gmra.mrb[20].mxu1 %vm1614_vm1, %v2000_v35  ;;  %v3053_v35 = vld [vmem:[%s5474_s8 + $0x150] sm:$0xff] }
 0x333   : > { %v4213_v18 = vpop.eup %4212  ;;  %3840 = vmatpush3.msra.mxu1 %v4807_v61  ;;  %3841 = vmatprep.mubr.msk.f32.mxu1 %vm1614_vm1, %v2181_v40  ;;  %v4034_v39 = vpack.c.bf16 %v3054_v14, %v3053_v35  ;;  %v3071_v40 = vld [vmem:[%s5474_s8 + $0x1e0] sm:$0xff]  ;;  %v3084_v14 = vld [vmem:[%s5474_s8 + $0x248] sm:$0xff] }
 0x334   : > { %v4215_v59 = vpop.eup %4214  ;;  %v2182_v41 = vmul.f32 %v4213_v18, %v4931_v43  ;;  %3849 = vmatprep.subr.mxu1 %v4809_v63  ;;  %v2724_v7 = vpop.xlane.xlu1 %2723  ;;  %4011 = vmatpush3.bf16.msra.mxu0 %v4010_v57  ;;  %v3072_v18 = vld [vmem:[%s5474_s8 + $0x1e8] sm:$0xff]  ;;  %v3083_v35 = vld [vmem:[%s5474_s8 + $0x240] sm:$0xff] }
 0x335   : > { %v2903_v21 = vpop.xlane.xlu0 %2902  ;;  %4224 = vrcp.f32 %v2724_v7  ;;  %v2363_v30 = vmul.f32 %v4215_v59, %v4933_v45  ;;  %v3091_v59 = vld [vmem:[%s5474_s8 + $0x280] sm:$0xff]  ;;  %v3092_v7 = vld [vmem:[%s5474_s8 + $0x288] sm:$0xff] }
 0x336   : > { %4226 = vrcp.f32 %v2903_v21  ;;  %3842 = vmatmul.mubr.msk.f32.vlgmr.msra.gmra.mrb[22].mxu1 %vm1614_vm1, %v2182_v41  ;;  %v4036_v41 = vpack.c.bf16 %v3072_v18, %v3071_v40  ;;  %v3055_v21 = vld [vmem:[%s5474_s8 + $0x160] sm:$0xff]  ;;  %v4060_v40 = vpack.c.bf16 %v3100_v23, %v3099_v17  ;;  %v4084_v18 = vpack.c.bf16 %v3128_v31, %v3127_v25  ;;  %v3137_v17 = vld [vmem:[%s5474_s8 + $0x3f0] sm:$0xff] }
 0x337   : > { %v4217_v37 = vpop.eup %4216  ;;  %3850 = vmatpush3.msra.mxu1 %v4809_v63  ;;  %3851 = vmatprep.mubr.msk.f32.mxu1 %vm1614_vm1, %v2363_v30  ;;  %v3056_v30 = vld [vmem:[%s5474_s8 + $0x168] sm:$0xff]  ;;  %v3121_v31 = vld [vmem:[%s5474_s8 + $0x370] sm:$0xff] }
 0x338   : > { %v4219_v61 = vpop.eup %4218  ;;  %v2364_v42 = vmul.f32 %v4217_v37, %v4940_v24  ;;  %3859 = vmatprep.subr.mxu1 %v4811_v1  ;;  %v2906_v43 = vpop.xlane.xlu1 %2905  ;;  %v4044_v37 = vpack.c.bf16 %v3092_v7, %v3091_v59  ;;  %v3111_v59 = vld [vmem:[%s5474_s8 + $0x320] sm:$0xff]  ;;  %v3101_v7 = vld [vmem:[%s5474_s8 + $0x2d0] sm:$0xff] }
 0x339   : > { %4228 = vrcp.f32 %v2906_v43  ;;  %v2545_v44 = vmul.f32 %v4219_v61, %v4942_v53  ;;  %v3060_v53 = vld [vmem:[%s5474_s8 + $0x188] sm:$0xff]  ;;  %v4038_v61 = vpack.c.bf16 %v3056_v30, %v3055_v21  ;;  %v3074_v43 = vld [vmem:[%s5474_s8 + $0x1f8] sm:$0xff]  ;;  %v3129_v30 = vld [vmem:[%s5474_s8 + $0x3b0] sm:$0xff] }
 0x33a   : > { %3852 = vmatmul.mubr.msk.f32.vlgmr.msra.gmra.mrb[24].mxu1 %vm1614_vm1, %v2364_v42  ;;  %4045 = vmatprep.subr.bf16.mxu0 %v4044_v37  ;;  %v3073_v42 = vld [vmem:[%s5474_s8 + $0x1f0] sm:$0xff]  ;;  %v3102_v21 = vld [vmem:[%s5474_s8 + $0x2d8] sm:$0xff] }
 0x33b   : > { %v4221_v45 = vpop.eup %4220  ;;  %3860 = vmatpush3.msra.mxu1 %v4811_v1  ;;  %3861 = vmatprep.mubr.msk.f32.mxu1 %vm1614_vm1, %v2545_v44  ;;  %v4040_v44 = vpack.c.bf16 %v3074_v43, %v3073_v42  ;;  %v3130_v37 = vld [vmem:[%s5474_s8 + $0x3b8] sm:$0xff]  ;;  %v4062_v42 = vpack.c.bf16 %v3084_v14, %v3083_v35 }
 0x33c   : > { %v4223_v29 = vpop.eup %4222  ;;  %v2546_v63 = vmul.f32 %v4221_v45, %v4948_v32  ;;  %3869 = vmatprep.subr.mxu1 %v4818_v4  ;;  %v3057_v45 = vld [vmem:[%s5474_s8 + $0x170] sm:$0xff] }
 0x33d   : > { %v2727_v24 = vmul.f32 %v4223_v29, %v4950_v55  ;;  %v4012_v55 = vpack.c.bf16 %v3060_v53, %v3059_v46  ;;  %v3058_v29 = vld [vmem:[%s5474_s8 + $0x178] sm:$0xff]  ;;  %v3124_v46 = vld [vmem:[%s5474_s8 + $0x388] sm:$0xff] }
 0x33e   : > { %3862 = vmatmul.mubr.msk.f32.vlgmr.msra.gmra.mrb[26].mxu1 %vm1614_vm1, %v2546_v63  ;;  %v4042_v63 = vpack.c.bf16 %v3058_v29, %v3057_v45  ;;  %v3086_v45 = vld [vmem:[%s5474_s8 + $0x258] sm:$0xff] }
 0x33f   : > { %v4225_v1 = vpop.eup %4224  ;;  %3870 = vmatpush3.msra.mxu1 %v4818_v4  ;;  %3871 = vmatprep.mubr.msk.f32.mxu1 %vm1614_vm1, %v2727_v24  ;;  %v3061_v4 = vld [vmem:[%s5474_s8 + $0x190] sm:$0xff]  ;;  %v3123_v24 = vld [vmem:[%s5474_s8 + $0x380] sm:$0xff] }
 0x340   : > { %v4227_v32 = vpop.eup %4226  ;;  %v2728_v47 = vmul.f32 %v4225_v1, %v4956_v27  ;;  %3879 = vmatprep.subr.mxu1 %v4821_v6  ;;  %v3062_v27 = vld [vmem:[%s5474_s8 + $0x198] sm:$0xff]  ;;  %v4076_v53 = vpack.c.bf16 %v3124_v46, %v3123_v24  ;;  %v4088_v24 = vpack.c.bf16 %v3130_v37, %v3129_v30  ;;  %v3113_v46 = vld [vmem:[%s5474_s8 + $0x330] sm:$0xff] }
 0x341   : > { %v2909_v52 = vmul.f32 %v4227_v32, %v4958_v60  ;;  %v4016_v60 = vpack.c.bf16 %v3062_v27, %v3061_v4 }
 0x342   : > { %3872 = vmatmul.mubr.msk.f32.vlgmr.msra.gmra.mrb[28].mxu1 %vm1614_vm1, %v2728_v47  ;;  %v3075_v47 = vld [vmem:[%s5474_s8 + $0x200] sm:$0xff] }
 0x343   : > { %v4229_v54 = vpop.eup %4228  ;;  %3880 = vmatpush3.msra.mxu1 %v4821_v6  ;;  %3881 = vmatprep.mubr.msk.f32.mxu1 %vm1614_vm1, %v2909_v52  ;;  %v3064_v6 = vld [vmem:[%s5474_s8 + $0x1a8] sm:$0xff] }
 0x344   : > { %v2910_v56 = vmul.f32 %v4229_v54, %v4964_v3  ;;  %4013 = vmatprep.subr.bf16.mxu1 %v4012_v55  ;;  %v4018_v3 = vpack.c.bf16 %v3046_v62, %v3045_v58  ;;  %v4020_v33 = vpack.c.bf16 %v3064_v6, %v3063_v0  ;;  %v3076_v55 = vld [vmem:[%s5474_s8 + $0x208] sm:$0xff]  ;;  %v4048_v54 = vpack.c.bf16 %v3094_v36, %v3093_v26  ;;  %v3079_v6 = vld [vmem:[%s5474_s8 + $0x220] sm:$0xff] }
 0x345   : > { %v4046_v4 = vpack.c.bf16 %v3076_v55, %v3075_v47  ;;  %v3096_v58 = vld [vmem:[%s5474_s8 + $0x2a8] sm:$0xff]  ;;  %v4054_v11 = vpack.c.bf16 %v3080_v50, %v3079_v6  ;;  %v3131_v47 = vld [vmem:[%s5474_s8 + $0x3c0] sm:$0xff]  ;;  %v3133_v6 = vld [vmem:[%s5474_s8 + $0x3d0] sm:$0xff] }
 0x346   : > { %3882 = vmatmul.mubr.msk.f32.vlgmr.msra.gmra.mrb[30].mxu1 %vm1614_vm1, %v2910_v56  ;;  %v3078_v56 = vld [vmem:[%s5474_s8 + $0x218] sm:$0xff]  ;;  %v3132_v55 = vld [vmem:[%s5474_s8 + $0x3c8] sm:$0xff] }
 0x347   : > { %4015 = vmatpush3.bf16.msra.mxu1 %v4014_v48  ;;  %v3077_v48 = vld [vmem:[%s5474_s8 + $0x210] sm:$0xff] }
 0x348   : > { %4017 = vmatprep.subr.bf16.mxu1 %v4016_v60  ;;  %v3095_v60 = vld [vmem:[%s5474_s8 + $0x2a0] sm:$0xff]  ;;  %v4050_v0 = vpack.c.bf16 %v3078_v56, %v3077_v48  ;;  %v4092_v56 = vpack.c.bf16 %v3132_v55, %v3131_v47 }
 0x34b   : > { %4019 = vmatpush3.bf16.msra.mxu1 %v4018_v3 }
 0x34c   : > { %4021 = vmatprep.subr.bf16.mxu1 %v4020_v33  ;;  %v4052_v33 = vpack.c.bf16 %v3096_v58, %v3095_v60  ;;  %v3115_v60 = vld [vmem:[%s5474_s8 + $0x340] sm:$0xff]  ;;  %v3116_v58 = vld [vmem:[%s5474_s8 + $0x348] sm:$0xff] }
 0x34d   : > { %v4094_v38 = vpack.c.bf16 %v3116_v58, %v3115_v60 }
 0x34f   : > { %4023 = vmatpush3.bf16.msra.mxu1 %v4022_v2  ;;  %v3098_v2 = vld [vmem:[%s5474_s8 + $0x2b8] sm:$0xff] }
 0x350   : > { %4025 = vmatprep.subr.bf16.mxu1 %v4024_v8  ;;  %v3125_v8 = vld [vmem:[%s5474_s8 + $0x390] sm:$0xff]  ;;  %v4056_v19 = vpack.c.bf16 %v3098_v2, %v3097_v34 }
 0x351   : > { %v4080_v49 = vpack.c.bf16 %v3126_v9, %v3125_v8  ;;  %v3090_v9 = vld [vmem:[%s5474_s8 + $0x278] sm:$0xff] }
 0x353   : > { %4027 = vmatpush3.bf16.msra.mxu1 %v4026_v13  ;;  %v3081_v13 = vld [vmem:[%s5474_s8 + $0x230] sm:$0xff] }
 0x354   : > { %4029 = vmatprep.subr.bf16.mxu1 %v4028_v15  ;;  %v3082_v15 = vld [vmem:[%s5474_s8 + $0x238] sm:$0xff] }
 0x357   : > { %4031 = vmatpush3.bf16.msra.mxu1 %v4030_v20  ;;  %v3109_v20 = vld [vmem:[%s5474_s8 + $0x310] sm:$0xff] }
 0x358   : > { %4033 = vmatprep.subr.bf16.mxu1 %v4032_v28  ;;  %v4058_v28 = vpack.c.bf16 %v3082_v15, %v3081_v13  ;;  %v4082_v57 = vpack.c.bf16 %v3110_v22, %v3109_v20  ;;  %v3136_v13 = vld [vmem:[%s5474_s8 + $0x3e8] sm:$0xff]  ;;  %v4074_v15 = vpack.c.bf16 %v3090_v9, %v3089_v5  ;;  %v3119_v20 = vld [vmem:[%s5474_s8 + $0x360] sm:$0xff] }
 0x359   : > { %v3120_v22 = vld [vmem:[%s5474_s8 + $0x368] sm:$0xff] }
 0x35a   : > { %v4102_v23 = vpack.c.bf16 %v3120_v22, %v3119_v20 }
 0x35b   : > { %4035 = vmatpush3.bf16.msra.mxu1 %v4034_v39 }
 0x35c   : > { %4037 = vmatprep.subr.bf16.mxu1 %v4036_v41  ;;  %v3112_v41 = vld [vmem:[%s5474_s8 + $0x328] sm:$0xff] }
 0x35d   : > { %v4086_v43 = vpack.c.bf16 %v3112_v41, %v3111_v59 }
 0x35f   : > { %4039 = vmatpush3.bf16.msra.mxu1 %v4038_v61 }
 0x360   : > { %4041 = vmatprep.subr.bf16.mxu1 %v4040_v44  ;;  %v3085_v44 = vld [vmem:[%s5474_s8 + $0x250] sm:$0xff] }
 0x361   : > { %v4066_v36 = vpack.c.bf16 %v3086_v45, %v3085_v44 }
 0x363   : > { %4043 = vmatpush3.bf16.msra.mxu1 %v4042_v63  ;;  %v4064_v63 = vpack.c.bf16 %v3102_v21, %v3101_v7 }
 0x364   : > { %4077 = vmatprep.subr.bf16.mxu1 %v4076_v53  ;;  %v3114_v53 = vld [vmem:[%s5474_s8 + $0x338] sm:$0xff] }
 0x3fd   : > { %v3813_v1 = vpop.f32.mrb[16].mxu1 }
 0x3fe   : > { %v1710_v32 = vpop.f32.mrb[17].mxu1 }
 0x401   : > { %v3823_v52 = vpop.f32.mrb[18].mxu1 }
 0x402   : > { %v1892_v27 = vpop.f32.mrb[19].mxu1 }
 0x403   : > { %3210 = vmatprep.mubr.f32.mxu0 %v1892_v27  ;;  %v3088_v27 = vld [vmem:[%s5474_s8 + $0x268] sm:$0xff] }
 0x404   : > { %3211 = vmatmul.mubr.f32.vlgmr.msra.gmra.mrb[32].mxu0 %v1710_v32  ;;  %v3104_v32 = vld [vmem:[%s5474_s8 + $0x2e8] sm:$0xff] }
 0x405   : > { %4047 = vmatpush3.bf16.msra.mxu0 %v4046_v4  ;;  %v3833_v62 = vpop.f32.mrb[20].mxu1  ;;  %3215 = vmatprep.mubr.f32.mxu0 %v3823_v52  ;;  %v4090_v52 = vpack.c.bf16 %v3114_v53, %v3113_v46  ;;  %v3087_v4 = vld [vmem:[%s5474_s8 + $0x260] sm:$0xff] }
 0x406   : > { %v2074_v3 = vpop.f32.mrb[21].mxu1  ;;  %4049 = vmatprep.subr.bf16.mxu0 %v4048_v54  ;;  %v4070_v50 = vpack.c.bf16 %v3088_v27, %v3087_v4 }
 0x408   : > { %3216 = vmatmul.mubr.f32.gmra.mrb[34].mxu0 %v3813_v1  ;;  %v3103_v1 = vld [vmem:[%s5474_s8 + $0x2e0] sm:$0xff] }
 0x409   : > { %4051 = vmatpush3.bf16.msra.mxu0 %v4050_v0  ;;  %v3843_v10 = vpop.f32.mrb[22].mxu1  ;;  %v4068_v48 = vpack.c.bf16 %v3104_v32, %v3103_v1  ;;  %v3106_v0 = vld [vmem:[%s5474_s8 + $0x2f8] sm:$0xff] }
 0x40a   : > { %v2256_v16 = vpop.f32.mrb[23].mxu1  ;;  %4053 = vmatprep.subr.bf16.mxu0 %v4052_v33 }
 0x40b   : > { %3285 = vmatprep.mubr.f32.mxu1 %v2256_v16 }
 0x40c   : > { %3286 = vmatmul.mubr.f32.vlgmr.msra.gmra.mrb[32].mxu1 %v2074_v3  ;;  %v3134_v3 = vld [vmem:[%s5474_s8 + $0x3d8] sm:$0xff] }
 0x40d   : > { %4055 = vmatpush3.bf16.msra.mxu0 %v4054_v11  ;;  %4079 = vmatpush3.bf16.msra.mxu1 %v4078_v12  ;;  %v5289_v51 = vpop.f32.mrb[24].mxu1  ;;  %v4096_v8 = vpack.c.bf16 %v3134_v3, %v3133_v6  ;;  %v3118_v11 = vld [vmem:[%s5474_s8 + $0x358] sm:$0xff]  ;;  %v3135_v12 = vld [vmem:[%s5474_s8 + $0x3e0] sm:$0xff] }
 0x40e   : > { %3290 = vmatprep.mubr.f32.mxu1 %v3843_v10  ;;  %v5297_v39 = vpop.f32.mrb[25].mxu1  ;;  %4057 = vmatprep.subr.bf16.mxu0 %v4056_v19  ;;  %v3117_v10 = vld [vmem:[%s5474_s8 + $0x350] sm:$0xff]  ;;  %v4100_v19 = vpack.c.bf16 %v3136_v13, %v3135_v12 }
 0x40f   : > { %4081 = vmatprep.subr.bf16.mxu1 %v4080_v49  ;;  %v4098_v16 = vpack.c.bf16 %v3118_v11, %v3117_v10  ;;  %v3138_v49 = vld [vmem:[%s5474_s8 + $0x3f8] sm:$0xff] }
 0x410   : > { %3291 = vmatmul.mubr.f32.gmra.mrb[34].mxu1 %v3833_v62  ;;  %v3105_v62 = vld [vmem:[%s5474_s8 + $0x2f0] sm:$0xff]  ;;  %v4104_v25 = vpack.c.bf16 %v3138_v49, %v3137_v17 }
 0x411   : > { %4059 = vmatpush3.bf16.msra.mxu0 %v4058_v28  ;;  %4083 = vmatpush3.bf16.msra.mxu1 %v4082_v57  ;;  %v5317_v61 = vpop.f32.mrb[26].mxu1  ;;  %v4072_v2 = vpack.c.bf16 %v3106_v0, %v3105_v62  ;;  %v3122_v28 = vld [vmem:[%s5474_s8 + $0x378] sm:$0xff] }
 0x412   : > { %v2620_v29 = vpop.f32.mrb[27].mxu1  ;;  %4061 = vmatprep.subr.bf16.mxu0 %v4060_v40  ;;  %4085 = vmatprep.subr.bf16.mxu1 %v4084_v18  ;;  %v4106_v57 = vpack.c.bf16 %v3122_v28, %v3121_v31 }
 0x413   : > { %3360 = vmatprep.mubr.f32.mxu0 %v2620_v29 }
 0x415   : > { %4063 = vmatpush3.bf16.msra.mxu0 %v4062_v42  ;;  %4087 = vmatpush3.bf16.msra.mxu1 %v4086_v43  ;;  %v3873_v26 = vpop.f32.mrb[28].mxu1 }
 0x416   : > { %v2802_v54 = vpop.f32.mrb[29].mxu1  ;;  %4065 = vmatprep.subr.bf16.mxu0 %v4064_v63  ;;  %4089 = vmatprep.subr.bf16.mxu1 %v4088_v24 }
 0x419   : > { %4067 = vmatpush3.bf16.msra.mxu0 %v4066_v36  ;;  %4091 = vmatpush3.bf16.msra.mxu1 %v4090_v52  ;;  %v3883_v33 = vpop.f32.mrb[30].mxu1 }
 0x41a   : > { %v2984_v34 = vpop.f32.mrb[31].mxu1  ;;  %4069 = vmatprep.subr.bf16.mxu0 %v4068_v48  ;;  %4093 = vmatprep.subr.bf16.mxu1 %v4092_v56 }
 0x41b   : > { %3435 = vmatprep.mubr.f32.mxu1 %v2984_v34 }
 0x41d   : > { %4071 = vmatpush3.bf16.msra.mxu0 %v4070_v50  ;;  %4095 = vmatpush3.bf16.msra.mxu1 %v4094_v38 }
 0x41e   : > { %4073 = vmatprep.subr.bf16.mxu0 %v4072_v2  ;;  %4097 = vmatprep.subr.bf16.mxu1 %v4096_v8 }
 0x421   : > { %4075 = vmatpush3.bf16.msra.mxu0 %v4074_v15  ;;  %4099 = vmatpush3.bf16.msra.mxu1 %v4098_v16 }
 0x422   : > { %4101 = vmatprep.subr.bf16.mxu1 %v4100_v19 }
 0x424   : > { %3361 = vmatmul.mubr.f32.vlgmr.msra.gmra.mrb[36].mxu0 %v5297_v39  ;;  %v3596_v39 = vld [vmem:[%s5475_s9] ss:$0 sm:$0xff] }
 0x425   : > { %3365 = vmatprep.mubr.f32.mxu0 %v5317_v61  ;;  %4103 = vmatpush3.bf16.msra.mxu1 %v4102_v23 }
 0x426   : > { %4105 = vmatprep.subr.bf16.mxu1 %v4104_v25 }
 0x428   : > { %3366 = vmatmul.mubr.f32.gmra.mrb[38].mxu0 %v5289_v51 }
 0x429   : > { %4107 = vmatpush3.bf16.msra.mxu1 %v4106_v57 }
 0x42c   : > { %3436 = vmatmul.mubr.f32.vlgmr.msra.gmra.mrb[36].mxu1 %v2802_v54 }
 0x42d   : > { %3440 = vmatprep.mubr.f32.mxu1 %v3883_v33 }
 0x430   : > { %3441 = vmatmul.mubr.f32.gmra.mrb[38].mxu1 %v3873_v26 }
 0x4d7   : > { %v3684_v35 = vpop.f32.mrb[32].mxu0 }
 0x4d8   : > { %v3685_v14 = vpop.f32.mrb[33].mxu0 }
 0x4d9   : > { %v3686_v40 = vadd.f32 %v3685_v14, %v3684_v35 }
 0x4db   : > { %v3687_v18 = vpop.f32.mrb[34].mxu0  ;;  %v3213_v30 = vadd.f32 %v3686_v40, %v3596_v39 }
 0x4dc   : > { %v3688_v59 = vpop.f32.mrb[35].mxu0 }
 0x4dd   : > { %v3689_v41 = vadd.f32 %v3688_v59, %v3687_v18 }
 0x4df   : > { %v3722_v7 = vpop.f32.mrb[32].mxu1  ;;  %v3218_v43 = vadd.f32 %v3689_v41, %v3596_v39 }
 0x4e0   : > { %v3723_v21 = vpop.f32.mrb[33].mxu1 }
 0x4e1   : > { %v3724_v37 = vadd.f32 %v3723_v21, %v3722_v7 }
 0x4e3   : > { %v3288_v51 = vadd.f32 %v3724_v37, %v3213_v30  ;;  %v3725_v61 = vpop.f32.mrb[34].mxu1 }
 0x4e4   : > { %v3726_v42 = vpop.f32.mrb[35].mxu1 }
 0x4e5   : > { %v3727_v44 = vadd.f32 %v3726_v42, %v3725_v61 }
 0x4e7   : > { %v3293_v45 = vadd.f32 %v3727_v44, %v3218_v43 }
 0x4f7   : > { %v3760_v29 = vpop.f32.mrb[36].mxu0 }
 0x4f8   : > { %v3761_v63 = vpop.f32.mrb[37].mxu0 }
 0x4f9   : > { %v3762_v24 = vadd.f32 %v3761_v63, %v3760_v29 }
 0x4fb   : > { %v3363_v46 = vadd.f32 %v3762_v24, %v3288_v51  ;;  %v3763_v53 = vpop.f32.mrb[38].mxu0 }
 0x4fc   : > { %v3764_v1 = vpop.f32.mrb[39].mxu0 }
 0x4fd   : > { %v3765_v32 = vadd.f32 %v3764_v1, %v3763_v53 }
 0x4ff   : > { %v3368_v47 = vadd.f32 %v3765_v32, %v3293_v45  ;;  %v3798_v55 = vpop.f32.mrb[36].mxu1 }
 0x500   : > { %v3799_v26 = vpop.f32.mrb[37].mxu1 }
 0x501   : > { %v3800_v36 = vadd.f32 %v3799_v26, %v3798_v55 }
 0x503   : > { %v3438_v52 = vadd.f32 %v3800_v36, %v3363_v46  ;;  %v3801_v4 = vpop.f32.mrb[38].mxu1 }
 0x504   : > { %v3802_v27 = vpop.f32.mrb[39].mxu1 }
 0x505   : > { %3446 = vst.msk [vmem:[%s390_s12] sm:$0xff] %vm485_vm0, %v3438_v52  ;;  %v3803_v54 = vadd.f32 %v3802_v27, %v3801_v4 }
 0x507   : > { %v3443_v48 = vadd.f32 %v3803_v54, %v3368_v47 }
 0x509   : > { %3447 = vst.msk [vmem:[%s390_s12 + $0x8] sm:$0xff] %vm485_vm0, %v3443_v48 }
 0x50a   : > { %4243 = shalt.err (!%p4240_p5)
}
 0x50b   : > { %s4244_s19 = scalar_lea.hbm %s5415_s29, 256  ;;  %s4248_s12 = scalar_lea.hbm %s5476_s10, 512 }
 0x50c   : > { %p4245_p6 = scmp.ne.s32.totalorder %s5415_s29, %s4244_s19  ;;  %p4249_p10 = scmp.lt.u32.totalorder %s5415_s29, %s5476_s10 }
 0x50d   : > { %p4250_p11 = scmp.lt.u32.totalorder %s4248_s12, %s4244_s19  ;;  %p4252_p13 = scmp.lt.u32.totalorder %s4244_s19, %s5415_s29 }
 0x50e   : > { %p4246_p7 = pnand %p4245_p6, %p4409_p4 }
 0x50f   : > { %p4251_p12 = por %p4250_p11, %p4249_p10 }
 0x510   : > { %p4247_p9 = pneg %p4246_p7 }
 0x511   : > { %p4253_p0 = por %p4252_p13, %p4251_p12 }
 0x513   : > { %p4254_p1 = pnand %p4253_p0, %p4247_p9 }
 0x515   : > { %4257 = shalt.err (!%p4254_p1)
}
 0x516   : > { %s4312_s11 = smov 128   ;;  %s4313_s16 = smov 8  }
 0x517   : > { %4108 = dma.vmem_to_hbm [thread:$0]  (%p4409_p4), %s5417_s20, 256, %s5415_s29, %s5420_s21, %s4312_s11, %s4312_s11, %s4313_s16  }
 0x518 PF: > { %p4114_p2 = scmp.ge.s32.totalorder %s4308_s18, 2  ;;  %s3479_s22 = sand.u32 1, %s4288_s13  }
 0x519   : > { %s3480_s26 = scalar_lea.sflag [#allocation6], %s3479_s22 }
 0x51a   : > { %p4111_p3 = pnand %p4114_p2, %p4416_p8 }
 0x51c   : > { %4283 = dma.done.wait (!%p4111_p3), %s3480_s26, 256  }
 0x51d   : > { %4285 = vsyncadd (!%p4111_p3), %s3480_s26, 4294967040  ;;  %s23_s18 = sadd.s32 1, %s4308_s18   ;;  %s5484_s28 = sld [smem:[#allocation10_spill]] }
 0x51e   : > { %p20_p5 = scmp.ge.s32.totalorder %s23_s18, 4   ;;  %s5485_s16 = sld [smem:[#allocation8_spill]] }
 0x51f   : > { %s5486_s17 = sld [smem:[#allocation9_spill]]  ;;  %s5487_s13 = smov %s4292_s14 }
 0x520   : > { %s5488_s14 = smov %s4296_s15  ;;  %22 = sbr.rel (!%p20_p5) target bundleno = 4 (0x4), region = 102 }
 0x523   : > { %s5489_s15 = smov %s5484_s28 }
 0x527   :  { %3485 = vsyncpa [#allocation6], 1 }
 0x528   :  { %3487 = vsyncpa [#allocation6 + $0x1], 1 }

// kernel: tpu_custom_call.1
= control target key start
LH: loop header
LB: loop body
LE: loop exit
PB: predicated region body
PF: predicated region fallthrough
CT: control target
= control target key end

     0   :  { %15 = vsyncpa [#allocation6], 0  ;;  %s5466_s0 = inlined_call_operand.vmem [shape: f32[2,16,32], index: 0, kind: input, shape index: {}]   ;;  %s5467_s1 = inlined_call_operand.vmem [shape: f32[2,8,32], index: 1, kind: input, shape index: {}]   ;;  %s5468_s2 = inlined_call_operand.vmem [shape: f32[32,1024], index: 2, kind: input, shape index: {}]   ;;  %s5469_s3 = inlined_call_operand.vmem [shape: f32[1,1024], index: 3, kind: input, shape index: {}]   ;;  %s5470_s4 = inlined_call_operand.vmem [shape: f32[32,1024], index: 4, kind: input, shape index: {}]   ;;  %s5471_s5 = inlined_call_operand.vmem [shape: f32[1,1024], index: 5, kind: input, shape index: {}]   ;;  %s5472_s6 = inlined_call_operand.vmem [shape: f32[32,1024], index: 6, kind: input, shape index: {}]   ;;  %s5473_s7 = inlined_call_operand.vmem [shape: f32[1,1024], index: 7, kind: input, shape index: {}]   ;;  %s5474_s8 = inlined_call_operand.vmem [shape: f32[1024,32], index: 8, kind: input, shape index: {}]   ;;  %s5475_s9 = inlined_call_operand.vmem [shape: f32[1,32], index: 9, kind: input, shape index: {}]   ;;  %s5476_s10 = inlined_call_operand.hbm [shape: f32[2,16,32], index: 10, kind: output, shape index: {}]  }
   0x1   :  { %17 = vsyncpa [#allocation6 + $0x1], 0  ;;  %s4369_s13 = smov 0   ;;  %s4371_s14 = smov 0  }
   0x2   :  { %s4373_s15 = smov 0   ;;  %s4375_s16 = smov 0  }
   0x3   :  { %s4377_s17 = smov 0   ;;  %s4379_s18 = smov 0  }
   0x4 LB: > { %5479 = sst [smem:[#allocation8_spill]] %s4304_s17  ;;  %s3555_s19 = sadd.s32 4294967295, %s4308_s18   ;;  %s4308_s18 = sphi %s4379_s18, %s23_s18   ;;  %s4304_s17 = sphi %s4377_s17, %s5486_s17   ;;  %s4300_s16 = sphi %s4375_s16, %s5485_s16   ;;  %s4296_s15 = sphi %s4373_s15, %s5489_s15   ;;  %s4292_s14 = sphi %s4371_s14, %s5488_s14   ;;  %s4288_s13 = sphi %s4369_s13, %s5487_s13  }
   0x5   : > { %s3556_s20 = sadd.s32 4294967294, %s4308_s18   ;;  %s35_s21 = sadd.s32 1, %s4304_s17 }
   0x6   : > { %s266_s22 = sadd.s32 1, %s4296_s15  ;;  %p37_p0 = scmp.ge.s32.totalorder %s35_s21, 2 }
   0x7   : > { %p276_p1 = scmp.ne.s32.totalorder %s4296_s15, %s4292_s14  ;;  %p277_p2 = scmp.eq.s32.totalorder %s3555_s19, 1 }
   0x8   : > { %p282_p3 = scmp.ne.s32.totalorder %s4292_s14, %s4288_s13  ;;  %s5491_s21 = smov (%p37_p0, %s35_s21), 0 }
   0x9   : > { %5480 = sst [smem:[#allocation9_spill]] %s5491_s21  ;;  %p4409_p4 = por %p277_p2, %p276_p1 }
   0xa   : > { %p283_p5 = scmp.eq.s32.totalorder %s3556_s20, 1  ;;  %s261_s24 = ssub.s32 %s4304_s17, %s5491_s21 }
   0xb   : > { %p3559_p6 = scmp.ge.s32.totalorder %s4308_s18, 1  ;;  %p264_p7 = scmp.eq.s32.totalorder %s261_s24, 0 }
   0xc   : > { %p4416_p8 = por %p283_p5, %p282_p3  ;;  %p345_p9 = scmp.lt.s32.totalorder %s4308_s18, 3 }
   0xd   : > { %s4422_s26 = scalar_select %p264_p7, %s4296_s15, %s266_s22  }
   0xe   : > { %p346_p10 = pnand %p3559_p6, %p345_p9 }
   0xf   : > { %5483 = sst [smem:[#allocation10_spill]] %s4422_s26  ;;  %v412_v0 = vld [vmem:[%s5470_s4 + $0x8] sm:$0xff] (!%p346_p10)  ;;  %v411_v2 = vld [vmem:[%s5470_s4] sm:$0xff] (!%p346_p10)  ;;  %p392_p11 = scmp.lt.s32.totalorder (!%p346_p10), %s4300_s16, 1  ;;  %v4310_v7 = vmov (!%p346_p10), 0.0   ;;  %v414_v12 = vld [vmem:[%s5470_s4 + $0x18] sm:$0xff] (!%p346_p10) }
  0x10   : > { %349 = sbr.rel (%p346_p10) target bundleno = 1304 (0x518), region = 60  ;;  %v420_v1 = vld [vmem:[%s5470_s4 + $0x48] sm:$0xff] (!%p346_p10)  ;;  %v419_v4 = vld [vmem:[%s5470_s4 + $0x40] sm:$0xff] (!%p346_p10)  ;;  %553 = vmatprep.mubr.f32.mxu0 (!%p346_p10), %v4310_v7  ;;  %624 = vmatprep.mubr.f32.mxu1 (!%p346_p10), %v4310_v7  ;;  %v422_v13 = vld [vmem:[%s5470_s4 + $0x58] sm:$0xff] (!%p346_p10)  ;;  %vm485_vm0 = vcmask (!%p346_p10), 261120   ;;  %vm1614_vm1 = vcmask (!%p346_p10), 64512  }
  0x11   : > { %v3884_v3 = vpack.c.bf16 (!%p346_p10), %v420_v1, %v412_v0  ;;  %v428_v5 = vld [vmem:[%s5470_s4 + $0x88] sm:$0xff] (!%p346_p10)  ;;  %v3886_v8 = vpack.c.bf16 (!%p346_p10), %v419_v4, %v411_v2  ;;  %v427_v10 = vld [vmem:[%s5470_s4 + $0x80] sm:$0xff] (!%p346_p10)  ;;  %v3892_v17 = vpack.c.bf16 (!%p346_p10), %v422_v13, %v414_v12  ;;  %v413_v18 = vld [vmem:[%s5470_s4 + $0x10] sm:$0xff] (!%p346_p10)  ;;  %s388_s30 = sand.u32 (!%p346_p10), 1, %s4292_s14   ;;  %s3603_s17 = sshll.u32 (!%p346_p10), %s4300_s16, 8 }
  0x12   : > { %v436_v6 = vld [vmem:[%s5470_s4 + $0xc8] sm:$0xff] (!%p346_p10)  ;;  %v435_v11 = vld [vmem:[%s5470_s4 + $0xc0] sm:$0xff] (!%p346_p10)  ;;  %v421_v19 = vld [vmem:[%s5470_s4 + $0x50] sm:$0xff] (!%p346_p10)  ;;  %s5420_s21 = scalar_lea.sflag (!%p346_p10), [#allocation6], %s388_s30 }
  0x13   : > { %v3888_v9 = vpack.c.bf16 (!%p346_p10), %v436_v6, %v428_v5  ;;  %3885 = vmatprep.subr.bf16.mxu0 (!%p346_p10), %v3884_v3  ;;  %v416_v14 = vld [vmem:[%s5470_s4 + $0x28] sm:$0xff] (!%p346_p10)  ;;  %v3890_v16 = vpack.c.bf16 (!%p346_p10), %v435_v11, %v427_v10  ;;  %v415_v20 = vld [vmem:[%s5470_s4 + $0x20] sm:$0xff] (!%p346_p10)  ;;  %v3894_v22 = vpack.c.bf16 (!%p346_p10), %v421_v19, %v413_v18  ;;  %v430_v24 = vld [vmem:[%s5470_s4 + $0x98] sm:$0xff] (!%p346_p10)  ;;  %3893 = vmatprep.subr.bf16.mxu1 (!%p346_p10), %v3892_v17 }
  0x14   : > { %v424_v15 = vld [vmem:[%s5470_s4 + $0x68] sm:$0xff] (!%p346_p10)  ;;  %3887 = vmatpush1.bf16.msra.mxu0 (!%p346_p10), %v3886_v8  ;;  %v423_v23 = vld [vmem:[%s5470_s4 + $0x60] sm:$0xff] (!%p346_p10)  ;;  %v438_v25 = vld [vmem:[%s5470_s4 + $0xd8] sm:$0xff] (!%p346_p10) }
  0x15   : > { %3889 = vmatprep.subr.bf16.mxu0 (!%p346_p10), %v3888_v9  ;;  %v3900_v21 = vpack.c.bf16 (!%p346_p10), %v424_v15, %v416_v14  ;;  %v3896_v26 = vpack.c.bf16 (!%p346_p10), %v438_v25, %v430_v24  ;;  %v432_v27 = vld [vmem:[%s5470_s4 + $0xa8] sm:$0xff] (!%p346_p10)  ;;  %3895 = vmatpush1.bf16.msra.mxu1 (!%p346_p10), %v3894_v22  ;;  %v429_v29 = vld [vmem:[%s5470_s4 + $0x90] sm:$0xff] (!%p346_p10)  ;;  %v3902_v32 = vpack.c.bf16 (!%p346_p10), %v423_v23, %v415_v20  ;;  %v418_v34 = vld [vmem:[%s5470_s4 + $0x38] sm:$0xff] (!%p346_p10) }
  0x16   : > { %v440_v28 = vld [vmem:[%s5470_s4 + $0xe8] sm:$0xff] (!%p346_p10)  ;;  %v437_v30 = vld [vmem:[%s5470_s4 + $0xd0] sm:$0xff] (!%p346_p10)  ;;  %v426_v35 = vld [vmem:[%s5470_s4 + $0x78] sm:$0xff] (!%p346_p10) }
  0x17   : > { %s4452_s19 = scalar_select %p392_p11, %s4300_s16, 1  ;;  %3897 = vmatprep.subr.bf16.mxu1 %v3896_v26  ;;  %v3898_v33 = vpack.c.bf16 %v437_v30, %v429_v29  ;;  %v3904_v36 = vpack.c.bf16 %v440_v28, %v432_v27  ;;  %v431_v37 = vld [vmem:[%s5470_s4 + $0xa0] sm:$0xff]  ;;  %v3908_v39 = vpack.c.bf16 %v426_v35, %v418_v34  ;;  %v417_v40 = vld [vmem:[%s5470_s4 + $0x30] sm:$0xff]  ;;  %v774_v41 = vld [vmem:[%s5472_s6 + $0x8] sm:$0xff] }
  0x18   : > { %3891 = vmatpush1.bf16.msra.mxu0 %v3890_v16  ;;  %v439_v38 = vld [vmem:[%s5470_s4 + $0xe0] sm:$0xff]  ;;  %v782_v42 = vld [vmem:[%s5472_s6 + $0x48] sm:$0xff]  ;;  %v425_v43 = vld [vmem:[%s5470_s4 + $0x70] sm:$0xff] }
  0x19   : > { %s3563_s11 = sshll.u32 %s4452_s19, 3  ;;  %3901 = vmatprep.subr.bf16.mxu0 %v3900_v21  ;;  %3899 = vmatpush1.bf16.msra.mxu1 %v3898_v33  ;;  %v3910_v44 = vpack.c.bf16 %v425_v43, %v417_v40  ;;  %v434_v45 = vld [vmem:[%s5470_s4 + $0xb8] sm:$0xff]  ;;  %v3906_v47 = vpack.c.bf16 %v439_v38, %v431_v37  ;;  %v433_v49 = vld [vmem:[%s5470_s4 + $0xb0] sm:$0xff]  ;;  %v3916_v51 = vpack.c.bf16 %v782_v42, %v774_v41  ;;  %v773_v52 = vld [vmem:[%s5472_s6] sm:$0xff]  ;;  %s3602_s27 = sshll.u32 %s4452_s19, 4 }
  0x1a   : > { %s404_s29 = scalar_lea.vmem %s5467_s1, %s3563_s11  ;;  %v442_v46 = vld [vmem:[%s5470_s4 + $0xf8] sm:$0xff]  ;;  %v441_v50 = vld [vmem:[%s5470_s4 + $0xf0] sm:$0xff]  ;;  %3909 = vmatprep.subr.bf16.mxu1 %v3908_v39  ;;  %v781_v53 = vld [vmem:[%s5472_s6 + $0x40] sm:$0xff]  ;;  %s399_s22 = scalar_lea.vmem %s5466_s0, %s3602_s27 }
  0x1b   : > { %v4500_v31 = vld [vmem:[%s404_s29] sm:$0xff]  ;;  %v3912_v48 = vpack.c.bf16 %v442_v46, %v434_v45  ;;  %v790_v54 = vld [vmem:[%s5472_s6 + $0x88] sm:$0xff]  ;;  %v776_v56 = vld [vmem:[%s5472_s6 + $0x18] sm:$0xff]  ;;  %v3914_v58 = vpack.c.bf16 %v441_v50, %v433_v49  ;;  %v3918_v59 = vpack.c.bf16 %v781_v53, %v773_v52  ;;  %s3560_s27 = sshll.u32 %s388_s30, 4  ;;  %s5415_s29 = scalar_lea.hbm %s5476_s10, %s3603_s17 }
  0x1c   : > { %3564 = vmatmul.mubr.msk.f32.vlgmr.msra.gmra.mrb[0].mxu0 %vm485_vm0, %v4500_v31  ;;  %3565 = vmatmul.mubr.msk.f32.vlgmr.msra.gmra.mrb[0].mxu1 %vm485_vm0, %v4500_v31  ;;  %v798_v55 = vld [vmem:[%s5472_s6 + $0xc8] sm:$0xff]  ;;  %v784_v57 = vld [vmem:[%s5472_s6 + $0x58] sm:$0xff]  ;;  %v789_v60 = vld [vmem:[%s5472_s6 + $0x80] sm:$0xff]  ;;  %s390_s12 = scalar_lea.vmem [#allocation5], %s3560_s27 }
  0x1d   : > { %3903 = vmatpush1.bf16.msra.mxu0 %v3902_v32  ;;  %695 = vmatprep.mubr.f32.mxu0 %v4310_v7  ;;  %v775_v61 = vld [vmem:[%s5472_s6 + $0x10] sm:$0xff]  ;;  %v3920_v63 = vpack.c.bf16 %v798_v55, %v790_v54  ;;  %v797_v0 = vld [vmem:[%s5472_s6 + $0xc0] sm:$0xff]  ;;  %v3924_v1 = vpack.c.bf16 %v784_v57, %v776_v56  ;;  %v792_v2 = vld [vmem:[%s5472_s6 + $0x98] sm:$0xff]  ;;  %s3464_s20 = sshll.u32 %s390_s12, 4  ;;  %s5417_s20 = int_to_ptr.vmem [resolvable:$true] %s3464_s20 }
  0x1e   : > { %3905 = vmatprep.subr.bf16.mxu0 %v3904_v36  ;;  %3911 = vmatpush1.bf16.msra.mxu1 %v3910_v44  ;;  %v783_v62 = vld [vmem:[%s5472_s6 + $0x50] sm:$0xff]  ;;  %v800_v3 = vld [vmem:[%s5472_s6 + $0xd8] sm:$0xff]  ;;  %v778_v4 = vld [vmem:[%s5472_s6 + $0x28] sm:$0xff]  ;;  %v3922_v8 = vpack.c.bf16 %v797_v0, %v789_v60  ;;  %s4230_s16 = scalar_lea.vmem %s5417_s20, 256 }
  0x1f   : > { %766 = vmatprep.mubr.f32.mxu1 %v4310_v7  ;;  %3913 = vmatprep.subr.bf16.mxu1 %v3912_v48  ;;  %v786_v5 = vld [vmem:[%s5472_s6 + $0x68] sm:$0xff]  ;;  %v3926_v6 = vpack.c.bf16 %v783_v62, %v775_v61  ;;  %v3928_v9 = vpack.c.bf16 %v800_v3, %v792_v2  ;;  %v791_v10 = vld [vmem:[%s5472_s6 + $0x90] sm:$0xff]  ;;  %v777_v13 = vld [vmem:[%s5472_s6 + $0x20] sm:$0xff]  ;;  %p4231_p12 = scmp.ne.s32.totalorder %s5417_s20, %s4230_s16 }
  0x20   : > { %v799_v11 = vld [vmem:[%s5472_s6 + $0xd0] sm:$0xff]  ;;  %v3932_v12 = vpack.c.bf16 %v786_v5, %v778_v4  ;;  %v785_v14 = vld [vmem:[%s5472_s6 + $0x60] sm:$0xff]  ;;  %v794_v15 = vld [vmem:[%s5472_s6 + $0xa8] sm:$0xff] }
  0x21   : > { %3907 = vmatpush1.bf16.msra.mxu0 %v3906_v47  ;;  %v802_v16 = vld [vmem:[%s5472_s6 + $0xe8] sm:$0xff]  ;;  %v780_v17 = vld [vmem:[%s5472_s6 + $0x38] sm:$0xff]  ;;  %v3930_v19 = vpack.c.bf16 %v799_v11, %v791_v10  ;;  %v3934_v20 = vpack.c.bf16 %v785_v14, %v777_v13  ;;  %v793_v21 = vld [vmem:[%s5472_s6 + $0xa0] sm:$0xff]  ;;  %p4232_p13 = pnand %p4231_p12, %p4409_p4 }
  0x22   : > { %3917 = vmatprep.subr.bf16.mxu0 %v3916_v51  ;;  %3915 = vmatpush1.bf16.msra.mxu1 %v3914_v58  ;;  %v788_v18 = vld [vmem:[%s5472_s6 + $0x78] sm:$0xff]  ;;  %v779_v22 = vld [vmem:[%s5472_s6 + $0x30] sm:$0xff]  ;;  %v3936_v24 = vpack.c.bf16 %v802_v16, %v794_v15  ;;  %v801_v25 = vld [vmem:[%s5472_s6 + $0xe0] sm:$0xff] }
  0x23   : > { %3925 = vmatprep.subr.bf16.mxu1 %v3924_v1  ;;  %v787_v23 = vld [vmem:[%s5472_s6 + $0x70] sm:$0xff]  ;;  %v3940_v26 = vpack.c.bf16 %v788_v18, %v780_v17  ;;  %v796_v27 = vld [vmem:[%s5472_s6 + $0xb8] sm:$0xff]  ;;  %v1150_v29 = vld [vmem:[%s5468_s2 + $0x8] sm:$0xff]  ;;  %v3938_v33 = vpack.c.bf16 %v801_v25, %v793_v21  ;;  %p4233_p0 = pneg %p4232_p13 }
  0x24   : > { %3566 = vmatmul.mubr.msk.f32.vlgmr.msra.gmra.mrb[2].mxu0 %vm485_vm0, %v4500_v31  ;;  %v804_v28 = vld [vmem:[%s5472_s6 + $0xf8] sm:$0xff]  ;;  %v1158_v30 = vld [vmem:[%s5468_s2 + $0x48] sm:$0xff]  ;;  %v3942_v32 = vpack.c.bf16 %v787_v23, %v779_v22  ;;  %v795_v35 = vld [vmem:[%s5472_s6 + $0xb0] sm:$0xff]  ;;  %v445_v22 = vlaneseq }
  0x25   : > { %3919 = vmatpush1.bf16.msra.mxu0 %v3918_v59  ;;  %911 = vmatprep.mubr.f32.mxu0 %v4310_v7  ;;  %v3944_v34 = vpack.c.bf16 %v804_v28, %v796_v27  ;;  %v803_v36 = vld [vmem:[%s5472_s6 + $0xf0] sm:$0xff]  ;;  %v3948_v37 = vpack.c.bf16 %v1158_v30, %v1150_v29  ;;  %v1149_v38 = vld [vmem:[%s5468_s2] sm:$0xff]  ;;  %v1166_v40 = vld [vmem:[%s5468_s2 + $0x88] sm:$0xff] }
  0x26   : > { %3921 = vmatprep.subr.bf16.mxu0 %v3920_v63  ;;  %3567 = vmatmul.mubr.msk.f32.vlgmr.msra.gmra.mrb[2].mxu1 %vm485_vm0, %v4500_v31  ;;  %v1157_v39 = vld [vmem:[%s5468_s2 + $0x40] sm:$0xff]  ;;  %v1174_v41 = vld [vmem:[%s5468_s2 + $0xc8] sm:$0xff]  ;;  %v1152_v42 = vld [vmem:[%s5468_s2 + $0x18] sm:$0xff]  ;;  %v3946_v44 = vpack.c.bf16 %v803_v36, %v795_v35  ;;  %v446_v23 = vshrl.u32 %v445_v22, 7 }
  0x27   : > { %3927 = vmatpush1.bf16.msra.mxu1 %v3926_v6  ;;  %982 = vmatprep.mubr.f32.mxu1 %v4310_v7  ;;  %v1160_v43 = vld [vmem:[%s5468_s2 + $0x58] sm:$0xff]  ;;  %v3950_v45 = vpack.c.bf16 %v1157_v39, %v1149_v38  ;;  %v1165_v46 = vld [vmem:[%s5468_s2 + $0x80] sm:$0xff]  ;;  %v1151_v47 = vld [vmem:[%s5468_s2 + $0x10] sm:$0xff]  ;;  %v3952_v49 = vpack.c.bf16 %v1174_v41, %v1166_v40 }
  0x28   : > { %3929 = vmatprep.subr.bf16.mxu1 %v3928_v9  ;;  %v1159_v48 = vld [vmem:[%s5468_s2 + $0x50] sm:$0xff]  ;;  %v1173_v50 = vld [vmem:[%s5468_s2 + $0xc0] sm:$0xff]  ;;  %v3956_v51 = vpack.c.bf16 %v1160_v43, %v1152_v42  ;;  %v1168_v52 = vld [vmem:[%s5468_s2 + $0x98] sm:$0xff]  ;;  %v4772_v27 = vsub.s32 5, %v446_v23  ;;  %v4774_v28 = vsub.s32 2, %v446_v23  ;;  %v4776_v29 = vsub.s32 3, %v446_v23 }
  0x29   : > { %3923 = vmatpush1.bf16.msra.mxu0 %v3922_v8  ;;  %v1176_v53 = vld [vmem:[%s5468_s2 + $0xd8] sm:$0xff]  ;;  %v1154_v54 = vld [vmem:[%s5468_s2 + $0x28] sm:$0xff]  ;;  %v3958_v56 = vpack.c.bf16 %v1159_v48, %v1151_v47  ;;  %v3954_v57 = vpack.c.bf16 %v1173_v50, %v1165_v46  ;;  %v1167_v59 = vld [vmem:[%s5468_s2 + $0x90] sm:$0xff]  ;;  %v451_v39 = vsub.s32 1, %v446_v23 }
  0x2a   : > { %3933 = vmatprep.subr.bf16.mxu0 %v3932_v12  ;;  %v1162_v55 = vld [vmem:[%s5468_s2 + $0x68] sm:$0xff]  ;;  %v3960_v58 = vpack.c.bf16 %v1176_v53, %v1168_v52  ;;  %v1175_v60 = vld [vmem:[%s5468_s2 + $0xd0] sm:$0xff]  ;;  %v1153_v62 = vld [vmem:[%s5468_s2 + $0x20] sm:$0xff] }
  0x2b   : > { %3931 = vmatpush1.bf16.msra.mxu1 %v3930_v19  ;;  %v3964_v61 = vpack.c.bf16 %v1162_v55, %v1154_v54  ;;  %v1161_v63 = vld [vmem:[%s5468_s2 + $0x60] sm:$0xff]  ;;  %v1170_v0 = vld [vmem:[%s5468_s2 + $0xa8] sm:$0xff]  ;;  %v1156_v2 = vld [vmem:[%s5468_s2 + $0x38] sm:$0xff]  ;;  %v3962_v4 = vpack.c.bf16 %v1175_v60, %v1167_v59 }
  0x2c   : > { %3568 = vmatmul.mubr.msk.f32.vlgmr.msra.gmra.mrb[4].mxu0 %vm485_vm0, %v4500_v31  ;;  %3941 = vmatprep.subr.bf16.mxu1 %v3940_v26  ;;  %v1178_v1 = vld [vmem:[%s5468_s2 + $0xe8] sm:$0xff]  ;;  %v1164_v3 = vld [vmem:[%s5468_s2 + $0x78] sm:$0xff]  ;;  %v1147_v5 = vld [vmem:[%s399_s22] sm:$0xff] }
  0x2d   : > { %3935 = vmatpush1.bf16.msra.mxu0 %v3934_v20  ;;  %1053 = vmatprep.mubr.f32.mxu0 %v4310_v7  ;;  %v3968_v6 = vpack.c.bf16 %v1178_v1, %v1170_v0  ;;  %v1169_v8 = vld [vmem:[%s5468_s2 + $0xa0] sm:$0xff]  ;;  %v3972_v10 = vpack.c.bf16 %v1164_v3, %v1156_v2  ;;  %v1155_v11 = vld [vmem:[%s5468_s2 + $0x30] sm:$0xff]  ;;  %v1172_v13 = vld [vmem:[%s5468_s2 + $0xb8] sm:$0xff] }
  0x2e   : > { %3937 = vmatprep.subr.bf16.mxu0 %v3936_v24  ;;  %3569 = vmatmul.mubr.msk.f32.vlgmr.msra.gmra.mrb[4].mxu1 %vm485_vm0, %v4500_v31  ;;  %v1177_v9 = vld [vmem:[%s5468_s2 + $0xe0] sm:$0xff]  ;;  %v1163_v12 = vld [vmem:[%s5468_s2 + $0x70] sm:$0xff]  ;;  %v1180_v14 = vld [vmem:[%s5468_s2 + $0xf8] sm:$0xff]  ;;  %v4766_v24 = vsub.s32 4, %v446_v23 }
  0x2f   : > { %3943 = vmatpush1.bf16.msra.mxu1 %v3942_v32  ;;  %1124 = vmatprep.mubr.f32.mxu1 %v4310_v7  ;;  %v1148_v15 = vld [vmem:[%s399_s22 + $0x8] sm:$0xff]  ;;  %v3970_v16 = vpack.c.bf16 %v1177_v9, %v1169_v8  ;;  %v3974_v17 = vpack.c.bf16 %v1163_v12, %v1155_v11  ;;  %v3976_v18 = vpack.c.bf16 %v1180_v14, %v1172_v13  ;;  %v1171_v19 = vld [vmem:[%s5468_s2 + $0xb0] sm:$0xff]  ;;  %v805_v25 = vld [vmem:[%s5473_s7] sm:$0xff]  ;;  %s4311_s22 = smov [#allocation5]  }
  0x30   : > { %3945 = vmatprep.subr.bf16.mxu1 %v3944_v34  ;;  %v1179_v20 = vld [vmem:[%s5468_s2 + $0xf0] sm:$0xff]  ;;  %v826_v26 = vrot.slane %v805_v25, %v4766_v24  ;;  %v818_v30 = vrot.slane %v805_v25, %v4774_v28  ;;  %v822_v32 = vrot.slane %v805_v25, %v4776_v29  ;;  %v4783_v34 = vsub.s32 7, %v446_v23  ;;  %v4790_v38 = vld [vmem:[%s5471_s5] sm:$0xff]  ;;  %s4234_s26 = sshll.u32 %s4311_s22, 4  ;;  %s4235_s26 = int_to_ptr.vmem [resolvable:$false] %s4234_s26 }
  0x31   : > { %3939 = vmatpush1.bf16.msra.mxu0 %v3938_v33  ;;  %v3978_v21 = vpack.c.bf16 %v1179_v20, %v1171_v19  ;;  %v4781_v33 = vsub.s32 6, %v446_v23  ;;  %v452_v41 = vrot.slane %v4790_v38, %v451_v39  ;;  %v814_v53 = vrot.slane %v805_v25, %v451_v39  ;;  %v4816_v2 = vld [vmem:[%s5469_s3] sm:$0xff]  ;;  %s4236_s28 = scalar_lea.vmem %s4235_s26, 512  ;;  %p4237_p1 = scmp.lt.s32.totalorder %s5417_s20, %s4235_s26 }
  0x32   : > { %3949 = vmatprep.subr.bf16.mxu0 %v3948_v37  ;;  %v838_v36 = vrot.slane %v805_v25, %v4783_v34  ;;  %v447_v37 = vsub.s32 0, %v446_v23  ;;  %v1190_v11 = vrot.slane %v4816_v2, %v451_v39  ;;  %v456_v12 = vrot.slane %v4790_v38, %v4774_v28  ;;  %p4238_p2 = scmp.lt.s32.totalorder %s4236_s28, %s4230_s16 }
  0x33   : > { %3947 = vmatpush1.bf16.msra.mxu1 %v3946_v44  ;;  %v834_v35 = vrot.slane %v805_v25, %v4781_v33 }
  0x34   : > { %3570 = vmatmul.mubr.msk.f32.vlgmr.msra.gmra.mrb[6].mxu0 %vm485_vm0, %v4500_v31  ;;  %3957 = vmatprep.subr.bf16.mxu1 %v3956_v51  ;;  %v448_v40 = vrot.slane %v4790_v38, %v447_v37  ;;  %v810_v52 = vrot.slane %v805_v25, %v447_v37  ;;  %p4239_p3 = por %p4238_p2, %p4237_p1 }
  0x35   : > { %3951 = vmatpush1.bf16.msra.mxu0 %v3950_v45  ;;  %1294 = vmatprep.mubr.f32.mxu0 %v4310_v7 }
  0x36   : > { %3953 = vmatprep.subr.bf16.mxu0 %v3952_v49  ;;  %3571 = vmatmul.mubr.msk.f32.vlgmr.msra.gmra.mrb[6].mxu1 %vm485_vm0, %v4500_v31  ;;  %v3966_v31 = vpack.c.bf16 %v1161_v63, %v1153_v62  ;;  %p4240_p5 = pnand %p4239_p3, %p4233_p0 }
  0x37   : > { %3959 = vmatpush1.bf16.msra.mxu1 %v3958_v56  ;;  %1371 = vmatprep.mubr.f32.mxu1 %v4310_v7 }
  0x38   : > { %3961 = vmatprep.subr.bf16.mxu1 %v3960_v58 }
  0x39   : > { %3955 = vmatpush1.bf16.msra.mxu0 %v3954_v57 }
  0x3a   : > { %3965 = vmatprep.subr.bf16.mxu0 %v3964_v61 }
  0x3b   : > { %3963 = vmatpush1.bf16.msra.mxu1 %v3962_v4 }
  0x3c   : > { %3572 = vmatmul.mubr.msk.f32.vlgmr.msra.gmra.mrb[8].mxu0 %vm485_vm0, %v1147_v5  ;;  %3973 = vmatprep.subr.bf16.mxu1 %v3972_v10 }
  0x3d   : > { %1300 = vmatprep.mubr.f32.mxu0 %v4310_v7  ;;  %3967 = vmatpush1.bf16.msra.mxu0 %v3966_v31  ;;  %v1186_v31 = vrot.slane %v4816_v2, %v447_v37  ;;  %v1202_v37 = vrot.slane %v4816_v2, %v4766_v24 }
  0x3e   : > { %3969 = vmatprep.subr.bf16.mxu0 %v3968_v6  ;;  %3574 = vmatmul.mubr.msk.f32.vlgmr.msra.gmra.mrb[8].mxu1 %vm485_vm0, %v1147_v5 }
  0x3f   : > { %1377 = vmatprep.mubr.f32.mxu1 %v4310_v7  ;;  %3975 = vmatpush1.bf16.msra.mxu1 %v3974_v17 }
  0x40   : > { %3573 = vmatmul.mubr.msk.f32.gmra.mrb[10].mxu0 %vm485_vm0, %v1148_v15  ;;  %3977 = vmatprep.subr.bf16.mxu1 %v3976_v18 }
  0x41   : > { %3971 = vmatpush1.bf16.msra.mxu0 %v3970_v16  ;;  %1448 = vmatprep.mubr.f32.mxu0 %v4310_v7 }
  0x42   : > { %3575 = vmatmul.mubr.msk.f32.gmra.mrb[10].mxu1 %vm485_vm0, %v1148_v15 }
  0x43   : > { %1525 = vmatprep.mubr.f32.mxu1 %v4310_v7  ;;  %3979 = vmatpush1.bf16.msra.mxu1 %v3978_v21  ;;  %v460_v21 = vrot.slane %v4790_v38, %v4776_v29 }
  0x44   : > { %3576 = vmatmul.mubr.msk.f32.vlgmr.msra.gmra.mrb[12].mxu0 %vm485_vm0, %v1147_v5 }
  0x45   : > { %1454 = vmatprep.mubr.f32.mxu0 %v4310_v7 }
  0x46   : > { %3578 = vmatmul.mubr.msk.f32.vlgmr.msra.gmra.mrb[12].mxu1 %vm485_vm0, %v1147_v5 }
  0x47   : > { %1531 = vmatprep.mubr.f32.mxu1 %v4310_v7  ;;  %v830_v7 = vrot.slane %v805_v25, %v4772_v27 }
  0x48   : > { %3577 = vmatmul.mubr.msk.f32.gmra.mrb[14].mxu0 %vm485_vm0, %v1148_v15 }
  0x4a   : > { %3579 = vmatmul.mubr.msk.f32.gmra.mrb[14].mxu1 %vm485_vm0, %v1148_v15  ;;  %v1194_v15 = vrot.slane %v4816_v2, %v4774_v28  ;;  %v1198_v28 = vrot.slane %v4816_v2, %v4776_v29  ;;  %v468_v29 = vrot.slane %v4790_v38, %v4772_v27 }
  0xef   : > { %v555_v42 = vpop.f32.mrb[0].mxu0  ;;  %v626_v46 = vpop.f32.mrb[0].mxu1 }
  0xf0   : > { %v556_v43 = vadd.f32 %v555_v42, %v448_v40  ;;  %v557_v44 = vpop.f32.mrb[1].mxu0  ;;  %v628_v47 = vpop.f32.mrb[1].mxu1  ;;  %v627_v20 = vadd.f32 %v626_v46, %v456_v12 }
  0xf1   : > { %v558_v45 = vadd.f32 %v557_v44, %v452_v41 }
  0xf2   : > { %3804 = vmatprep.subr.mxu0 %v556_v43 }
  0xf3   : > { %3805 = vmatpush3.xpose.msra.mxu0 %v556_v43 }
  0xf4   : > { %3814 = vmatprep.subr.mxu0 %v558_v45 }
  0xf7   : > { %v4794_v48 = vpop.f32.mrb[2].mxu0 }
  0xf8   : > { %v4796_v49 = vpop.f32.mrb[3].mxu0 }
  0xf9   : > { %v4798_v50 = vpop.f32.mrb[2].mxu1 }
  0xfa   : > { %v4800_v51 = vpop.f32.mrb[3].mxu1 }
  0xff   : > { %v913_v54 = vpop.f32.mrb[4].mxu0 }
 0x100   : > { %v914_v55 = vadd.f32 %v913_v54, %v810_v52  ;;  %v915_v56 = vpop.f32.mrb[5].mxu0  ;;  %v472_v54 = vrot.slane %v4790_v38, %v4781_v33 }
 0x101   : > { %v4802_v57 = vadd.f32 %v915_v56, %v814_v53  ;;  %v984_v58 = vpop.f32.mrb[4].mxu1  ;;  %v700_v53 = vadd.f32 %v4796_v49, %v468_v29  ;;  %v1210_v56 = vrot.slane %v4816_v2, %v4781_v33 }
 0x102   : > { %3809 = vmatprep.subr.mxu1 %v914_v55  ;;  %v4804_v59 = vadd.f32 %v984_v58, %v818_v30  ;;  %v986_v60 = vpop.f32.mrb[5].mxu1  ;;  %v769_v58 = vadd.f32 %v4798_v50, %v472_v54 }
 0x103   : > { %3810 = vmatpush3.msra.mxu1 %v914_v55  ;;  %v4807_v61 = vadd.f32 %v986_v60, %v822_v32  ;;  %v464_v32 = vrot.slane %v4790_v38, %v4766_v24 }
 0x104   : > { %3819 = vmatprep.subr.mxu1 %v4802_v57 }
 0x105   : > { %v698_v44 = vadd.f32 %v4794_v48, %v464_v32 }
 0x107   : > { %v1055_v62 = vpop.f32.mrb[6].mxu0 }
 0x108   : > { %v4809_v63 = vadd.f32 %v1055_v62, %v826_v26  ;;  %v1057_v0 = vpop.f32.mrb[7].mxu0  ;;  %v1214_v62 = vrot.slane %v4816_v2, %v4783_v34 }
 0x109   : > { %v4811_v1 = vadd.f32 %v1057_v0, %v830_v7  ;;  %v1126_v3 = vpop.f32.mrb[6].mxu1 }
 0x10a   : > { %v4818_v4 = vadd.f32 %v1126_v3, %v834_v35  ;;  %v1128_v5 = vpop.f32.mrb[7].mxu1  ;;  %v629_v35 = vadd.f32 %v628_v47, %v460_v21  ;;  %v1206_v47 = vrot.slane %v4816_v2, %v4772_v27  ;;  %v476_v27 = vrot.slane %v4790_v38, %v4783_v34 }
 0x10b   : > { %v4821_v6 = vadd.f32 %v1128_v5, %v838_v36 }
 0x10c   : > { %v771_v0 = vadd.f32 %v4800_v51, %v476_v27 }
 0x10f   : > { %v1296_v8 = vpop.f32.mrb[8].mxu0 }
 0x110   : > { %v1297_v9 = vadd.f32 %v1296_v8, %v1186_v31  ;;  %v1298_v10 = vpop.f32.mrb[9].mxu0 }
 0x111   : > { %v1373_v13 = vpop.f32.mrb[8].mxu1  ;;  %v1299_v19 = vadd.f32 %v1298_v10, %v1190_v11 }
 0x112   : > { %3806 = vmatprep.mubr.f32.mxu0 %v1297_v9  ;;  %v1375_v16 = vpop.f32.mrb[9].mxu1  ;;  %v1374_v23 = vadd.f32 %v1373_v13, %v1194_v15 }
 0x113   : > { %v1302_v14 = vpop.f32.mrb[10].mxu0  ;;  %v1376_v42 = vadd.f32 %v1375_v16, %v1198_v28 }
 0x114   : > { %v1303_v17 = vadd.f32 %v1302_v14, %v1186_v31  ;;  %v1304_v18 = vpop.f32.mrb[11].mxu0 }
 0x115   : > { %v1379_v22 = vpop.f32.mrb[10].mxu1  ;;  %v1305_v7 = vadd.f32 %v1304_v18, %v1190_v11 }
 0x116   : > { %3807 = vmatmul.mubr.f32.vlgmr.msra.gmra.mrb[16].mxu0 %v1303_v17  ;;  %v1381_v25 = vpop.f32.mrb[11].mxu1  ;;  %v1380_v36 = vadd.f32 %v1379_v22, %v1194_v15 }
 0x117   : > { %3815 = vmatpush3.xpose.msra.mxu0 %v558_v45  ;;  %3816 = vmatprep.mubr.f32.mxu0 %v1299_v19  ;;  %v1450_v26 = vpop.f32.mrb[12].mxu0  ;;  %v1382_v45 = vadd.f32 %v1381_v25, %v1198_v28 }
 0x118   : > { %3824 = vmatprep.subr.mxu0 %v627_v20  ;;  %v1452_v30 = vpop.f32.mrb[13].mxu0  ;;  %v1451_v46 = vadd.f32 %v1450_v26, %v1202_v37 }
 0x119   : > { %v1527_v41 = vpop.f32.mrb[12].mxu1  ;;  %v1453_v55 = vadd.f32 %v1452_v30, %v1206_v47 }
 0x11a   : > { %3817 = vmatmul.mubr.f32.vlgmr.msra.gmra.mrb[18].mxu0 %v1305_v7  ;;  %v1529_v43 = vpop.f32.mrb[13].mxu1  ;;  %v1528_v49 = vadd.f32 %v1527_v41, %v1210_v56 }
 0x11b   : > { %3825 = vmatpush3.xpose.msra.mxu0 %v627_v20  ;;  %3826 = vmatprep.mubr.f32.mxu0 %v1374_v23  ;;  %v1456_v39 = vpop.f32.mrb[14].mxu0  ;;  %v1530_v33 = vadd.f32 %v1529_v43, %v1214_v62 }
 0x11c   : > { %3834 = vmatprep.subr.mxu0 %v629_v35  ;;  %v1458_v40 = vpop.f32.mrb[15].mxu0  ;;  %v1457_v48 = vadd.f32 %v1456_v39, %v1202_v37 }
 0x11d   : > { %v1533_v24 = vpop.f32.mrb[14].mxu1  ;;  %v1459_v60 = vadd.f32 %v1458_v40, %v1206_v47 }
 0x11e   : > { %3827 = vmatmul.mubr.f32.vlgmr.msra.gmra.mrb[20].mxu0 %v1380_v36  ;;  %v1535_v52 = vpop.f32.mrb[15].mxu1  ;;  %v1534_v3 = vadd.f32 %v1533_v24, %v1210_v56 }
 0x11f   : > { %3835 = vmatpush3.xpose.msra.mxu0 %v629_v35  ;;  %3836 = vmatprep.mubr.f32.mxu0 %v1376_v42  ;;  %v1536_v50 = vadd.f32 %v1535_v52, %v1214_v62 }
 0x120   : > { %3844 = vmatprep.subr.mxu0 %v698_v44 }
 0x122   : > { %3837 = vmatmul.mubr.f32.vlgmr.msra.gmra.mrb[22].mxu0 %v1382_v45 }
 0x123   : > { %3845 = vmatpush3.xpose.msra.mxu0 %v698_v44  ;;  %3846 = vmatprep.mubr.f32.mxu0 %v1451_v46 }
 0x124   : > { %3854 = vmatprep.subr.mxu0 %v700_v53 }
 0x126   : > { %3847 = vmatmul.mubr.f32.vlgmr.msra.gmra.mrb[24].mxu0 %v1457_v48 }
 0x127   : > { %3855 = vmatpush3.xpose.msra.mxu0 %v700_v53  ;;  %3856 = vmatprep.mubr.f32.mxu0 %v1453_v55 }
 0x128   : > { %3864 = vmatprep.subr.mxu0 %v769_v58 }
 0x12a   : > { %3857 = vmatmul.mubr.f32.vlgmr.msra.gmra.mrb[26].mxu0 %v1459_v60 }
 0x12b   : > { %3865 = vmatpush3.xpose.msra.mxu0 %v769_v58  ;;  %3866 = vmatprep.mubr.f32.mxu0 %v1528_v49 }
 0x12c   : > { %3874 = vmatprep.subr.mxu0 %v771_v0 }
 0x12e   : > { %3867 = vmatmul.mubr.f32.vlgmr.msra.gmra.mrb[28].mxu0 %v1534_v3 }
 0x12f   : > { %3875 = vmatpush3.xpose.msra.mxu0 %v771_v0  ;;  %3876 = vmatprep.mubr.f32.mxu0 %v1530_v33 }
 0x132   : > { %3877 = vmatmul.mubr.f32.vlgmr.msra.gmra.mrb[30].mxu0 %v1536_v50 }
 0x1e9   : > { %v3808_v38 = vpop.f32.mrb[16].mxu0 }
 0x1ea   : > { %v1605_v5 = vpop.f32.mrb[17].mxu0  ;;  %v1618_v8 = vsel %vm1614_vm1, %v3808_v38, -inf }
 0x1eb   : > { %v1615_v31 = vsel %vm1614_vm1, %v1605_v5, -inf }
 0x1ec   : > { %1616 = vmax.xlane.f32.xlu0 %v1615_v31 }
 0x1ed   : > { %v3818_v34 = vpop.f32.mrb[18].mxu0 }
 0x1ee   : > { %v1788_v2 = vpop.f32.mrb[19].mxu0  ;;  %v1800_v11 = vsel %vm1614_vm1, %v3818_v34, -inf }
 0x1ef   : > { %v1797_v51 = vsel %vm1614_vm1, %v1788_v2, -inf }
 0x1f0   : > { %1798 = vmax.xlane.f32.xlu1 %v1797_v51  ;;  %1619 = vmax.xlane.f32.xlu0 %v1618_v8 }
 0x1f1   : > { %v4855_v9 = vpop.f32.mrb[20].mxu0 }
 0x1f2   : > { %v1970_v10 = vpop.f32.mrb[21].mxu0  ;;  %v1982_v15 = vsel %vm1614_vm1, %v4855_v9, -inf }
 0x1f3   : > { %v1979_v12 = vsel %vm1614_vm1, %v1970_v10, -inf }
 0x1f4   : > { %1801 = vmax.xlane.f32.xlu1 %v1800_v11  ;;  %1980 = vmax.xlane.f32.xlu0 %v1979_v12 }
 0x1f5   : > { %v4859_v13 = vpop.f32.mrb[22].mxu0 }
 0x1f6   : > { %v2152_v14 = vpop.f32.mrb[23].mxu0  ;;  %v2164_v19 = vsel %vm1614_vm1, %v4859_v13, -inf }
 0x1f7   : > { %v2161_v16 = vsel %vm1614_vm1, %v2152_v14, -inf }
 0x1f8   : > { %1983 = vmax.xlane.f32.xlu1 %v1982_v15  ;;  %2162 = vmax.xlane.f32.xlu0 %v2161_v16 }
 0x1f9   : > { %v4864_v17 = vpop.f32.mrb[24].mxu0 }
 0x1fa   : > { %v2334_v18 = vpop.f32.mrb[25].mxu0  ;;  %v2346_v22 = vsel %vm1614_vm1, %v4864_v17, -inf }
 0x1fb   : > { %v2343_v20 = vsel %vm1614_vm1, %v2334_v18, -inf }
 0x1fc   : > { %2165 = vmax.xlane.f32.xlu1 %v2164_v19  ;;  %2344 = vmax.xlane.f32.xlu0 %v2343_v20 }
 0x1fd   : > { %v4869_v21 = vpop.f32.mrb[26].mxu0 }
 0x1fe   : > { %v4873_v23 = vpop.f32.mrb[27].mxu0  ;;  %v2528_v7 = vsel %vm1614_vm1, %v4869_v21, -inf }
 0x1ff   : > { %v2525_v25 = vsel %vm1614_vm1, %v4873_v23, -inf }
 0x200   : > { %2347 = vmax.xlane.f32.xlu1 %v2346_v22  ;;  %2526 = vmax.xlane.f32.xlu0 %v2525_v25 }
 0x201   : > { %v4877_v26 = vpop.f32.mrb[28].mxu0 }
 0x202   : > { %v4881_v30 = vpop.f32.mrb[29].mxu0  ;;  %v2710_v35 = vsel %vm1614_vm1, %v4877_v26, -inf }
 0x203   : > { %v2707_v28 = vsel %vm1614_vm1, %v4881_v30, -inf }
 0x204   : > { %2529 = vmax.xlane.f32.xlu1 %v2528_v7  ;;  %2708 = vmax.xlane.f32.xlu0 %v2707_v28 }
 0x205   : > { %v4885_v32 = vpop.f32.mrb[30].mxu0 }
 0x206   : > { %v4889_v36 = vpop.f32.mrb[31].mxu0  ;;  %v2892_v39 = vsel %vm1614_vm1, %v4885_v32, -inf }
 0x207   : > { %v2889_v37 = vsel %vm1614_vm1, %v4889_v36, -inf }
 0x208   : > { %2711 = vmax.xlane.f32.xlu1 %v2710_v35  ;;  %2890 = vmax.xlane.f32.xlu0 %v2889_v37 }
 0x20c   : > { %2893 = vmax.xlane.f32.xlu1 %v2892_v39 }
 0x279   : > { %v1617_v40 = vpop.xlane.xlu0 %1616 }
 0x27a   : > { %v1621_v41 = vsub.f32 %v1605_v5, %v1617_v40 }
 0x27c   : > { %v1623_v42 = vmul.f32 1.442695, %v1621_v41 }
 0x27d   : > { %v1799_v43 = vpop.xlane.xlu1 %1798  ;;  %v1620_v44 = vpop.xlane.xlu0 %1619 }
 0x27e   : > { %4166 = vpow2.f32 %v1623_v42  ;;  %v1803_v29 = vsub.f32 %v1788_v2, %v1799_v43  ;;  %v1622_v45 = vsub.f32 %v3808_v38, %v1620_v44 }
 0x280   : > { %v1805_v46 = vmul.f32 1.442695, %v1803_v29  ;;  %v1625_v47 = vmul.f32 1.442695, %v1622_v45 }
 0x281   : > { %v1802_v24 = vpop.xlane.xlu1 %1801  ;;  %v1981_v52 = vpop.xlane.xlu0 %1980 }
 0x282   : > { %4168 = vpow2.f32 %v1805_v46  ;;  %v1804_v53 = vsub.f32 %v3818_v34, %v1802_v24  ;;  %v1985_v54 = vsub.f32 %v1970_v10, %v1981_v52 }
 0x283   : > { %4170 = vpow2.f32 %v1625_v47 }
 0x284   : > { %v1807_v48 = vmul.f32 1.442695, %v1804_v53  ;;  %v1987_v55 = vmul.f32 1.442695, %v1985_v54 }
 0x285   : > { %v1984_v56 = vpop.xlane.xlu1 %1983  ;;  %v2163_v58 = vpop.xlane.xlu0 %2162 }
 0x286   : > { %4172 = vpow2.f32 %v1807_v48  ;;  %v1986_v27 = vsub.f32 %v4855_v9, %v1984_v56  ;;  %v2167_v60 = vsub.f32 %v2152_v14, %v2163_v58 }
 0x287   : > { %4174 = vpow2.f32 %v1987_v55 }
 0x288   : > { %v4896_v49 = vpop.eup %4166  ;;  %v1989_v62 = vmul.f32 1.442695, %v1986_v27  ;;  %v2169_v0 = vmul.f32 1.442695, %v2167_v60 }
 0x289   : > { %v2166_v3 = vpop.xlane.xlu1 %2165  ;;  %v2345_v33 = vpop.xlane.xlu0 %2344  ;;  %v1627_v50 = vsel %vm1614_vm1, %v4896_v49, 0.0 }
 0x28a   : > { %4176 = vpow2.f32 %v1989_v62  ;;  %v2168_v38 = vsub.f32 %v4859_v13, %v2166_v3  ;;  %v2349_v5 = vsub.f32 %v2334_v18, %v2345_v33  ;;  %1628 = vadd.xlane.f32.xlu0 %v1627_v50  ;;  %v3027_v50 = vld [vmem:[%s5474_s8 + $0x80] sm:$0xff] }
 0x28b   : > { %4178 = vpow2.f32 %v2169_v0 }
 0x28c   : > { %v4901_v31 = vpop.eup %4168  ;;  %v2171_v34 = vmul.f32 1.442695, %v2168_v38  ;;  %v2351_v2 = vmul.f32 1.442695, %v2349_v5  ;;  %v3028_v38 = vld [vmem:[%s5474_s8 + $0x88] sm:$0xff]  ;;  %v3011_v5 = vld [vmem:[%s5474_s8] sm:$0xff] }
 0x28d   : > { %v4903_v51 = vpop.eup %4170  ;;  %v2348_v8 = vpop.xlane.xlu1 %2347  ;;  %v1809_v10 = vsel %vm1614_vm1, %v4901_v31, 0.0 }
 0x28e   : > { %v2527_v9 = vpop.xlane.xlu0 %2526  ;;  %4180 = vpow2.f32 %v2171_v34  ;;  %v2350_v11 = vsub.f32 %v4864_v17, %v2348_v8  ;;  %1810 = vadd.xlane.f32.xlu0 %v1809_v10  ;;  %v1630_v13 = vsel %vm1614_vm1, %v4903_v51, 0.0  ;;  %v3980_v34 = vpack.c.bf16 %v3028_v38, %v3027_v50  ;;  %v3029_v8 = vld [vmem:[%s5474_s8 + $0x90] sm:$0xff] }
 0x28f   : > { %v2531_v12 = vsub.f32 %v4873_v23, %v2527_v9  ;;  %4182 = vpow2.f32 %v2351_v2  ;;  %1631 = vadd.xlane.f32.xlu1 %v1630_v13  ;;  %v3012_v2 = vld [vmem:[%s5474_s8 + $0x8] sm:$0xff]  ;;  %v3030_v9 = vld [vmem:[%s5474_s8 + $0x98] sm:$0xff] }
 0x290   : > { %v4911_v14 = vpop.eup %4172  ;;  %v2353_v15 = vmul.f32 1.442695, %v2350_v11  ;;  %v3982_v10 = vpack.c.bf16 %v3012_v2, %v3011_v5  ;;  %v3984_v11 = vpack.c.bf16 %v3030_v9, %v3029_v8  ;;  %v3014_v13 = vld [vmem:[%s5474_s8 + $0x18] sm:$0xff]  ;;  %3981 = vmatprep.subr.bf16.mxu0 %v3980_v34 }
 0x291   : > { %v2533_v16 = vmul.f32 1.442695, %v2531_v12  ;;  %v4913_v18 = vpop.eup %4174  ;;  %v2530_v19 = vpop.xlane.xlu1 %2529  ;;  %v1812_v22 = vsel %vm1614_vm1, %v4911_v14, 0.0  ;;  %v3013_v12 = vld [vmem:[%s5474_s8 + $0x10] sm:$0xff] }
 0x292   : > { %v2709_v20 = vpop.xlane.xlu0 %2708  ;;  %4184 = vpow2.f32 %v2353_v15  ;;  %v2532_v17 = vsub.f32 %v4869_v21, %v2530_v19  ;;  %v1991_v25 = vsel %vm1614_vm1, %v4913_v18, 0.0  ;;  %v3031_v15 = vld [vmem:[%s5474_s8 + $0xa0] sm:$0xff]  ;;  %3983 = vmatpush3.bf16.msra.mxu0 %v3982_v10  ;;  %v3986_v19 = vpack.c.bf16 %v3014_v13, %v3013_v12 }
 0x293   : > { %v2713_v23 = vsub.f32 %v4881_v30, %v2709_v20  ;;  %4186 = vpow2.f32 %v2533_v16  ;;  %1813 = vadd.xlane.f32.xlu1 %v1812_v22  ;;  %1992 = vadd.xlane.f32.xlu0 %v1991_v25  ;;  %v3032_v16 = vld [vmem:[%s5474_s8 + $0xa8] sm:$0xff]  ;;  %v3015_v22 = vld [vmem:[%s5474_s8 + $0x20] sm:$0xff]  ;;  %v3034_v25 = vld [vmem:[%s5474_s8 + $0xb8] sm:$0xff] }
 0x294   : > { %v4921_v7 = vpop.eup %4176  ;;  %v2535_v28 = vmul.f32 1.442695, %v2532_v17  ;;  %3985 = vmatprep.subr.bf16.mxu0 %v3984_v11  ;;  %v3988_v20 = vpack.c.bf16 %v3032_v16, %v3031_v15  ;;  %v3016_v17 = vld [vmem:[%s5474_s8 + $0x28] sm:$0xff] }
 0x295   : > { %v2715_v35 = vmul.f32 1.442695, %v2713_v23  ;;  %v4923_v37 = vpop.eup %4178  ;;  %v2712_v39 = vpop.xlane.xlu1 %2711  ;;  %v1994_v41 = vsel %vm1614_vm1, %v4921_v7, 0.0  ;;  %v3033_v23 = vld [vmem:[%s5474_s8 + $0xb0] sm:$0xff] }
 0x296   : > { %v2891_v40 = vpop.xlane.xlu0 %2890  ;;  %4188 = vpow2.f32 %v2535_v28  ;;  %v2714_v21 = vsub.f32 %v4877_v26, %v2712_v39  ;;  %v2173_v42 = vsel %vm1614_vm1, %v4923_v37, 0.0  ;;  %3987 = vmatpush3.bf16.msra.mxu0 %v3986_v19  ;;  %v3990_v28 = vpack.c.bf16 %v3016_v17, %v3015_v22  ;;  %v3017_v39 = vld [vmem:[%s5474_s8 + $0x30] sm:$0xff] }
 0x297   : > { %v2895_v30 = vsub.f32 %v4889_v36, %v2891_v40  ;;  %4190 = vpow2.f32 %v2715_v35  ;;  %1995 = vadd.xlane.f32.xlu1 %v1994_v41  ;;  %2174 = vadd.xlane.f32.xlu0 %v2173_v42  ;;  %v3992_v35 = vpack.c.bf16 %v3034_v25, %v3033_v23  ;;  %v3018_v40 = vld [vmem:[%s5474_s8 + $0x38] sm:$0xff]  ;;  %v3035_v41 = vld [vmem:[%s5474_s8 + $0xc0] sm:$0xff] }
 0x298   : > { %v4931_v43 = vpop.eup %4180  ;;  %v2717_v44 = vmul.f32 1.442695, %v2714_v21  ;;  %3989 = vmatprep.subr.bf16.mxu0 %v3988_v20  ;;  %v3036_v21 = vld [vmem:[%s5474_s8 + $0xc8] sm:$0xff] }
 0x299   : > { %v2897_v29 = vmul.f32 1.442695, %v2895_v30  ;;  %v4933_v45 = vpop.eup %4182  ;;  %v2894_v46 = vpop.xlane.xlu1 %2893  ;;  %v2176_v47 = vsel %vm1614_vm1, %v4931_v43, 0.0  ;;  %v3994_v30 = vpack.c.bf16 %v3018_v40, %v3017_v39  ;;  %v3996_v42 = vpack.c.bf16 %v3036_v21, %v3035_v41 }
 0x29a   : > { %4192 = vpow2.f32 %v2717_v44  ;;  %v2896_v26 = vsub.f32 %v4885_v32, %v2894_v46  ;;  %v2355_v36 = vsel %vm1614_vm1, %v4933_v45, 0.0  ;;  %3991 = vmatpush3.bf16.msra.mxu0 %v3990_v28  ;;  %v3019_v44 = vld [vmem:[%s5474_s8 + $0x40] sm:$0xff]  ;;  %v3037_v46 = vld [vmem:[%s5474_s8 + $0xd0] sm:$0xff] }
 0x29b   : > { %4194 = vpow2.f32 %v2897_v29  ;;  %2177 = vadd.xlane.f32.xlu1 %v2176_v47  ;;  %2356 = vadd.xlane.f32.xlu0 %v2355_v36  ;;  %v3020_v29 = vld [vmem:[%s5474_s8 + $0x48] sm:$0xff]  ;;  %v3038_v47 = vld [vmem:[%s5474_s8 + $0xd8] sm:$0xff] }
 0x29c   : > { %v4940_v24 = vpop.eup %4184  ;;  %v2899_v52 = vmul.f32 1.442695, %v2896_v26  ;;  %3993 = vmatprep.subr.bf16.mxu0 %v3992_v35  ;;  %v3998_v26 = vpack.c.bf16 %v3020_v29, %v3019_v44  ;;  %v4000_v36 = vpack.c.bf16 %v3038_v47, %v3037_v46  ;;  %v3059_v46 = vld [vmem:[%s5474_s8 + $0x180] sm:$0xff] }
 0x29d   : > { %v4942_v53 = vpop.eup %4186  ;;  %v2358_v54 = vsel %vm1614_vm1, %v4940_v24, 0.0 }
 0x29e   : > { %4196 = vpow2.f32 %v2899_v52  ;;  %v2537_v48 = vsel %vm1614_vm1, %v4942_v53, 0.0  ;;  %3995 = vmatpush3.bf16.msra.mxu0 %v3994_v30  ;;  %v3021_v52 = vld [vmem:[%s5474_s8 + $0x50] sm:$0xff] }
 0x29f   : > { %2359 = vadd.xlane.f32.xlu1 %v2358_v54  ;;  %2538 = vadd.xlane.f32.xlu0 %v2537_v48  ;;  %v3022_v54 = vld [vmem:[%s5474_s8 + $0x58] sm:$0xff]  ;;  %v3039_v48 = vld [vmem:[%s5474_s8 + $0xe0] sm:$0xff] }
 0x2a0   : > { %v4948_v32 = vpop.eup %4188  ;;  %3997 = vmatprep.subr.bf16.mxu0 %v3996_v42 }
 0x2a1   : > { %v4950_v55 = vpop.eup %4190  ;;  %v2540_v56 = vsel %vm1614_vm1, %v4948_v32, 0.0 }
 0x2a2   : > { %v2719_v58 = vsel %vm1614_vm1, %v4950_v55, 0.0  ;;  %3999 = vmatpush3.bf16.msra.mxu0 %v3998_v26  ;;  %v3043_v26 = vld [vmem:[%s5474_s8 + $0x100] sm:$0xff] }
 0x2a3   : > { %2541 = vadd.xlane.f32.xlu1 %v2540_v56  ;;  %2720 = vadd.xlane.f32.xlu0 %v2719_v58  ;;  %v3040_v56 = vld [vmem:[%s5474_s8 + $0xe8] sm:$0xff]  ;;  %v4002_v58 = vpack.c.bf16 %v3022_v54, %v3021_v52 }
 0x2a4   : > { %v4956_v27 = vpop.eup %4192  ;;  %4001 = vmatprep.subr.bf16.mxu0 %v4000_v36  ;;  %v3044_v36 = vld [vmem:[%s5474_s8 + $0x108] sm:$0xff] }
 0x2a5   : > { %v4958_v60 = vpop.eup %4194  ;;  %v2722_v62 = vsel %vm1614_vm1, %v4956_v27, 0.0 }
 0x2a6   : > { %v2901_v0 = vsel %vm1614_vm1, %v4958_v60, 0.0  ;;  %4003 = vmatpush3.bf16.msra.mxu0 %v4002_v58  ;;  %v3045_v58 = vld [vmem:[%s5474_s8 + $0x110] sm:$0xff] }
 0x2a7   : > { %2723 = vadd.xlane.f32.xlu1 %v2722_v62  ;;  %2902 = vadd.xlane.f32.xlu0 %v2901_v0  ;;  %v4004_v62 = vpack.c.bf16 %v3040_v56, %v3039_v48  ;;  %v3023_v0 = vld [vmem:[%s5474_s8 + $0x60] sm:$0xff]  ;;  %v4014_v48 = vpack.c.bf16 %v3044_v36, %v3043_v26  ;;  %v3093_v26 = vld [vmem:[%s5474_s8 + $0x290] sm:$0xff]  ;;  %v3094_v36 = vld [vmem:[%s5474_s8 + $0x298] sm:$0xff] }
 0x2a8   : > { %v4964_v3 = vpop.eup %4196 }
 0x2a9   : > { %v2904_v33 = vsel %vm1614_vm1, %v4964_v3, 0.0  ;;  %4005 = vmatprep.subr.bf16.mxu0 %v4004_v62  ;;  %v3046_v62 = vld [vmem:[%s5474_s8 + $0x118] sm:$0xff] }
 0x2ab   : > { %2905 = vadd.xlane.f32.xlu1 %v2904_v33  ;;  %v3024_v33 = vld [vmem:[%s5474_s8 + $0x68] sm:$0xff] }
 0x2ac   : > { %v4006_v50 = vpack.c.bf16 %v3024_v33, %v3023_v0  ;;  %v3063_v0 = vld [vmem:[%s5474_s8 + $0x1a0] sm:$0xff] }
 0x2ae   : > { %4007 = vmatpush3.bf16.msra.mxu0 %v4006_v50  ;;  %v3047_v50 = vld [vmem:[%s5474_s8 + $0x120] sm:$0xff] }
 0x317   : > { %v1629_v38 = vpop.xlane.xlu0 %1628 }
 0x318   : > { %4198 = vrcp.f32 %v1629_v38  ;;  %v3048_v38 = vld [vmem:[%s5474_s8 + $0x128] sm:$0xff] }
 0x31b   : > { %v1811_v5 = vpop.xlane.xlu0 %1810 }
 0x31c   : > { %v1632_v34 = vpop.xlane.xlu1 %1631  ;;  %4200 = vrcp.f32 %v1811_v5  ;;  %v3065_v5 = vld [vmem:[%s5474_s8 + $0x1b0] sm:$0xff] }
 0x31d   : > { %4202 = vrcp.f32 %v1632_v34  ;;  %v3066_v34 = vld [vmem:[%s5474_s8 + $0x1b8] sm:$0xff] }
 0x320   : > { %v1814_v2 = vpop.xlane.xlu1 %1813  ;;  %v1993_v8 = vpop.xlane.xlu0 %1992 }
 0x321   : > { %4204 = vrcp.f32 %v1814_v2  ;;  %v4022_v2 = vpack.c.bf16 %v3048_v38, %v3047_v50  ;;  %v3080_v50 = vld [vmem:[%s5474_s8 + $0x228] sm:$0xff]  ;;  %v3107_v38 = vld [vmem:[%s5474_s8 + $0x300] sm:$0xff] }
 0x322   : > { %v4199_v9 = vpop.eup %4198  ;;  %4206 = vrcp.f32 %v1993_v8  ;;  %v4024_v8 = vpack.c.bf16 %v3066_v34, %v3065_v5  ;;  %v3108_v5 = vld [vmem:[%s5474_s8 + $0x308] sm:$0xff]  ;;  %v3097_v34 = vld [vmem:[%s5474_s8 + $0x2b0] sm:$0xff] }
 0x323   : > { %v1635_v10 = vmul.f32 %v4199_v9, %v4896_v49  ;;  %v3049_v9 = vld [vmem:[%s5474_s8 + $0x130] sm:$0xff] }
 0x324   : > { %v1996_v11 = vpop.xlane.xlu1 %1995  ;;  %v2175_v12 = vpop.xlane.xlu0 %2174 }
 0x325   : > { %4208 = vrcp.f32 %v1996_v11  ;;  %3811 = vmatprep.mubr.msk.f32.mxu1 %vm1614_vm1, %v1635_v10  ;;  %v3050_v10 = vld [vmem:[%s5474_s8 + $0x138] sm:$0xff]  ;;  %v3067_v11 = vld [vmem:[%s5474_s8 + $0x1c0] sm:$0xff] }
 0x326   : > { %v4201_v13 = vpop.eup %4200  ;;  %4210 = vrcp.f32 %v2175_v12  ;;  %v3068_v12 = vld [vmem:[%s5474_s8 + $0x1c8] sm:$0xff] }
 0x327   : > { %v4203_v15 = vpop.eup %4202  ;;  %v1817_v16 = vmul.f32 %v4201_v13, %v4901_v31  ;;  %v4026_v13 = vpack.c.bf16 %v3050_v10, %v3049_v9  ;;  %v3126_v9 = vld [vmem:[%s5474_s8 + $0x398] sm:$0xff] }
 0x328   : > { %v1636_v19 = vmul.f32 %v4203_v15, %v4903_v51  ;;  %v2178_v20 = vpop.xlane.xlu1 %2177  ;;  %v2357_v22 = vpop.xlane.xlu0 %2356  ;;  %v4028_v15 = vpack.c.bf16 %v3068_v12, %v3067_v11  ;;  %v4078_v12 = vpack.c.bf16 %v3108_v5, %v3107_v38  ;;  %v3089_v5 = vld [vmem:[%s5474_s8 + $0x270] sm:$0xff] }
 0x329   : > { %4212 = vrcp.f32 %v2178_v20 }
 0x32a   : > { %4214 = vrcp.f32 %v2357_v22  ;;  %3812 = vmatmul.mubr.msk.f32.vlgmr.msra.gmra.mrb[16].mxu1 %vm1614_vm1, %v1636_v19  ;;  %v3052_v19 = vld [vmem:[%s5474_s8 + $0x148] sm:$0xff]  ;;  %v3041_v22 = vld [vmem:[%s5474_s8 + $0xf0] sm:$0xff] }
 0x32b   : > { %v4205_v17 = vpop.eup %4204  ;;  %3820 = vmatpush3.msra.mxu1 %v4802_v57  ;;  %3821 = vmatprep.mubr.msk.f32.mxu1 %vm1614_vm1, %v1817_v16  ;;  %v3051_v16 = vld [vmem:[%s5474_s8 + $0x140] sm:$0xff] }
 0x32c   : > { %v4207_v49 = vpop.eup %4206  ;;  %v1818_v23 = vmul.f32 %v4205_v17, %v4911_v14  ;;  %3829 = vmatprep.subr.mxu1 %v4804_v59  ;;  %v2360_v25 = vpop.xlane.xlu1 %2359  ;;  %v4030_v20 = vpack.c.bf16 %v3052_v19, %v3051_v16  ;;  %v3042_v17 = vld [vmem:[%s5474_s8 + $0xf8] sm:$0xff] }
 0x32d   : > { %v2539_v31 = vpop.xlane.xlu0 %2538  ;;  %4216 = vrcp.f32 %v2360_v25  ;;  %v1999_v51 = vmul.f32 %v4207_v49, %v4913_v18  ;;  %v3069_v49 = vld [vmem:[%s5474_s8 + $0x1d0] sm:$0xff]  ;;  %v3070_v25 = vld [vmem:[%s5474_s8 + $0x1d8] sm:$0xff] }
 0x32e   : > { %4218 = vrcp.f32 %v2539_v31  ;;  %3822 = vmatmul.mubr.msk.f32.vlgmr.msra.gmra.mrb[18].mxu1 %vm1614_vm1, %v1818_v23  ;;  %v4008_v23 = vpack.c.bf16 %v3042_v17, %v3041_v22  ;;  %v3025_v31 = vld [vmem:[%s5474_s8 + $0x70] sm:$0xff]  ;;  %v3110_v22 = vld [vmem:[%s5474_s8 + $0x318] sm:$0xff]  ;;  %v3099_v17 = vld [vmem:[%s5474_s8 + $0x2c0] sm:$0xff] }
 0x32f   : > { %v4209_v28 = vpop.eup %4208  ;;  %3830 = vmatpush3.msra.mxu1 %v4804_v59  ;;  %3831 = vmatprep.mubr.msk.f32.mxu1 %vm1614_vm1, %v1999_v51  ;;  %v3026_v51 = vld [vmem:[%s5474_s8 + $0x78] sm:$0xff] }
 0x330   : > { %v4211_v57 = vpop.eup %4210  ;;  %v2000_v35 = vmul.f32 %v4209_v28, %v4921_v7  ;;  %3839 = vmatprep.subr.mxu1 %v4807_v61  ;;  %v2542_v14 = vpop.xlane.xlu1 %2541  ;;  %v4032_v28 = vpack.c.bf16 %v3070_v25, %v3069_v49  ;;  %4009 = vmatprep.subr.bf16.mxu0 %v4008_v23  ;;  %v3100_v23 = vld [vmem:[%s5474_s8 + $0x2c8] sm:$0xff]  ;;  %v3127_v25 = vld [vmem:[%s5474_s8 + $0x3a0] sm:$0xff] }
 0x331   : > { %v2721_v39 = vpop.xlane.xlu0 %2720  ;;  %4220 = vrcp.f32 %v2542_v14  ;;  %v2181_v40 = vmul.f32 %v4211_v57, %v4923_v37  ;;  %v4010_v57 = vpack.c.bf16 %v3026_v51, %v3025_v31  ;;  %v3054_v14 = vld [vmem:[%s5474_s8 + $0x158] sm:$0xff]  ;;  %v3128_v31 = vld [vmem:[%s5474_s8 + $0x3a8] sm:$0xff] }
 0x332   : > { %4222 = vrcp.f32 %v2721_v39  ;;  %3832 = vmatmul.mubr.msk.f32.vlgmr.msra.gmra.mrb[20].mxu1 %vm1614_vm1, %v2000_v35  ;;  %v3053_v35 = vld [vmem:[%s5474_s8 + $0x150] sm:$0xff] }
 0x333   : > { %v4213_v18 = vpop.eup %4212  ;;  %3840 = vmatpush3.msra.mxu1 %v4807_v61  ;;  %3841 = vmatprep.mubr.msk.f32.mxu1 %vm1614_vm1, %v2181_v40  ;;  %v4034_v39 = vpack.c.bf16 %v3054_v14, %v3053_v35  ;;  %v3071_v40 = vld [vmem:[%s5474_s8 + $0x1e0] sm:$0xff]  ;;  %v3084_v14 = vld [vmem:[%s5474_s8 + $0x248] sm:$0xff] }
 0x334   : > { %v4215_v59 = vpop.eup %4214  ;;  %v2182_v41 = vmul.f32 %v4213_v18, %v4931_v43  ;;  %3849 = vmatprep.subr.mxu1 %v4809_v63  ;;  %v2724_v7 = vpop.xlane.xlu1 %2723  ;;  %4011 = vmatpush3.bf16.msra.mxu0 %v4010_v57  ;;  %v3072_v18 = vld [vmem:[%s5474_s8 + $0x1e8] sm:$0xff]  ;;  %v3083_v35 = vld [vmem:[%s5474_s8 + $0x240] sm:$0xff] }
 0x335   : > { %v2903_v21 = vpop.xlane.xlu0 %2902  ;;  %4224 = vrcp.f32 %v2724_v7  ;;  %v2363_v30 = vmul.f32 %v4215_v59, %v4933_v45  ;;  %v3091_v59 = vld [vmem:[%s5474_s8 + $0x280] sm:$0xff]  ;;  %v3092_v7 = vld [vmem:[%s5474_s8 + $0x288] sm:$0xff] }
 0x336   : > { %4226 = vrcp.f32 %v2903_v21  ;;  %3842 = vmatmul.mubr.msk.f32.vlgmr.msra.gmra.mrb[22].mxu1 %vm1614_vm1, %v2182_v41  ;;  %v4036_v41 = vpack.c.bf16 %v3072_v18, %v3071_v40  ;;  %v3055_v21 = vld [vmem:[%s5474_s8 + $0x160] sm:$0xff]  ;;  %v4060_v40 = vpack.c.bf16 %v3100_v23, %v3099_v17  ;;  %v4084_v18 = vpack.c.bf16 %v3128_v31, %v3127_v25  ;;  %v3137_v17 = vld [vmem:[%s5474_s8 + $0x3f0] sm:$0xff] }
 0x337   : > { %v4217_v37 = vpop.eup %4216  ;;  %3850 = vmatpush3.msra.mxu1 %v4809_v63  ;;  %3851 = vmatprep.mubr.msk.f32.mxu1 %vm1614_vm1, %v2363_v30  ;;  %v3056_v30 = vld [vmem:[%s5474_s8 + $0x168] sm:$0xff]  ;;  %v3121_v31 = vld [vmem:[%s5474_s8 + $0x370] sm:$0xff] }
 0x338   : > { %v4219_v61 = vpop.eup %4218  ;;  %v2364_v42 = vmul.f32 %v4217_v37, %v4940_v24  ;;  %3859 = vmatprep.subr.mxu1 %v4811_v1  ;;  %v2906_v43 = vpop.xlane.xlu1 %2905  ;;  %v4044_v37 = vpack.c.bf16 %v3092_v7, %v3091_v59  ;;  %v3111_v59 = vld [vmem:[%s5474_s8 + $0x320] sm:$0xff]  ;;  %v3101_v7 = vld [vmem:[%s5474_s8 + $0x2d0] sm:$0xff] }
 0x339   : > { %4228 = vrcp.f32 %v2906_v43  ;;  %v2545_v44 = vmul.f32 %v4219_v61, %v4942_v53  ;;  %v3060_v53 = vld [vmem:[%s5474_s8 + $0x188] sm:$0xff]  ;;  %v4038_v61 = vpack.c.bf16 %v3056_v30, %v3055_v21  ;;  %v3074_v43 = vld [vmem:[%s5474_s8 + $0x1f8] sm:$0xff]  ;;  %v3129_v30 = vld [vmem:[%s5474_s8 + $0x3b0] sm:$0xff] }
 0x33a   : > { %3852 = vmatmul.mubr.msk.f32.vlgmr.msra.gmra.mrb[24].mxu1 %vm1614_vm1, %v2364_v42  ;;  %4045 = vmatprep.subr.bf16.mxu0 %v4044_v37  ;;  %v3073_v42 = vld [vmem:[%s5474_s8 + $0x1f0] sm:$0xff]  ;;  %v3102_v21 = vld [vmem:[%s5474_s8 + $0x2d8] sm:$0xff] }
 0x33b   : > { %v4221_v45 = vpop.eup %4220  ;;  %3860 = vmatpush3.msra.mxu1 %v4811_v1  ;;  %3861 = vmatprep.mubr.msk.f32.mxu1 %vm1614_vm1, %v2545_v44  ;;  %v4040_v44 = vpack.c.bf16 %v3074_v43, %v3073_v42  ;;  %v3130_v37 = vld [vmem:[%s5474_s8 + $0x3b8] sm:$0xff]  ;;  %v4062_v42 = vpack.c.bf16 %v3084_v14, %v3083_v35 }
 0x33c   : > { %v4223_v29 = vpop.eup %4222  ;;  %v2546_v63 = vmul.f32 %v4221_v45, %v4948_v32  ;;  %3869 = vmatprep.subr.mxu1 %v4818_v4  ;;  %v3057_v45 = vld [vmem:[%s5474_s8 + $0x170] sm:$0xff] }
 0x33d   : > { %v2727_v24 = vmul.f32 %v4223_v29, %v4950_v55  ;;  %v4012_v55 = vpack.c.bf16 %v3060_v53, %v3059_v46  ;;  %v3058_v29 = vld [vmem:[%s5474_s8 + $0x178] sm:$0xff]  ;;  %v3124_v46 = vld [vmem:[%s5474_s8 + $0x388] sm:$0xff] }
 0x33e   : > { %3862 = vmatmul.mubr.msk.f32.vlgmr.msra.gmra.mrb[26].mxu1 %vm1614_vm1, %v2546_v63  ;;  %v4042_v63 = vpack.c.bf16 %v3058_v29, %v3057_v45  ;;  %v3086_v45 = vld [vmem:[%s5474_s8 + $0x258] sm:$0xff] }
 0x33f   : > { %v4225_v1 = vpop.eup %4224  ;;  %3870 = vmatpush3.msra.mxu1 %v4818_v4  ;;  %3871 = vmatprep.mubr.msk.f32.mxu1 %vm1614_vm1, %v2727_v24  ;;  %v3061_v4 = vld [vmem:[%s5474_s8 + $0x190] sm:$0xff]  ;;  %v3123_v24 = vld [vmem:[%s5474_s8 + $0x380] sm:$0xff] }
 0x340   : > { %v4227_v32 = vpop.eup %4226  ;;  %v2728_v47 = vmul.f32 %v4225_v1, %v4956_v27  ;;  %3879 = vmatprep.subr.mxu1 %v4821_v6  ;;  %v3062_v27 = vld [vmem:[%s5474_s8 + $0x198] sm:$0xff]  ;;  %v4076_v53 = vpack.c.bf16 %v3124_v46, %v3123_v24  ;;  %v4088_v24 = vpack.c.bf16 %v3130_v37, %v3129_v30  ;;  %v3113_v46 = vld [vmem:[%s5474_s8 + $0x330] sm:$0xff] }
 0x341   : > { %v2909_v52 = vmul.f32 %v4227_v32, %v4958_v60  ;;  %v4016_v60 = vpack.c.bf16 %v3062_v27, %v3061_v4 }
 0x342   : > { %3872 = vmatmul.mubr.msk.f32.vlgmr.msra.gmra.mrb[28].mxu1 %vm1614_vm1, %v2728_v47  ;;  %v3075_v47 = vld [vmem:[%s5474_s8 + $0x200] sm:$0xff] }
 0x343   : > { %v4229_v54 = vpop.eup %4228  ;;  %3880 = vmatpush3.msra.mxu1 %v4821_v6  ;;  %3881 = vmatprep.mubr.msk.f32.mxu1 %vm1614_vm1, %v2909_v52  ;;  %v3064_v6 = vld [vmem:[%s5474_s8 + $0x1a8] sm:$0xff] }
 0x344   : > { %v2910_v56 = vmul.f32 %v4229_v54, %v4964_v3  ;;  %4013 = vmatprep.subr.bf16.mxu1 %v4012_v55  ;;  %v4018_v3 = vpack.c.bf16 %v3046_v62, %v3045_v58  ;;  %v4020_v33 = vpack.c.bf16 %v3064_v6, %v3063_v0  ;;  %v3076_v55 = vld [vmem:[%s5474_s8 + $0x208] sm:$0xff]  ;;  %v4048_v54 = vpack.c.bf16 %v3094_v36, %v3093_v26  ;;  %v3079_v6 = vld [vmem:[%s5474_s8 + $0x220] sm:$0xff] }
 0x345   : > { %v4046_v4 = vpack.c.bf16 %v3076_v55, %v3075_v47  ;;  %v3096_v58 = vld [vmem:[%s5474_s8 + $0x2a8] sm:$0xff]  ;;  %v4054_v11 = vpack.c.bf16 %v3080_v50, %v3079_v6  ;;  %v3131_v47 = vld [vmem:[%s5474_s8 + $0x3c0] sm:$0xff]  ;;  %v3133_v6 = vld [vmem:[%s5474_s8 + $0x3d0] sm:$0xff] }
 0x346   : > { %3882 = vmatmul.mubr.msk.f32.vlgmr.msra.gmra.mrb[30].mxu1 %vm1614_vm1, %v2910_v56  ;;  %v3078_v56 = vld [vmem:[%s5474_s8 + $0x218] sm:$0xff]  ;;  %v3132_v55 = vld [vmem:[%s5474_s8 + $0x3c8] sm:$0xff] }
 0x347   : > { %4015 = vmatpush3.bf16.msra.mxu1 %v4014_v48  ;;  %v3077_v48 = vld [vmem:[%s5474_s8 + $0x210] sm:$0xff] }
 0x348   : > { %4017 = vmatprep.subr.bf16.mxu1 %v4016_v60  ;;  %v3095_v60 = vld [vmem:[%s5474_s8 + $0x2a0] sm:$0xff]  ;;  %v4050_v0 = vpack.c.bf16 %v3078_v56, %v3077_v48  ;;  %v4092_v56 = vpack.c.bf16 %v3132_v55, %v3131_v47 }
 0x34b   : > { %4019 = vmatpush3.bf16.msra.mxu1 %v4018_v3 }
 0x34c   : > { %4021 = vmatprep.subr.bf16.mxu1 %v4020_v33  ;;  %v4052_v33 = vpack.c.bf16 %v3096_v58, %v3095_v60  ;;  %v3115_v60 = vld [vmem:[%s5474_s8 + $0x340] sm:$0xff]  ;;  %v3116_v58 = vld [vmem:[%s5474_s8 + $0x348] sm:$0xff] }
 0x34d   : > { %v4094_v38 = vpack.c.bf16 %v3116_v58, %v3115_v60 }
 0x34f   : > { %4023 = vmatpush3.bf16.msra.mxu1 %v4022_v2  ;;  %v3098_v2 = vld [vmem:[%s5474_s8 + $0x2b8] sm:$0xff] }
 0x350   : > { %4025 = vmatprep.subr.bf16.mxu1 %v4024_v8  ;;  %v3125_v8 = vld [vmem:[%s5474_s8 + $0x390] sm:$0xff]  ;;  %v4056_v19 = vpack.c.bf16 %v3098_v2, %v3097_v34 }
 0x351   : > { %v4080_v49 = vpack.c.bf16 %v3126_v9, %v3125_v8  ;;  %v3090_v9 = vld [vmem:[%s5474_s8 + $0x278] sm:$0xff] }
 0x353   : > { %4027 = vmatpush3.bf16.msra.mxu1 %v4026_v13  ;;  %v3081_v13 = vld [vmem:[%s5474_s8 + $0x230] sm:$0xff] }
 0x354   : > { %4029 = vmatprep.subr.bf16.mxu1 %v4028_v15  ;;  %v3082_v15 = vld [vmem:[%s5474_s8 + $0x238] sm:$0xff] }
 0x357   : > { %4031 = vmatpush3.bf16.msra.mxu1 %v4030_v20  ;;  %v3109_v20 = vld [vmem:[%s5474_s8 + $0x310] sm:$0xff] }
 0x358   : > { %4033 = vmatprep.subr.bf16.mxu1 %v4032_v28  ;;  %v4058_v28 = vpack.c.bf16 %v3082_v15, %v3081_v13  ;;  %v4082_v57 = vpack.c.bf16 %v3110_v22, %v3109_v20  ;;  %v3136_v13 = vld [vmem:[%s5474_s8 + $0x3e8] sm:$0xff]  ;;  %v4074_v15 = vpack.c.bf16 %v3090_v9, %v3089_v5  ;;  %v3119_v20 = vld [vmem:[%s5474_s8 + $0x360] sm:$0xff] }
 0x359   : > { %v3120_v22 = vld [vmem:[%s5474_s8 + $0x368] sm:$0xff] }
 0x35a   : > { %v4102_v23 = vpack.c.bf16 %v3120_v22, %v3119_v20 }
 0x35b   : > { %4035 = vmatpush3.bf16.msra.mxu1 %v4034_v39 }
 0x35c   : > { %4037 = vmatprep.subr.bf16.mxu1 %v4036_v41  ;;  %v3112_v41 = vld [vmem:[%s5474_s8 + $0x328] sm:$0xff] }
 0x35d   : > { %v4086_v43 = vpack.c.bf16 %v3112_v41, %v3111_v59 }
 0x35f   : > { %4039 = vmatpush3.bf16.msra.mxu1 %v4038_v61 }
 0x360   : > { %4041 = vmatprep.subr.bf16.mxu1 %v4040_v44  ;;  %v3085_v44 = vld [vmem:[%s5474_s8 + $0x250] sm:$0xff] }
 0x361   : > { %v4066_v36 = vpack.c.bf16 %v3086_v45, %v3085_v44 }
 0x363   : > { %4043 = vmatpush3.bf16.msra.mxu1 %v4042_v63  ;;  %v4064_v63 = vpack.c.bf16 %v3102_v21, %v3101_v7 }
 0x364   : > { %4077 = vmatprep.subr.bf16.mxu1 %v4076_v53  ;;  %v3114_v53 = vld [vmem:[%s5474_s8 + $0x338] sm:$0xff] }
 0x3fd   : > { %v3813_v1 = vpop.f32.mrb[16].mxu1 }
 0x3fe   : > { %v1710_v32 = vpop.f32.mrb[17].mxu1 }
 0x401   : > { %v3823_v52 = vpop.f32.mrb[18].mxu1 }
 0x402   : > { %v1892_v27 = vpop.f32.mrb[19].mxu1 }
 0x403   : > { %3210 = vmatprep.mubr.f32.mxu0 %v1892_v27  ;;  %v3088_v27 = vld [vmem:[%s5474_s8 + $0x268] sm:$0xff] }
 0x404   : > { %3211 = vmatmul.mubr.f32.vlgmr.msra.gmra.mrb[32].mxu0 %v1710_v32  ;;  %v3104_v32 = vld [vmem:[%s5474_s8 + $0x2e8] sm:$0xff] }
 0x405   : > { %4047 = vmatpush3.bf16.msra.mxu0 %v4046_v4  ;;  %v3833_v62 = vpop.f32.mrb[20].mxu1  ;;  %3215 = vmatprep.mubr.f32.mxu0 %v3823_v52  ;;  %v4090_v52 = vpack.c.bf16 %v3114_v53, %v3113_v46  ;;  %v3087_v4 = vld [vmem:[%s5474_s8 + $0x260] sm:$0xff] }
 0x406   : > { %v2074_v3 = vpop.f32.mrb[21].mxu1  ;;  %4049 = vmatprep.subr.bf16.mxu0 %v4048_v54  ;;  %v4070_v50 = vpack.c.bf16 %v3088_v27, %v3087_v4 }
 0x408   : > { %3216 = vmatmul.mubr.f32.gmra.mrb[34].mxu0 %v3813_v1  ;;  %v3103_v1 = vld [vmem:[%s5474_s8 + $0x2e0] sm:$0xff] }
 0x409   : > { %4051 = vmatpush3.bf16.msra.mxu0 %v4050_v0  ;;  %v3843_v10 = vpop.f32.mrb[22].mxu1  ;;  %v4068_v48 = vpack.c.bf16 %v3104_v32, %v3103_v1  ;;  %v3106_v0 = vld [vmem:[%s5474_s8 + $0x2f8] sm:$0xff] }
 0x40a   : > { %v2256_v16 = vpop.f32.mrb[23].mxu1  ;;  %4053 = vmatprep.subr.bf16.mxu0 %v4052_v33 }
 0x40b   : > { %3285 = vmatprep.mubr.f32.mxu1 %v2256_v16 }
 0x40c   : > { %3286 = vmatmul.mubr.f32.vlgmr.msra.gmra.mrb[32].mxu1 %v2074_v3  ;;  %v3134_v3 = vld [vmem:[%s5474_s8 + $0x3d8] sm:$0xff] }
 0x40d   : > { %4055 = vmatpush3.bf16.msra.mxu0 %v4054_v11  ;;  %4079 = vmatpush3.bf16.msra.mxu1 %v4078_v12  ;;  %v5289_v51 = vpop.f32.mrb[24].mxu1  ;;  %v4096_v8 = vpack.c.bf16 %v3134_v3, %v3133_v6  ;;  %v3118_v11 = vld [vmem:[%s5474_s8 + $0x358] sm:$0xff]  ;;  %v3135_v12 = vld [vmem:[%s5474_s8 + $0x3e0] sm:$0xff] }
 0x40e   : > { %3290 = vmatprep.mubr.f32.mxu1 %v3843_v10  ;;  %v5297_v39 = vpop.f32.mrb[25].mxu1  ;;  %4057 = vmatprep.subr.bf16.mxu0 %v4056_v19  ;;  %v3117_v10 = vld [vmem:[%s5474_s8 + $0x350] sm:$0xff]  ;;  %v4100_v19 = vpack.c.bf16 %v3136_v13, %v3135_v12 }
 0x40f   : > { %4081 = vmatprep.subr.bf16.mxu1 %v4080_v49  ;;  %v4098_v16 = vpack.c.bf16 %v3118_v11, %v3117_v10  ;;  %v3138_v49 = vld [vmem:[%s5474_s8 + $0x3f8] sm:$0xff] }
 0x410   : > { %3291 = vmatmul.mubr.f32.gmra.mrb[34].mxu1 %v3833_v62  ;;  %v3105_v62 = vld [vmem:[%s5474_s8 + $0x2f0] sm:$0xff]  ;;  %v4104_v25 = vpack.c.bf16 %v3138_v49, %v3137_v17 }
 0x411   : > { %4059 = vmatpush3.bf16.msra.mxu0 %v4058_v28  ;;  %4083 = vmatpush3.bf16.msra.mxu1 %v4082_v57  ;;  %v5317_v61 = vpop.f32.mrb[26].mxu1  ;;  %v4072_v2 = vpack.c.bf16 %v3106_v0, %v3105_v62  ;;  %v3122_v28 = vld [vmem:[%s5474_s8 + $0x378] sm:$0xff] }
 0x412   : > { %v2620_v29 = vpop.f32.mrb[27].mxu1  ;;  %4061 = vmatprep.subr.bf16.mxu0 %v4060_v40  ;;  %4085 = vmatprep.subr.bf16.mxu1 %v4084_v18  ;;  %v4106_v57 = vpack.c.bf16 %v3122_v28, %v3121_v31 }
 0x413   : > { %3360 = vmatprep.mubr.f32.mxu0 %v2620_v29 }
 0x415   : > { %4063 = vmatpush3.bf16.msra.mxu0 %v4062_v42  ;;  %4087 = vmatpush3.bf16.msra.mxu1 %v4086_v43  ;;  %v3873_v26 = vpop.f32.mrb[28].mxu1 }
 0x416   : > { %v2802_v54 = vpop.f32.mrb[29].mxu1  ;;  %4065 = vmatprep.subr.bf16.mxu0 %v4064_v63  ;;  %4089 = vmatprep.subr.bf16.mxu1 %v4088_v24 }
 0x419   : > { %4067 = vmatpush3.bf16.msra.mxu0 %v4066_v36  ;;  %4091 = vmatpush3.bf16.msra.mxu1 %v4090_v52  ;;  %v3883_v33 = vpop.f32.mrb[30].mxu1 }
 0x41a   : > { %v2984_v34 = vpop.f32.mrb[31].mxu1  ;;  %4069 = vmatprep.subr.bf16.mxu0 %v4068_v48  ;;  %4093 = vmatprep.subr.bf16.mxu1 %v4092_v56 }
 0x41b   : > { %3435 = vmatprep.mubr.f32.mxu1 %v2984_v34 }
 0x41d   : > { %4071 = vmatpush3.bf16.msra.mxu0 %v4070_v50  ;;  %4095 = vmatpush3.bf16.msra.mxu1 %v4094_v38 }
 0x41e   : > { %4073 = vmatprep.subr.bf16.mxu0 %v4072_v2  ;;  %4097 = vmatprep.subr.bf16.mxu1 %v4096_v8 }
 0x421   : > { %4075 = vmatpush3.bf16.msra.mxu0 %v4074_v15  ;;  %4099 = vmatpush3.bf16.msra.mxu1 %v4098_v16 }
 0x422   : > { %4101 = vmatprep.subr.bf16.mxu1 %v4100_v19 }
 0x424   : > { %3361 = vmatmul.mubr.f32.vlgmr.msra.gmra.mrb[36].mxu0 %v5297_v39  ;;  %v3596_v39 = vld [vmem:[%s5475_s9] ss:$0 sm:$0xff] }
 0x425   : > { %3365 = vmatprep.mubr.f32.mxu0 %v5317_v61  ;;  %4103 = vmatpush3.bf16.msra.mxu1 %v4102_v23 }
 0x426   : > { %4105 = vmatprep.subr.bf16.mxu1 %v4104_v25 }
 0x428   : > { %3366 = vmatmul.mubr.f32.gmra.mrb[38].mxu0 %v5289_v51 }
 0x429   : > { %4107 = vmatpush3.bf16.msra.mxu1 %v4106_v57 }
 0x42c   : > { %3436 = vmatmul.mubr.f32.vlgmr.msra.gmra.mrb[36].mxu1 %v2802_v54 }
 0x42d   : > { %3440 = vmatprep.mubr.f32.mxu1 %v3883_v33 }
 0x430   : > { %3441 = vmatmul.mubr.f32.gmra.mrb[38].mxu1 %v3873_v26 }
 0x4d7   : > { %v3684_v35 = vpop.f32.mrb[32].mxu0 }
 0x4d8   : > { %v3685_v14 = vpop.f32.mrb[33].mxu0 }
 0x4d9   : > { %v3686_v40 = vadd.f32 %v3685_v14, %v3684_v35 }
 0x4db   : > { %v3687_v18 = vpop.f32.mrb[34].mxu0  ;;  %v3213_v30 = vadd.f32 %v3686_v40, %v3596_v39 }
 0x4dc   : > { %v3688_v59 = vpop.f32.mrb[35].mxu0 }
 0x4dd   : > { %v3689_v41 = vadd.f32 %v3688_v59, %v3687_v18 }
 0x4df   : > { %v3722_v7 = vpop.f32.mrb[32].mxu1  ;;  %v3218_v43 = vadd.f32 %v3689_v41, %v3596_v39 }
 0x4e0   : > { %v3723_v21 = vpop.f32.mrb[33].mxu1 }
 0x4e1   : > { %v3724_v37 = vadd.f32 %v3723_v21, %v3722_v7 }
 0x4e3   : > { %v3288_v51 = vadd.f32 %v3724_v37, %v3213_v30  ;;  %v3725_v61 = vpop.f32.mrb[34].mxu1 }
 0x4e4   : > { %v3726_v42 = vpop.f32.mrb[35].mxu1 }
 0x4e5   : > { %v3727_v44 = vadd.f32 %v3726_v42, %v3725_v61 }
 0x4e7   : > { %v3293_v45 = vadd.f32 %v3727_v44, %v3218_v43 }
 0x4f7   : > { %v3760_v29 = vpop.f32.mrb[36].mxu0 }
 0x4f8   : > { %v3761_v63 = vpop.f32.mrb[37].mxu0 }
 0x4f9   : > { %v3762_v24 = vadd.f32 %v3761_v63, %v3760_v29 }
 0x4fb   : > { %v3363_v46 = vadd.f32 %v3762_v24, %v3288_v51  ;;  %v3763_v53 = vpop.f32.mrb[38].mxu0 }
 0x4fc   : > { %v3764_v1 = vpop.f32.mrb[39].mxu0 }
 0x4fd   : > { %v3765_v32 = vadd.f32 %v3764_v1, %v3763_v53 }
 0x4ff   : > { %v3368_v47 = vadd.f32 %v3765_v32, %v3293_v45  ;;  %v3798_v55 = vpop.f32.mrb[36].mxu1 }
 0x500   : > { %v3799_v26 = vpop.f32.mrb[37].mxu1 }
 0x501   : > { %v3800_v36 = vadd.f32 %v3799_v26, %v3798_v55 }
 0x503   : > { %v3438_v52 = vadd.f32 %v3800_v36, %v3363_v46  ;;  %v3801_v4 = vpop.f32.mrb[38].mxu1 }
 0x504   : > { %v3802_v27 = vpop.f32.mrb[39].mxu1 }
 0x505   : > { %3446 = vst.msk [vmem:[%s390_s12] sm:$0xff] %vm485_vm0, %v3438_v52  ;;  %v3803_v54 = vadd.f32 %v3802_v27, %v3801_v4 }
 0x507   : > { %v3443_v48 = vadd.f32 %v3803_v54, %v3368_v47 }
 0x509   : > { %3447 = vst.msk [vmem:[%s390_s12 + $0x8] sm:$0xff] %vm485_vm0, %v3443_v48 }
 0x50a   : > { %4243 = shalt.err (!%p4240_p5)
}
 0x50b   : > { %s4244_s19 = scalar_lea.hbm %s5415_s29, 256  ;;  %s4248_s12 = scalar_lea.hbm %s5476_s10, 512 }
 0x50c   : > { %p4245_p6 = scmp.ne.s32.totalorder %s5415_s29, %s4244_s19  ;;  %p4249_p10 = scmp.lt.u32.totalorder %s5415_s29, %s5476_s10 }
 0x50d   : > { %p4250_p11 = scmp.lt.u32.totalorder %s4248_s12, %s4244_s19  ;;  %p4252_p13 = scmp.lt.u32.totalorder %s4244_s19, %s5415_s29 }
 0x50e   : > { %p4246_p7 = pnand %p4245_p6, %p4409_p4 }
 0x50f   : > { %p4251_p12 = por %p4250_p11, %p4249_p10 }
 0x510   : > { %p4247_p9 = pneg %p4246_p7 }
 0x511   : > { %p4253_p0 = por %p4252_p13, %p4251_p12 }
 0x513   : > { %p4254_p1 = pnand %p4253_p0, %p4247_p9 }
 0x515   : > { %4257 = shalt.err (!%p4254_p1)
}
 0x516   : > { %s4312_s11 = smov 128   ;;  %s4313_s16 = smov 8  }
 0x517   : > { %4108 = dma.vmem_to_hbm [thread:$0]  (%p4409_p4), %s5417_s20, 256, %s5415_s29, %s5420_s21, %s4312_s11, %s4312_s11, %s4313_s16  }
 0x518 PF: > { %p4114_p2 = scmp.ge.s32.totalorder %s4308_s18, 2  ;;  %s3479_s22 = sand.u32 1, %s4288_s13  }
 0x519   : > { %s3480_s26 = scalar_lea.sflag [#allocation6], %s3479_s22 }
 0x51a   : > { %p4111_p3 = pnand %p4114_p2, %p4416_p8 }
 0x51c   : > { %4283 = dma.done.wait (!%p4111_p3), %s3480_s26, 256  }
 0x51d   : > { %4285 = vsyncadd (!%p4111_p3), %s3480_s26, 4294967040  ;;  %s23_s18 = sadd.s32 1, %s4308_s18   ;;  %s5484_s28 = sld [smem:[#allocation10_spill]] }
 0x51e   : > { %p20_p5 = scmp.ge.s32.totalorder %s23_s18, 4   ;;  %s5485_s16 = sld [smem:[#allocation8_spill]] }
 0x51f   : > { %s5486_s17 = sld [smem:[#allocation9_spill]]  ;;  %s5487_s13 = smov %s4292_s14 }
 0x520   : > { %s5488_s14 = smov %s4296_s15  ;;  %22 = sbr.rel (!%p20_p5) target bundleno = 4 (0x4), region = 102 }
 0x523   : > { %s5489_s15 = smov %s5484_s28 }
 0x527   :  { %3485 = vsyncpa [#allocation6], 1 }
 0x528   :  { %3487 = vsyncpa [#allocation6 + $0x1], 1 }

</bundles_post_ra>
